<compile_context>
chip_gen: v5e
topology: v5e:2x2
jax: 0.10.0
libtpu: 0.0.40
codegen_flags: <defaults>
</compile_context>

<pallas_src>
import jax
import jax.numpy as jnp
from jax.experimental import pallas as pl
from jax.experimental.pallas import tpu as pltpu


def _round_up(x, m):
    return (x + m - 1) // m * m


def vae_kernel(x_ref, wq1_ref, bq1_ref, wq2_ref, bq2_ref,
               eps_ref, wp1_ref, bp1_ref, wp2_ref, bp2_ref,
               out_ref, mu_ref, logvar_ref,
               acc_ref, ssq_ref, d1_ref):
    phase = pl.program_id(1)          # 0: encoder reduction, 1: decoder output
    j = pl.program_id(2)              # item tile
    n_item_tiles = pl.num_programs(2)
    Lp = mu_ref.shape[-1]             # padded latent dim (multiple of 128)

    # ---------------- phase 0: stream item tiles, accumulate encoder L1 -------
    @pl.when(phase == 0)
    def _phase0():
        @pl.when(j == 0)
        def _init():
            acc_ref[...] = jnp.zeros_like(acc_ref)
            ssq_ref[...] = jnp.zeros_like(ssq_ref)

        x = x_ref[...]                                            # (TB, TN) bf16
        xf = x.astype(jnp.float32)
        ssq_ref[...] += jnp.sum(xf * xf, axis=1, keepdims=True)
        acc_ref[...] += jnp.dot(x, wq1_ref[...],
                                preferred_element_type=jnp.float32)

        # Last item tile: finish encoder, reparameterize, decoder hidden layer.
        @pl.when(j == n_item_tiles - 1)
        def _finish_encoder():
            # F.normalize: x / max(||x||, 1e-12) == (x @ W) * rsqrt(max(ssq, 1e-24))
            inv_norm = jax.lax.rsqrt(jnp.maximum(ssq_ref[...], 1e-24))
            h1 = jnp.tanh(acc_ref[...] * inv_norm + bq1_ref[...])    # (TB, H1p)
            h1b = h1.astype(jnp.bfloat16)
            # Fused mu/logvar GEMM; split at Lp is vreg-aligned (Lp % 128 == 0).
            ml = jnp.dot(h1b, wq2_ref[...],
                         preferred_element_type=jnp.float32) + bq2_ref[...]
            mu = ml[:, :Lp]
            logvar = ml[:, Lp:]
            mu_ref[...] = mu
            logvar_ref[...] = logvar
            z = mu + eps_ref[...] * jnp.exp(0.5 * logvar)             # (TB, Lp)
            d1 = jnp.tanh(jnp.dot(z.astype(jnp.bfloat16), wp1_ref[...],
                                  preferred_element_type=jnp.float32) + bp1_ref[...])
            d1_ref[...] = d1.astype(d1_ref.dtype)

    # ---------------- phase 1: emit decoder output item tiles ------------------
    @pl.when(phase == 1)
    def _phase1():
        y = jnp.dot(d1_ref[...], wp2_ref[...], preferred_element_type=jnp.float32)
        out_ref[...] = (y + bp2_ref[...]).astype(out_ref.dtype)


def vae_forward(x, params, eps, *, tile_n=None, tile_b=None):
    """Fused Mult-VAE forward. Returns (recon, mu, logvar)."""
    wq1, bq1, wq2, bq2, wp1, bp1, wp2, bp2 = params
    B, N = x.shape
    H1 = wq1.shape[1]
    L = wp1.shape[0]
    assert wq1.shape == (N, H1) and wq2.shape == (H1, 2 * L)
    assert wp1.shape == (L, H1) and wp2.shape == (H1, N)
    assert eps.shape == (B, L)

    LANE, SUB = 128, 8
    H1p = _round_up(H1, LANE)     # 500 -> 512: full-lane MXU passes
    Lp = _round_up(L, LANE)       # 250 -> 256: aligned mu/logvar split & stores

    # Tile selection (review: big batch tile, 1-2K item tile).
    if tile_b is None:
        tile_b = min(256, _round_up(B, SUB))
    tile_b = max(SUB, (tile_b // SUB) * SUB)
    if tile_n is None:
        tile_n = min(2048, _round_up(N, LANE))
    tile_n = max(LANE, (tile_n // LANE) * LANE)

    Bp = _round_up(B, tile_b)
    Np = _round_up(N, tile_n)
    n_bt = Bp // tile_b
    n_nt = Np // tile_n

    def pad2(a, r, c):
        return jnp.pad(a, ((0, r - a.shape[0]), (0, c - a.shape[1])))

    # bf16 matmul operands (f32 accumulation); biases stay f32. Zero padding is
    # exact: padded rows/cols contribute nothing to ssq or any matmul.
    x_bf = pad2(x, Bp, Np).astype(jnp.bfloat16)
    wq1_bf = pad2(wq1, Np, H1p).astype(jnp.bfloat16)
    bq1_p = pad2(bq1, 1, H1p)
    wq2_p = jnp.concatenate(
        [pad2(wq2[:, :L], H1p, Lp), pad2(wq2[:, L:], H1p, Lp)],
        axis=1).astype(jnp.bfloat16)                       # (H1p, 2*Lp)
    bq2_p = jnp.concatenate(
        [pad2(bq2[:, :L], 1, Lp), pad2(bq2[:, L:], 1, Lp)], axis=1)
    eps_p = pad2(eps, Bp, Lp)
    wp1_bf = pad2(wp1, Lp, H1p).astype(jnp.bfloat16)
    bp1_p = pad2(bp1, 1, H1p)
    wp2_bf = pad2(wp2, H1p, Np).astype(jnp.bfloat16)
    bp2_p = pad2(bp2, 1, Np)

    # Block-index helpers. b: batch block, p: phase, j: item tile.
    # Encoder operands stay pinned on their last tile during phase 1 (no re-DMA);
    # decoder operands stay pinned on tile 0 during phase 0.
    enc_tile = lambda p, j: j * (1 - p) + (n_nt - 1) * p
    dec_tile = lambda p, j: j * p

    in_specs = [
        pl.BlockSpec((tile_b, tile_n), lambda b, p, j: (b, enc_tile(p, j))),  # x (bf16)
        pl.BlockSpec((tile_n, H1p),    lambda b, p, j: (enc_tile(p, j), 0)),  # Wq1 (bf16)
        pl.BlockSpec((1, H1p),         lambda b, p, j: (0, 0)),               # bq1
        pl.BlockSpec((H1p, 2 * Lp),    lambda b, p, j: (0, 0)),               # Wq2 (bf16, fused mu|logvar)
        pl.BlockSpec((1, 2 * Lp),      lambda b, p, j: (0, 0)),               # bq2
        pl.BlockSpec((tile_b, Lp),     lambda b, p, j: (b, 0)),               # eps
        pl.BlockSpec((Lp, H1p),        lambda b, p, j: (0, 0)),               # Wp1 (bf16)
        pl.BlockSpec((1, H1p),         lambda b, p, j: (0, 0)),               # bp1
        pl.BlockSpec((H1p, tile_n),    lambda b, p, j: (0, dec_tile(p, j))),  # Wp2 (bf16)
        pl.BlockSpec((1, tile_n),      lambda b, p, j: (0, dec_tile(p, j))),  # bp2
    ]
    out_specs = [
        pl.BlockSpec((tile_b, tile_n), lambda b, p, j: (b, dec_tile(p, j))),  # recon
        pl.BlockSpec((tile_b, Lp),     lambda b, p, j: (b, 0)),               # mu
        pl.BlockSpec((tile_b, Lp),     lambda b, p, j: (b, 0)),               # logvar
    ]

    # Honest advisory cost model: big weights (and bp2) are re-streamed once per
    # batch block; small weights/biases are pinned (DMA'd once); rsqrt counted.
    flops = 2 * Bp * (Np * H1p + H1p * 2 * Lp + Lp * H1p + H1p * Np)
    transcendentals = Bp * (2 * H1p + Lp + 1)
    bytes_accessed = (
        x_bf.size * 2                                              # x stream (bf16, once)
        + n_bt * (wq1_bf.size * 2 + wp2_bf.size * 2 + bp2_p.size * 4)
        + (wq2_p.size + wp1_bf.size) * 2
        + (bq1_p.size + bq2_p.size + bp1_p.size) * 4
        + eps_p.size * 4
        + Bp * Np * 4                                              # recon out
        + 2 * Bp * Lp * 4                                          # mu, logvar out
    )

    recon, mu, logvar = pl.pallas_call(
        vae_kernel,
        out_shape=(jax.ShapeDtypeStruct((Bp, Np), jnp.float32),
                   jax.ShapeDtypeStruct((Bp, Lp), jnp.float32),
                   jax.ShapeDtypeStruct((Bp, Lp), jnp.float32)),
        grid_spec=pltpu.PrefetchScalarGridSpec(
            num_scalar_prefetch=0,
            grid=(n_bt, 2, n_nt),
            in_specs=in_specs,
            out_specs=out_specs,
            scratch_shapes=[
                pltpu.VMEM((tile_b, H1p), jnp.float32),   # encoder L1 accumulator
                pltpu.VMEM((tile_b, 1), jnp.float32),     # per-row sum of squares
                pltpu.VMEM((tile_b, H1p), jnp.bfloat16),  # decoder hidden state
            ]),
        compiler_params=pltpu.CompilerParams(
            dimension_semantics=("parallel", "arbitrary", "arbitrary"),
            # 32 MiB: lifts v5e's 16 MiB default so the big-tile config compiles
            # there; matches the v6e/v7x default and stays well under v7x's
            # 64 MiB physical VMEM.
            vmem_limit_bytes=32 * 1024 * 1024),
        cost_estimate=pl.CostEstimate(flops=flops,
                                      transcendentals=transcendentals,
                                      bytes_accessed=bytes_accessed),
    )(x_bf, wq1_bf, bq1_p, wq2_p, bq2_p, eps_p, wp1_bf, bp1_p, wp2_bf, bp2_p)

    return recon[:B, :N], mu[:B, :L], logvar[:B, :L]


def reference_forward(x, params, eps):
    """Pure-JAX reference mirroring the kernel's bf16-operand / f32-accumulate math."""
    wq1, bq1, wq2, bq2, wp1, bp1, wp2, bp2 = params
    L = wp1.shape[0]
    bf = lambda a: a.astype(jnp.bfloat16)
    dot = lambda a, b: jnp.dot(bf(a), bf(b), preferred_element_type=jnp.float32)

    xb = x.astype(jnp.bfloat16).astype(jnp.float32)        # kernel streams x as bf16
    ssq = jnp.sum(xb * xb, axis=1, keepdims=True)
    inv_norm = jax.lax.rsqrt(jnp.maximum(ssq, 1e-24))      # F.normalize (L2, eps=1e-12)
    h1 = jnp.tanh(dot(x, wq1) * inv_norm + bq1)
    mu = dot(h1, wq2[:, :L]) + bq2[:, :L]
    logvar = dot(h1, wq2[:, L:]) + bq2[:, L:]
    z = mu + eps * jnp.exp(0.5 * logvar)
    d1 = jnp.tanh(dot(z, wp1) + bp1)
    out = dot(d1, wp2) + bp2
    return out, mu, logvar


if __name__ == "__main__":
    # Small but representative shapes; hidden sizes are the module defaults
    # p_dims = [250, 500, n_items].  n_items/B deliberately not multiples of
    # 128/8 so the padding path is exercised.
    n_items, H1, L = 1000, 500, 250
    B = 12

    key = jax.random.PRNGKey(0)
    keys = jax.random.split(key, 10)

    x = jax.random.normal(keys[0], (B, n_items), dtype=jnp.float32)

    def glorot(k, shape):
        fan_in, fan_out = shape
        std = (2.0 / (fan_in + fan_out)) ** 0.5
        return jax.random.normal(k, shape, dtype=jnp.float32) * std

    # Weights stored (in_features, out_features) == torch weight.T
    wq1 = glorot(keys[1], (n_items, H1))
    bq1 = jax.random.normal(keys[2], (1, H1), jnp.float32) * 0.001
    wq2 = glorot(keys[3], (H1, 2 * L))
    bq2 = jax.random.normal(keys[4], (1, 2 * L), jnp.float32) * 0.001
    wp1 = glorot(keys[5], (L, H1))
    bp1 = jax.random.normal(keys[6], (1, H1), jnp.float32) * 0.001
    wp2 = glorot(keys[7], (H1, n_items))
    bp2 = jax.random.normal(keys[8], (1, n_items), jnp.float32) * 0.001
    params = (wq1, bq1, wq2, bq2, wp1, bp1, wp2, bp2)

    # Reparameterization noise (same sample fed to kernel and reference).
    eps = jax.random.normal(keys[9], (B, L), dtype=jnp.float32)

    ref_out, ref_mu, ref_logvar = reference_forward(x, params, eps)

    # Config 1: auto tiles (single item tile, one batch block).
    out, mu, logvar = vae_forward(x, params, eps)
    out = jax.block_until_ready(out)
    assert out.shape == (B, n_items) and mu.shape == (B, L) and logvar.shape == (B, L)
    assert jnp.allclose(mu, ref_mu, atol=5e-3, rtol=5e-3), "mu mismatch (auto tiles)"
    assert jnp.allclose(logvar, ref_logvar, atol=5e-3, rtol=5e-3), "logvar mismatch (auto tiles)"
    assert jnp.allclose(out, ref_out, atol=5e-3, rtol=5e-3), "recon mismatch (auto tiles)"

    # Config 2: forced small tiles — exercises multi-tile item accumulation and
    # multiple batch blocks (correctness of the pinned-block phase trick).
    out2, mu2, logvar2 = vae_forward(x, params, eps, tile_n=256, tile_b=8)
    out2 = jax.block_until_ready(out2)
    assert jnp.allclose(mu2, ref_mu, atol=5e-3, rtol=5e-3), "mu mismatch (small tiles)"
    assert jnp.allclose(logvar2, ref_logvar, atol=5e-3, rtol=5e-3), "logvar mismatch (small tiles)"
    assert jnp.allclose(out2, ref_out, atol=5e-3, rtol=5e-3), "recon mismatch (small tiles)"

    print("KERNEL_OK")
</pallas_src>

<mosaic_0001>
module attributes {stable_mosaic.version = 11 : i64} {
  func.func @vae_kernel(%arg0: i32, %arg1: i32, %arg2: i32, %arg3: memref<16x1024xbf16, #tpu.memory_space<vmem>>, %arg4: memref<1024x512xbf16, #tpu.memory_space<vmem>>, %arg5: memref<1x512xf32, #tpu.memory_space<vmem>>, %arg6: memref<512x512xbf16, #tpu.memory_space<vmem>>, %arg7: memref<1x512xf32, #tpu.memory_space<vmem>>, %arg8: memref<16x256xf32, #tpu.memory_space<vmem>>, %arg9: memref<256x512xbf16, #tpu.memory_space<vmem>>, %arg10: memref<1x512xf32, #tpu.memory_space<vmem>>, %arg11: memref<512x1024xbf16, #tpu.memory_space<vmem>>, %arg12: memref<1x1024xf32, #tpu.memory_space<vmem>>, %arg13: memref<16x1024xf32, #tpu.memory_space<vmem>>, %arg14: memref<16x256xf32, #tpu.memory_space<vmem>>, %arg15: memref<16x256xf32, #tpu.memory_space<vmem>>, %arg16: memref<16x512xf32, #tpu.memory_space<vmem>>, %arg17: memref<16x1xf32, #tpu.memory_space<vmem>>, %arg18: memref<16x512xbf16, #tpu.memory_space<vmem>>) attributes {dimension_semantics = [#tpu.dimension_semantics<parallel>, #tpu.dimension_semantics<arbitrary>, #tpu.dimension_semantics<arbitrary>], iteration_bounds = array<i64: 1, 2, 1>, scalar_prefetch = 0 : i64, scratch_operands = 3 : i64, tpu.core_type = #tpu.core_type<tc>, window_params = [{transform_indices = @transform_0, window_bounds = array<i64: 16, 1024>}, {transform_indices = @transform_1, window_bounds = array<i64: 1024, 512>}, {pipeline_mode = #tpu.pipeline_mode<synchronous>, transform_indices = @transform_2, window_bounds = array<i64: 1, 512>}, {pipeline_mode = #tpu.pipeline_mode<synchronous>, transform_indices = @transform_3, window_bounds = array<i64: 512, 512>}, {pipeline_mode = #tpu.pipeline_mode<synchronous>, transform_indices = @transform_4, window_bounds = array<i64: 1, 512>}, {transform_indices = @transform_5, window_bounds = array<i64: 16, 256>}, {pipeline_mode = #tpu.pipeline_mode<synchronous>, transform_indices = @transform_6, window_bounds = array<i64: 256, 512>}, {pipeline_mode = #tpu.pipeline_mode<synchronous>, transform_indices = @transform_7, window_bounds = array<i64: 1, 512>}, {transform_indices = @transform_8, window_bounds = array<i64: 512, 1024>}, {transform_indices = @transform_9, window_bounds = array<i64: 1, 1024>}, {transform_indices = @transform_10, window_bounds = array<i64: 16, 1024>}, {transform_indices = @transform_11, window_bounds = array<i64: 16, 256>}, {transform_indices = @transform_12, window_bounds = array<i64: 16, 256>}]} {
    %c0_i32 = arith.constant 0 : i32
    %0 = arith.cmpi eq, %arg1, %c0_i32 : i32
    %1 = arith.extui %0 : i1 to i32
    %c0_i32_0 = arith.constant 0 : i32
    %2 = arith.cmpi ne, %1, %c0_i32_0 : i32
    scf.if %2 {
      %c0_i32_2 = arith.constant 0 : i32
      %6 = arith.cmpi eq, %arg2, %c0_i32_2 : i32
      %7 = arith.extui %6 : i1 to i32
      %c0_i32_3 = arith.constant 0 : i32
      %8 = arith.cmpi ne, %7, %c0_i32_3 : i32
      scf.if %8 {
        %cst_18 = arith.constant 0.000000e+00 : f32
        %25 = vector.broadcast %cst_18 : f32 to vector<16x512xf32>
        %c0_19 = arith.constant 0 : index
        %c0_20 = arith.constant 0 : index
        %26 = vector.load %arg16[%c0_19, %c0_20] : memref<16x512xf32, #tpu.memory_space<vmem>>, vector<16x512xf32>
        tpu.vector_store %arg16[%c0_19, %c0_20], %25 {strides = array<i32>} : memref<16x512xf32, #tpu.memory_space<vmem>>, vector<16x512xf32>,
        %cst_21 = arith.constant 0.000000e+00 : f32
        %27 = vector.broadcast %cst_21 : f32 to vector<16x1xf32>
        %c0_22 = arith.constant 0 : index
        %c0_23 = arith.constant 0 : index
        %28 = vector.load %arg17[%c0_22, %c0_23] : memref<16x1xf32, #tpu.memory_space<vmem>>, vector<16x1xf32>
        tpu.vector_store %arg17[%c0_22, %c0_23], %27 {strides = array<i32>} : memref<16x1xf32, #tpu.memory_space<vmem>>, vector<16x1xf32>,
      } else {
      }
      %c0 = arith.constant 0 : index
      %c0_4 = arith.constant 0 : index
      %9 = vector.load %arg3[%c0, %c0_4] : memref<16x1024xbf16, #tpu.memory_space<vmem>>, vector<16x1024xbf16>
      %10 = arith.extf %9 : vector<16x1024xbf16> to vector<16x1024xf32>
      %c0_5 = arith.constant 0 : index
      %c0_6 = arith.constant 0 : index
      %11 = vector.load %arg17[%c0_5, %c0_6] : memref<16x1xf32, #tpu.memory_space<vmem>>, vector<16x1xf32>
      %12 = arith.mulf %10, %10 : vector<16x1024xf32>
      %cst = arith.constant dense<0.000000e+00> : vector<16xf32>
      %13 = vector.multi_reduction <add>, %12, %cst [1] : vector<16x1024xf32> to vector<16xf32>
      %14 = vector.shape_cast %13 : vector<16xf32> to vector<16x1xf32>
      %15 = arith.addf %11, %14 : vector<16x1xf32>
      %c0_7 = arith.constant 0 : index
      %c0_8 = arith.constant 0 : index
      %16 = vector.load %arg17[%c0_7, %c0_8] : memref<16x1xf32, #tpu.memory_space<vmem>>, vector<16x1xf32>
      tpu.vector_store %arg17[%c0_7, %c0_8], %15 {strides = array<i32>} : memref<16x1xf32, #tpu.memory_space<vmem>>, vector<16x1xf32>,
      %c0_9 = arith.constant 0 : index
      %c0_10 = arith.constant 0 : index
      %17 = vector.load %arg16[%c0_9, %c0_10] : memref<16x512xf32, #tpu.memory_space<vmem>>, vector<16x512xf32>
      %c0_11 = arith.constant 0 : index
      %c0_12 = arith.constant 0 : index
      %18 = vector.load %arg4[%c0_11, %c0_12] : memref<1024x512xbf16, #tpu.memory_space<vmem>>, vector<1024x512xbf16>
      %cst_13 = arith.constant dense<0.000000e+00> : vector<16x512xf32>
      %19 = tpu.matmul %9, %18, %cst_13 {dimension_numbers = #tpu.dot_dimension_numbers<[1], [0], [0], [1], [0, 0, 1, 1], [], []>} : vector<16x1024xbf16>, vector<1024x512xbf16>, vector<16x512xf32> -> vector<16x512xf32>
      %20 = arith.addf %17, %19 : vector<16x512xf32>
      %c0_14 = arith.constant 0 : index
      %c0_15 = arith.constant 0 : index
      %21 = vector.load %arg16[%c0_14, %c0_15] : memref<16x512xf32, #tpu.memory_space<vmem>>, vector<16x512xf32>
      tpu.vector_store %arg16[%c0_14, %c0_15], %20 {strides = array<i32>} : memref<16x512xf32, #tpu.memory_space<vmem>>, vector<16x512xf32>,
      %c0_i32_16 = arith.constant 0 : i32
      %22 = arith.cmpi eq, %arg2, %c0_i32_16 : i32
      %23 = arith.extui %22 : i1 to i32
      %c0_i32_17 = arith.constant 0 : i32
      %24 = arith.cmpi ne, %23, %c0_i32_17 : i32
      scf.if %24 {
        %c0_18 = arith.constant 0 : index
        %c0_19 = arith.constant 0 : index
        %25 = vector.load %arg17[%c0_18, %c0_19] : memref<16x1xf32, #tpu.memory_space<vmem>>, vector<16x1xf32>
        %cst_20 = arith.constant 1.000000e-24 : f32
        %26 = vector.broadcast %cst_20 : f32 to vector<16x1xf32>
        %27 = arith.maximumf %25, %26 : vector<16x1xf32>
        %28 = math.rsqrt %27 : vector<16x1xf32>
        %c0_21 = arith.constant 0 : index
        %c0_22 = arith.constant 0 : index
        %29 = vector.load %arg16[%c0_21, %c0_22] : memref<16x512xf32, #tpu.memory_space<vmem>>, vector<16x512xf32>
        %30 = vector.broadcast %28 : vector<16x1xf32> to vector<16x512xf32>
        %31 = arith.mulf %29, %30 : vector<16x512xf32>
        %c0_23 = arith.constant 0 : index
        %c0_24 = arith.constant 0 : index
        %32 = vector.load %arg5[%c0_23, %c0_24] : memref<1x512xf32, #tpu.memory_space<vmem>>, vector<1x512xf32>
        %33 = vector.broadcast %32 : vector<1x512xf32> to vector<16x512xf32>
        %34 = arith.addf %31, %33 : vector<16x512xf32>
        %35 = math.tanh %34 : vector<16x512xf32>
        %36 = arith.truncf %35 : vector<16x512xf32> to vector<16x512xbf16>
        %c0_25 = arith.constant 0 : index
        %c0_26 = arith.constant 0 : index
        %37 = vector.load %arg6[%c0_25, %c0_26] : memref<512x512xbf16, #tpu.memory_space<vmem>>, vector<512x512xbf16>
        %cst_27 = arith.constant dense<0.000000e+00> : vector<16x512xf32>
        %38 = tpu.matmul %36, %37, %cst_27 {dimension_numbers = #tpu.dot_dimension_numbers<[1], [0], [0], [1], [0, 0, 1, 1], [], []>} : vector<16x512xbf16>, vector<512x512xbf16>, vector<16x512xf32> -> vector<16x512xf32>
        %c0_28 = arith.constant 0 : index
        %c0_29 = arith.constant 0 : index
        %39 = vector.load %arg7[%c0_28, %c0_29] : memref<1x512xf32, #tpu.memory_space<vmem>>, vector<1x512xf32>
        %40 = vector.broadcast %39 : vector<1x512xf32> to vector<16x512xf32>
        %41 = arith.addf %38, %40 : vector<16x512xf32>
        %42 = vector.extract_strided_slice %41 {offsets = [0, 0], sizes = [16, 256], strides = [1, 1]} : vector<16x512xf32> to vector<16x256xf32>
        %43 = vector.extract_strided_slice %41 {offsets = [0, 256], sizes = [16, 256], strides = [1, 1]} : vector<16x512xf32> to vector<16x256xf32>
        %c0_30 = arith.constant 0 : index
        %c0_31 = arith.constant 0 : index
        %44 = vector.load %arg14[%c0_30, %c0_31] : memref<16x256xf32, #tpu.memory_space<vmem>>, vector<16x256xf32>
        tpu.vector_store %arg14[%c0_30, %c0_31], %42 {strides = array<i32>} : memref<16x256xf32, #tpu.memory_space<vmem>>, vector<16x256xf32>,
        %c0_32 = arith.constant 0 : index
        %c0_33 = arith.constant 0 : index
        %45 = vector.load %arg15[%c0_32, %c0_33] : memref<16x256xf32, #tpu.memory_space<vmem>>, vector<16x256xf32>
        tpu.vector_store %arg15[%c0_32, %c0_33], %43 {strides = array<i32>} : memref<16x256xf32, #tpu.memory_space<vmem>>, vector<16x256xf32>,
        %c0_34 = arith.constant 0 : index
        %c0_35 = arith.constant 0 : index
        %46 = vector.load %arg8[%c0_34, %c0_35] : memref<16x256xf32, #tpu.memory_space<vmem>>, vector<16x256xf32>
        %cst_36 = arith.constant 5.000000e-01 : f32
        %47 = vector.broadcast %cst_36 : f32 to vector<16x256xf32>
        %48 = arith.mulf %47, %43 : vector<16x256xf32>
        %49 = math.exp %48 : vector<16x256xf32>
        %50 = arith.mulf %46, %49 : vector<16x256xf32>
        %51 = arith.addf %42, %50 : vector<16x256xf32>
        %52 = arith.truncf %51 : vector<16x256xf32> to vector<16x256xbf16>
        %c0_37 = arith.constant 0 : index
        %c0_38 = arith.constant 0 : index
        %53 = vector.load %arg9[%c0_37, %c0_38] : memref<256x512xbf16, #tpu.memory_space<vmem>>, vector<256x512xbf16>
        %cst_39 = arith.constant dense<0.000000e+00> : vector<16x512xf32>
        %54 = tpu.matmul %52, %53, %cst_39 {dimension_numbers = #tpu.dot_dimension_numbers<[1], [0], [0], [1], [0, 0, 1, 1], [], []>} : vector<16x256xbf16>, vector<256x512xbf16>, vector<16x512xf32> -> vector<16x512xf32>
        %c0_40 = arith.constant 0 : index
        %c0_41 = arith.constant 0 : index
        %55 = vector.load %arg10[%c0_40, %c0_41] : memref<1x512xf32, #tpu.memory_space<vmem>>, vector<1x512xf32>
        %56 = vector.broadcast %55 : vector<1x512xf32> to vector<16x512xf32>
        %57 = arith.addf %54, %56 : vector<16x512xf32>
        %58 = math.tanh %57 : vector<16x512xf32>
        %59 = arith.truncf %58 : vector<16x512xf32> to vector<16x512xbf16>
        %c0_42 = arith.constant 0 : index
        %c0_43 = arith.constant 0 : index
        %60 = vector.load %arg18[%c0_42, %c0_43] : memref<16x512xbf16, #tpu.memory_space<vmem>>, vector<16x512xbf16>
        tpu.vector_store %arg18[%c0_42, %c0_43], %59 {strides = array<i32>} : memref<16x512xbf16, #tpu.memory_space<vmem>>, vector<16x512xbf16>,
      } else {
      }
    } else {
    }
    %c1_i32 = arith.constant 1 : i32
    %3 = arith.cmpi eq, %arg1, %c1_i32 : i32
    %4 = arith.extui %3 : i1 to i32
    %c0_i32_1 = arith.constant 0 : i32
    %5 = arith.cmpi ne, %4, %c0_i32_1 : i32
    scf.if %5 {
      %c0 = arith.constant 0 : index
      %c0_2 = arith.constant 0 : index
      %6 = vector.load %arg18[%c0, %c0_2] : memref<16x512xbf16, #tpu.memory_space<vmem>>, vector<16x512xbf16>
      %c0_3 = arith.constant 0 : index
      %c0_4 = arith.constant 0 : index
      %7 = vector.load %arg11[%c0_3, %c0_4] : memref<512x1024xbf16, #tpu.memory_space<vmem>>, vector<512x1024xbf16>
      %cst = arith.constant dense<0.000000e+00> : vector<16x1024xf32>
      %8 = tpu.matmul %6, %7, %cst {dimension_numbers = #tpu.dot_dimension_numbers<[1], [0], [0], [1], [0, 0, 1, 1], [], []>} : vector<16x512xbf16>, vector<512x1024xbf16>, vector<16x1024xf32> -> vector<16x1024xf32>
      %c0_5 = arith.constant 0 : index
      %c0_6 = arith.constant 0 : index
      %9 = vector.load %arg12[%c0_5, %c0_6] : memref<1x1024xf32, #tpu.memory_space<vmem>>, vector<1x1024xf32>
      %10 = vector.broadcast %9 : vector<1x1024xf32> to vector<16x1024xf32>
      %11 = arith.addf %8, %10 : vector<16x1024xf32>
      %c0_7 = arith.constant 0 : index
      %c0_8 = arith.constant 0 : index
      %12 = vector.load %arg13[%c0_7, %c0_8] : memref<16x1024xf32, #tpu.memory_space<vmem>>, vector<16x1024xf32>
      tpu.vector_store %arg13[%c0_7, %c0_8], %11 {strides = array<i32>} : memref<16x1024xf32, #tpu.memory_space<vmem>>, vector<16x1024xf32>,
    } else {
    }
    return
  }
  func.func @transform_0(%arg0: i32, %arg1: i32, %arg2: i32) -> (i32, i32) {
    %c1_i32 = arith.constant 1 : i32
    %0 = arith.subi %c1_i32, %arg1 : i32
    %1 = arith.muli %arg2, %0 : i32
    %c0_i32 = arith.constant 0 : i32
    %2 = arith.muli %c0_i32, %arg1 : i32
    %3 = arith.addi %1, %2 : i32
    %c0_i32_0 = arith.constant 0 : i32
    return %arg0, %3 : i32, i32
  }
  func.func @transform_1(%arg0: i32, %arg1: i32, %arg2: i32) -> (i32, i32) {
    %c1_i32 = arith.constant 1 : i32
    %0 = arith.subi %c1_i32, %arg1 : i32
    %1 = arith.muli %arg2, %0 : i32
    %c0_i32 = arith.constant 0 : i32
    %2 = arith.muli %c0_i32, %arg1 : i32
    %3 = arith.addi %1, %2 : i32
    %c0_i32_0 = arith.constant 0 : i32
    %c0_i32_1 = arith.constant 0 : i32
    return %3, %c0_i32_0 : i32, i32
  }
  func.func @transform_2(%arg0: i32, %arg1: i32, %arg2: i32) -> (i32, i32) {
    %c0_i32 = arith.constant 0 : i32
    %c0_i32_0 = arith.constant 0 : i32
    %c0_i32_1 = arith.constant 0 : i32
    return %c0_i32, %c0_i32_0 : i32, i32
  }
  func.func @transform_3(%arg0: i32, %arg1: i32, %arg2: i32) -> (i32, i32) {
    %c0_i32 = arith.constant 0 : i32
    %c0_i32_0 = arith.constant 0 : i32
    %c0_i32_1 = arith.constant 0 : i32
    return %c0_i32, %c0_i32_0 : i32, i32
  }
  func.func @transform_4(%arg0: i32, %arg1: i32, %arg2: i32) -> (i32, i32) {
    %c0_i32 = arith.constant 0 : i32
    %c0_i32_0 = arith.constant 0 : i32
    %c0_i32_1 = arith.constant 0 : i32
    return %c0_i32, %c0_i32_0 : i32, i32
  }
  func.func @transform_5(%arg0: i32, %arg1: i32, %arg2: i32) -> (i32, i32) {
    %c0_i32 = arith.constant 0 : i32
    %c0_i32_0 = arith.constant 0 : i32
    return %arg0, %c0_i32 : i32, i32
  }
  func.func @transform_6(%arg0: i32, %arg1: i32, %arg2: i32) -> (i32, i32) {
    %c0_i32 = arith.constant 0 : i32
    %c0_i32_0 = arith.constant 0 : i32
    %c0_i32_1 = arith.constant 0 : i32
    return %c0_i32, %c0_i32_0 : i32, i32
  }
  func.func @transform_7(%arg0: i32, %arg1: i32, %arg2: i32) -> (i32, i32) {
    %c0_i32 = arith.constant 0 : i32
    %c0_i32_0 = arith.constant 0 : i32
    %c0_i32_1 = arith.constant 0 : i32
    return %c0_i32, %c0_i32_0 : i32, i32
  }
  func.func @transform_8(%arg0: i32, %arg1: i32, %arg2: i32) -> (i32, i32) {
    %0 = arith.muli %arg2, %arg1 : i32
    %c0_i32 = arith.constant 0 : i32
    %c0_i32_0 = arith.constant 0 : i32
    return %c0_i32, %0 : i32, i32
  }
  func.func @transform_9(%arg0: i32, %arg1: i32, %arg2: i32) -> (i32, i32) {
    %0 = arith.muli %arg2, %arg1 : i32
    %c0_i32 = arith.constant 0 : i32
    %c0_i32_0 = arith.constant 0 : i32
    return %c0_i32, %0 : i32, i32
  }
  func.func @transform_10(%arg0: i32, %arg1: i32, %arg2: i32) -> (i32, i32) {
    %0 = arith.muli %arg2, %arg1 : i32
    %c0_i32 = arith.constant 0 : i32
    return %arg0, %0 : i32, i32
  }
  func.func @transform_11(%arg0: i32, %arg1: i32, %arg2: i32) -> (i32, i32) {
    %c0_i32 = arith.constant 0 : i32
    %c0_i32_0 = arith.constant 0 : i32
    return %arg0, %c0_i32 : i32, i32
  }
  func.func @transform_12(%arg0: i32, %arg1: i32, %arg2: i32) -> (i32, i32) {
    %c0_i32 = arith.constant 0 : i32
    %c0_i32_0 = arith.constant 0 : i32
    return %arg0, %c0_i32 : i32, i32
  }
}

</mosaic_0001>

<bundles_post_ra>
// kernel: tpu_custom_call.1
= control target key start
LH: loop header
LB: loop body
LE: loop exit
PB: predicated region body
PF: predicated region fallthrough
CT: control target
= control target key end

     0   :  { %s11581_s0 = inlined_call_operand.hbm [shape: bf16[16,1024], index: 0, kind: input, shape index: {}]   ;;  %s11582_s1 = inlined_call_operand.hbm [shape: bf16[1024,512], index: 1, kind: input, shape index: {}]   ;;  %s11583_s2 = inlined_call_operand.hbm [shape: f32[1,512], index: 2, kind: input, shape index: {}]   ;;  %s11584_s3 = inlined_call_operand.hbm [shape: bf16[512,512], index: 3, kind: input, shape index: {}]   ;;  %s11585_s4 = inlined_call_operand.hbm [shape: f32[1,512], index: 4, kind: input, shape index: {}]   ;;  %s11586_s5 = inlined_call_operand.hbm [shape: f32[16,256], index: 5, kind: input, shape index: {}]   ;;  %s11587_s6 = inlined_call_operand.hbm [shape: bf16[256,512], index: 6, kind: input, shape index: {}]   ;;  %s11588_s7 = inlined_call_operand.hbm [shape: f32[1,512], index: 7, kind: input, shape index: {}]   ;;  %s11589_s8 = inlined_call_operand.hbm [shape: bf16[512,1024], index: 8, kind: input, shape index: {}]   ;;  %s11590_s9 = inlined_call_operand.vmem [shape: f32[1,1024], index: 9, kind: input, shape index: {}]   ;;  %s11591_s10 = inlined_call_operand.hbm [shape: f32[16,1024], index: 10, kind: output, shape index: {0}]   ;;  %s11592_s11 = inlined_call_operand.hbm [shape: f32[16,256], index: 11, kind: output, shape index: {1}]   ;;  %s11593_s12 = inlined_call_operand.hbm [shape: f32[16,256], index: 12, kind: output, shape index: {2}]  }
   0x1   :  { %11601 = sst [smem:[#allocation34_spill]] %s11581_s0 }
   0x2   :  { %11602 = sst [smem:[#allocation35_spill]] %s11583_s2 }
   0x3   :  { %11603 = sst [smem:[#allocation36_spill]] %s11584_s3 }
   0x4   :  { %11604 = sst [smem:[#allocation37_spill]] %s11585_s4 }
   0x5   :  { %11605 = sst [smem:[#allocation38_spill]] %s11586_s5 }
   0x6   :  { %18 = vsyncpa [#allocation6], 0 }
   0x7   :  { %20 = vsyncpa [#allocation6 + $0x1], 0 }
   0x8   :  { %21 = vsyncpa [#allocation9], 0 }
   0x9   :  { %23 = vsyncpa [#allocation9 + $0x1], 0 }
   0xa   :  { %24 = vsyncpa [#allocation12], 0 }
   0xb   :  { %25 = vsyncpa [#allocation15], 0 }
   0xc   :  { %26 = vsyncpa [#allocation18], 0 }
   0xd   :  { %27 = vsyncpa [#allocation7], 0 }
   0xe   :  { %29 = vsyncpa [#allocation7 + $0x1], 0 }
   0xf   :  { %30 = vsyncpa [#allocation22], 0  ;;  %s11125_s21 = smov 0   ;;  %s11127_s22 = smov 0  }
  0x10   :  { %s11129_s23 = smov 0  }
  0x11 LB: > { %s11141_s24 = sadd.s32 4294967295, %s11036_s23   ;;  %s51_s26 = sadd.s32 1, %s11032_s22  ;;  %s11036_s23 = sphi %s11129_s23, %s36_s23   ;;  %s11032_s22 = sphi %s11127_s22, %s11627_s22   ;;  %s11028_s21 = sphi %s11125_s21, %s11626_s21  }
  0x12   : > { %p6813_p0 = scmp.ge.s32.totalorder %s11036_s23, 1  ;;  %p53_p1 = scmp.ge.s32.totalorder %s51_s26, 2 }
  0x13   : > { %p391_p2 = scmp.lt.s32.totalorder %s11036_s23, 3  ;;  %p10506_p3 = scmp.eq.s32.totalorder %s11141_s24, 0 }
  0x14   : > { %s11629_s26 = smov (%p53_p1, %s51_s26), 0  ;;  %s11608_s2 = sld [smem:[#allocation35_spill]] }
  0x15   : > { %11606 = sst [smem:[#allocation33_spill]] %s11629_s26  ;;  %p11150_p4 = pnand %p6813_p0, %p391_p2 }
  0x16   : > { %s11038_s13 = smov [#allocation10]   ;;  %p6820_p6 = scmp.ge.s32.totalorder %s11036_s23, 2 }
  0x17   : > { %p10473_p5 = pneg %p11150_p4  ;;  %s405_s14 = sshll.u32 %s11038_s13, 4  ;;  %s406_s14 = int_to_ptr.vmem [resolvable:$true] %s405_s14 }
  0x18   : > { %s11610_s3 = sld [smem:[#allocation36_spill]]  ;;  %s11039_s19 = smov [#allocation11]  }
  0x19   : > { %p11162_p7 = pnand %p10506_p3, %p10473_p5  ;;  %s416_s20 = sshll.u32 %s11039_s19, 4  ;;  %s417_s20 = int_to_ptr.vmem [resolvable:$true] %s416_s20 }
  0x1a   : > { %s403_s30 = sshll.u32 %s11608_s2, 4  ;;  %s11594_s28 = smov 256   ;;  %s404_s30 = int_to_ptr.hbm [resolvable:$true] %s403_s30 }
  0x1b   : > { %10476 = dma.hbm_to_vmem [thread:$0]  (!%p11162_p7), %s404_s30, 64, %s406_s14, [#allocation9]  }
  0x1c   : > { %s11596_s29 = smov 16   ;;  %s11611_s5 = sld [smem:[#allocation38_spill]] }
  0x1d   : > { %s11042_s25 = smov [#allocation14]   ;;  %p10512_p8 = scmp.lt.s32.totalorder %s11036_s23, 2 }
  0x1e   : > { %s414_s18 = sshll.u32 %s11610_s3, 4  ;;  %s446_s2 = sshll.u32 %s11042_s25, 4  ;;  %s415_s18 = int_to_ptr.hbm [resolvable:$true] %s414_s18  ;;  %s447_s2 = int_to_ptr.vmem [resolvable:$true] %s446_s2 }
  0x1f   : > { %10479 = dma.hbm_to_vmem [thread:$0]  (!%p11162_p7), %s415_s18, 16384, %s417_s20, [#allocation12], %s11594_s28, %s11594_s28, %s11596_s29  }
  0x20   : > { %p10513_p9 = scmp.eq.s32.totalorder %s11036_s23, 0  ;;  %s11598_s30 = sand.u32 1, %s11036_s23  }
  0x21   : > { %s11612_s0 = sld [smem:[#allocation34_spill]]  ;;  %s11043_s20 = smov [#allocation5]  }
  0x22   : > { %s444_s17 = sshll.u32 %s11611_s5, 4  ;;  %s503_s13 = sshll.u32 %s11043_s20, 4  ;;  %s445_s17 = int_to_ptr.hbm [resolvable:$true] %s444_s17  ;;  %s504_s13 = int_to_ptr.vmem [resolvable:$true] %s503_s13 }
  0x23   : > { %10485 = dma.hbm_to_vmem [thread:$0]  (!%p11162_p7), %s445_s17, 512, %s447_s2, [#allocation15], %s11594_s28, %s11594_s28, %s11596_s29  }
  0x24   : > { %p11190_p10 = pnand %p10513_p9, %p10512_p8  ;;  %s11196_s25 = scalar_lea.sflag [#allocation6], %s11598_s30 }
  0x25   : > { %s11599_s2 = smov 512   ;;  %s11600_s17 = smov 32  }
  0x26   : > { %s11614_s4 = sld [smem:[#allocation37_spill]]  ;;  %s11046_s28 = smov [#allocation13]  }
  0x27   : > { %s501_s18 = sshll.u32 %s11612_s0, 4  ;;  %s431_s29 = sshll.u32 %s11046_s28, 4  ;;  %s502_s18 = int_to_ptr.hbm [resolvable:$true] %s501_s18  ;;  %s432_s29 = int_to_ptr.vmem [resolvable:$true] %s431_s29 }
  0x28   : > { %10495 = dma.hbm_to_vmem [thread:$0]  (!%p11190_p10), %s502_s18, 1024, %s504_s13, %s11196_s25, %s11599_s2, %s11599_s2, %s11600_s17  }
  0x29   : > { %s458_s30 = sshll.u32 %s11587_s6, 4  ;;  %s473_s18 = sshll.u32 %s11588_s7, 4  ;;  %s459_s30 = int_to_ptr.hbm [resolvable:$true] %s458_s30  ;;  %s474_s18 = int_to_ptr.hbm [resolvable:$true] %s473_s18 }
  0x2a   : > { %s11047_s13 = smov [#allocation16]   ;;  %s11615_s28 = smov 16  }
  0x2b   : > { %s460_s14 = sshll.u32 %s11047_s13, 4  ;;  %s11616_s19 = smov 256   ;;  %s461_s14 = int_to_ptr.vmem [resolvable:$true] %s460_s14 }
  0x2c   : > { %s429_s20 = sshll.u32 %s11614_s4, 4  ;;  %s11048_s0 = smov [#allocation17]   ;;  %s430_s20 = int_to_ptr.hbm [resolvable:$true] %s429_s20 }
  0x2d   : > { %10482 = dma.hbm_to_vmem [thread:$0]  (!%p11162_p7), %s430_s20, 64, %s432_s29, [#allocation12]  }
  0x2e   : > { %10488 = dma.hbm_to_vmem [thread:$0]  (!%p11162_p7), %s459_s30, 8192, %s461_s14, [#allocation15], %s11616_s19, %s11616_s19, %s11615_s28  }
  0x2f   : > { %s475_s3 = sshll.u32 %s11048_s0, 4  ;;  %s526_s5 = sshll.u32 %s11582_s1, 4  ;;  %s476_s3 = int_to_ptr.vmem [resolvable:$true] %s475_s3  ;;  %s527_s5 = int_to_ptr.hbm [resolvable:$true] %s526_s5 }
  0x30   : > { %10491 = dma.hbm_to_vmem [thread:$0]  (!%p11162_p7), %s474_s18, 64, %s476_s3, [#allocation18]  }
  0x31   : > { %s549_s2 = sshll.u32 %s11589_s8, 4  ;;  %s11049_s17 = smov [#allocation8]   ;;  %s550_s2 = int_to_ptr.hbm [resolvable:$true] %s549_s2 }
  0x32   : > { %s528_s4 = sshll.u32 %s11049_s17, 4  ;;  %s11617_s30 = sand.u32 1, %s11036_s23   ;;  %s529_s4 = int_to_ptr.vmem [resolvable:$true] %s528_s4 }
  0x33   : > { %s514_s14 = scalar_lea.sflag [#allocation9], %s11617_s30  ;;  %s11050_s0 = smov [#allocation19]  }
  0x34   : > { %10498 = dma.hbm_to_vmem [thread:$0]  (!%p11190_p10), %s527_s5, 32768, %s529_s4, %s514_s14, %s11616_s19, %s11616_s19, %s11615_s28  }
  0x35   : > { %s551_s29 = sshll.u32 %s11050_s0, 4  ;;  %s11618_s15 = smov 32   ;;  %s552_s29 = int_to_ptr.vmem [resolvable:$true] %s551_s29 }
  0x36   : > { %s11619_s18 = smov 512   ;;  %573 = sbr.rel (%p11150_p4) target bundleno = 1348 (0x544), region = 60 }
  0x37   : > { %10501 = dma.hbm_to_vmem [thread:$0]  (!%p11190_p10), %s550_s2, 32768, %s552_s29, %s11196_s25, %s11619_s18, %s11619_s18, %s11618_s15  }
  0x38   : > { %s575_s17 = sand.u32 (!%p11150_p4), 1, %s11141_s24  }
  0x39   : > { %s576_s3 = scalar_lea.sflag (!%p11150_p4), [#allocation6], %s575_s17 }
  0x3b   : > { %10991 = dma.done.wait (%p10506_p3), %s576_s3, 1024  }
  0x3c   : > { %10993 = vsyncadd (%p10506_p3), %s576_s3, 4294966272  ;;  %s586_s4 = scalar_lea.sflag [#allocation9], %s575_s17 }
  0x3d   : > { %10995 = dma.done.wait (%p10506_p3), %s586_s4, 32768  }
  0x3e   : > { %10997 = vsyncadd (%p10506_p3), %s586_s4, 4294934528 }
  0x3f   : > { %10999 = dma.done.wait (%p10506_p3), [#allocation9], 64  }
  0x40   : > { %11001 = vsyncadd (%p10506_p3), [#allocation9], 4294967232 }
  0x41   : > { %11003 = dma.done.wait (%p10506_p3), [#allocation12], 16448  }
  0x42   : > { %11005 = vsyncadd (%p10506_p3), [#allocation12], 4294950848 }
  0x43   : > { %11007 = dma.done.wait (%p10506_p3), [#allocation15], 8704  }
  0x44   : > { %11009 = vsyncadd (%p10506_p3), [#allocation15], 4294958592 }
  0x45   : > { %11011 = dma.done.wait (%p10506_p3), [#allocation18], 64  }
  0x46   : > { %11013 = vsyncadd (%p10506_p3), [#allocation18], 4294967232 }
  0x47   : > { %11015 = dma.done.wait (%p10506_p3), %s576_s3, 32768  }
  0x48   : > { %11017 = vsyncadd (%p10506_p3), %s576_s3, 4294934528  ;;  %p6835_p11 = scmp.ne.s32.totalorder %s11028_s21, 0 }
  0x4a   : > { %711 = sbr.rel (%p6835_p11) target bundleno = 891 (0x37b), region = 100 }
  0x4f   : > { %v6982_v0 = vld [vmem:[#allocation8 + $0xe0] sm:$0xf]  ;;  %v9747_v1 = vld [vmem:[#allocation8 + $0xec] sm:$0xf0]  ;;  %v728_v55 = vld [vmem:[#allocation5 + $0x8] sm:$0xff]  ;;  %vm724_vm0 = vcmask 7168  }
  0x50   : > { %v7110_v2 = vld [vmem:[#allocation8 + $0x1e0] sm:$0xf]  ;;  %v6983_v3 = vor.u32 %v9747_v1, %v6982_v0  ;;  %v9779_v4 = vld [vmem:[#allocation8 + $0x1ec] sm:$0xf0]  ;;  %v737_v62 = vunpack.c.l.bf16 %v728_v55  ;;  %v11273_v1 = vld [vmem:[#allocation5 + $0x18] sm:$0xff] }
  0x51   : > { %v7238_v5 = vld [vmem:[#allocation8 + $0x2e0] sm:$0xf]  ;;  %v9811_v6 = vld [vmem:[#allocation8 + $0x2ec] sm:$0xf0]  ;;  %v7111_v7 = vor.u32 %v9779_v4, %v7110_v2  ;;  %v738_v2 = vunpack.c.h.bf16 %v728_v55 }
  0x52   : > { %v7239_v8 = vor.u32 %v9811_v6, %v7238_v5  ;;  %v7366_v9 = vld [vmem:[#allocation8 + $0x3e0] sm:$0xf]  ;;  %v9843_v10 = vld [vmem:[#allocation8 + $0x3ec] sm:$0xf0]  ;;  %2376 = vmatpush.bf16.msra.mxu0 %v6983_v3 }
  0x53   : > { %v6966_v11 = vld [vmem:[#allocation8 + $0xc0] sm:$0xf]  ;;  %v7367_v12 = vor.u32 %v9843_v10, %v7366_v9  ;;  %v9743_v13 = vld [vmem:[#allocation8 + $0xcc] sm:$0xf0]  ;;  %2390 = vmatpush.bf16.msra.mxu1 %v7111_v7 }
  0x54   : > { %v7094_v14 = vld [vmem:[#allocation8 + $0x1c0] sm:$0xf]  ;;  %v9775_v15 = vld [vmem:[#allocation8 + $0x1cc] sm:$0xf0]  ;;  %2404 = vmatpush.bf16.msra.mxu2 %v7239_v8  ;;  %v6967_v16 = vor.u32 %v9743_v13, %v6966_v11  ;;  %v755_v8 = vmul.f32 %v737_v62, %v737_v62 }
  0x55   : > { %v7095_v17 = vor.u32 %v9775_v15, %v7094_v14  ;;  %v7222_v18 = vld [vmem:[#allocation8 + $0x2c0] sm:$0xf]  ;;  %v9807_v19 = vld [vmem:[#allocation8 + $0x2cc] sm:$0xf0]  ;;  %2418 = vmatpush.bf16.msra.mxu3 %v7367_v12 }
  0x56   : > { %v7350_v20 = vld [vmem:[#allocation8 + $0x3c0] sm:$0xf]  ;;  %v7223_v21 = vor.u32 %v9807_v19, %v7222_v18  ;;  %v9839_v22 = vld [vmem:[#allocation8 + $0x3cc] sm:$0xf0]  ;;  %2377 = vmatpush.bf16.msra.mxu0 %v6967_v16  ;;  %v756_v18 = vmul.f32 %v738_v2, %v738_v2 }
  0x57   : > { %v6950_v23 = vld [vmem:[#allocation8 + $0xa0] sm:$0xf]  ;;  %v9739_v24 = vld [vmem:[#allocation8 + $0xac] sm:$0xf0]  ;;  %v7351_v25 = vor.u32 %v9839_v22, %v7350_v20  ;;  %2391 = vmatpush.bf16.msra.mxu1 %v7095_v17  ;;  %v741_v17 = vunpack.c.l.bf16 %v11273_v1 }
  0x58   : > { %v7078_v26 = vld [vmem:[#allocation8 + $0x1a0] sm:$0xf]  ;;  %v9771_v27 = vld [vmem:[#allocation8 + $0x1ac] sm:$0xf0]  ;;  %v6951_v29 = vor.u32 %v9739_v24, %v6950_v23  ;;  %2405 = vmatpush.bf16.msra.mxu2 %v7223_v21 }
  0x59   : > { %v7206_v28 = vld [vmem:[#allocation8 + $0x2a0] sm:$0xf]  ;;  %v9803_v30 = vld [vmem:[#allocation8 + $0x2ac] sm:$0xf0]  ;;  %v7079_v33 = vor.u32 %v9771_v27, %v7078_v26  ;;  %2419 = vmatpush.bf16.msra.mxu3 %v7351_v25  ;;  %v742_v26 = vunpack.c.h.bf16 %v11273_v1 }
  0x5a   : > { %v7334_v31 = vld [vmem:[#allocation8 + $0x3a0] sm:$0xf]  ;;  %v9835_v32 = vld [vmem:[#allocation8 + $0x3ac] sm:$0xf0]  ;;  %v7207_v34 = vor.u32 %v9803_v30, %v7206_v28  ;;  %2378 = vmatpush.bf16.msra.mxu0 %v6951_v29 }
  0x5b   : > { %v6934_v35 = vld [vmem:[#allocation8 + $0x80] sm:$0xf]  ;;  %v9735_v36 = vld [vmem:[#allocation8 + $0x8c] sm:$0xf0]  ;;  %v7335_v38 = vor.u32 %v9835_v32, %v7334_v31  ;;  %2392 = vmatpush.bf16.msra.mxu1 %v7079_v33  ;;  %v732_v31 = vld [vmem:[#allocation5 + $0x28] sm:$0xff]  ;;  %v760_v1 = vmul.f32 %v742_v26, %v742_v26 }
  0x5c   : > { %v7062_v37 = vld [vmem:[#allocation8 + $0x180] sm:$0xf]  ;;  %v9767_v39 = vld [vmem:[#allocation8 + $0x18c] sm:$0xf0]  ;;  %v6935_v44 = vor.u32 %v9735_v36, %v6934_v35  ;;  %2406 = vmatpush.bf16.msra.mxu2 %v7207_v34 }
  0x5d   : > { %v7190_v40 = vld [vmem:[#allocation8 + $0x280] sm:$0xf]  ;;  %v9799_v41 = vld [vmem:[#allocation8 + $0x28c] sm:$0xf0]  ;;  %v7063_v48 = vor.u32 %v9767_v39, %v7062_v37  ;;  %2420 = vmatpush.bf16.msra.mxu3 %v7335_v38  ;;  %v745_v38 = vunpack.c.l.bf16 %v732_v31  ;;  %v746_v39 = vunpack.c.h.bf16 %v732_v31 }
  0x5e   : > { %v7318_v42 = vld [vmem:[#allocation8 + $0x380] sm:$0xf]  ;;  %v9831_v43 = vld [vmem:[#allocation8 + $0x38c] sm:$0xf0]  ;;  %v7191_v49 = vor.u32 %v9799_v41, %v7190_v40  ;;  %2379 = vmatpush.bf16.msra.mxu0 %v6935_v44  ;;  %v759_v41 = vmul.f32 %v741_v17, %v741_v17 }
  0x5f   : > { %v6918_v45 = vld [vmem:[#allocation8 + $0x60] sm:$0xf]  ;;  %v9731_v46 = vld [vmem:[#allocation8 + $0x6c] sm:$0xf0]  ;;  %v7319_v53 = vor.u32 %v9831_v43, %v7318_v42  ;;  %2393 = vmatpush.bf16.msra.mxu1 %v7063_v48 }
  0x60   : > { %v7046_v47 = vld [vmem:[#allocation8 + $0x160] sm:$0xf]  ;;  %v9763_v50 = vld [vmem:[#allocation8 + $0x16c] sm:$0xf0]  ;;  %v6919_v56 = vor.u32 %v9731_v46, %v6918_v45  ;;  %2407 = vmatpush.bf16.msra.mxu2 %v7191_v49  ;;  %v11277_v46 = vld [vmem:[#allocation5 + $0x38] sm:$0xff] }
  0x61   : > { %v7174_v51 = vld [vmem:[#allocation8 + $0x260] sm:$0xf]  ;;  %v9795_v52 = vld [vmem:[#allocation8 + $0x26c] sm:$0xf0]  ;;  %v7047_v63 = vor.u32 %v9763_v50, %v7046_v47  ;;  %2421 = vmatpush.bf16.msra.mxu3 %v7319_v53  ;;  %v763_v50 = vmul.f32 %v745_v38, %v745_v38 }
  0x62   : > { %v727_v54 = vld [vmem:[#allocation5] sm:$0xff]  ;;  %v9827_v58 = vld [vmem:[#allocation8 + $0x36c] sm:$0xf0]  ;;  %v7175_v0 = vor.u32 %v9795_v52, %v7174_v51  ;;  %2380 = vmatpush.bf16.msra.mxu0 %v6919_v56 }
  0x63   : > { %v7302_v57 = vld [vmem:[#allocation8 + $0x360] sm:$0xf]  ;;  %v729_v59 = vld [vmem:[#allocation5 + $0x10] sm:$0xff]  ;;  %v735_v60 = vunpack.c.l.bf16 %v727_v54  ;;  %v736_v61 = vunpack.c.h.bf16 %v727_v54  ;;  %2394 = vmatpush.bf16.msra.mxu1 %v7047_v63 }
  0x64   : > { %v739_v3 = vunpack.c.l.bf16 %v729_v59  ;;  %v6902_v4 = vld [vmem:[#allocation8 + $0x40] sm:$0xf]  ;;  %v9727_v5 = vld [vmem:[#allocation8 + $0x4c] sm:$0xf0]  ;;  %v7303_v12 = vor.u32 %v9827_v58, %v7302_v57  ;;  %v740_v16 = vunpack.c.h.bf16 %v729_v59  ;;  %2408 = vmatpush.bf16.msra.mxu2 %v7175_v0 }
  0x65   : > { %v753_v6 = vmul.f32 %v735_v60, %v735_v60  ;;  %v754_v7 = vmul.f32 %v736_v61, %v736_v61  ;;  %v7030_v9 = vld [vmem:[#allocation8 + $0x140] sm:$0xf]  ;;  %v9759_v10 = vld [vmem:[#allocation8 + $0x14c] sm:$0xf0]  ;;  %v6903_v21 = vor.u32 %v9727_v5, %v6902_v4  ;;  %v764_v60 = vmul.f32 %v746_v39, %v746_v39 }
  0x66   : > { %v7158_v11 = vld [vmem:[#allocation8 + $0x240] sm:$0xf]  ;;  %v9791_v13 = vld [vmem:[#allocation8 + $0x24c] sm:$0xf0]  ;;  %v757_v20 = vmul.f32 %v739_v3, %v739_v3  ;;  %v7031_v22 = vor.u32 %v9759_v10, %v7030_v9  ;;  %2422 = vmatpush.bf16.msra.mxu3 %v7303_v12  ;;  %v758_v40 = vmul.f32 %v740_v16, %v740_v16 }
  0x67   : > { %v7286_v14 = vld [vmem:[#allocation8 + $0x340] sm:$0xf]  ;;  %v9823_v15 = vld [vmem:[#allocation8 + $0x34c] sm:$0xf0]  ;;  %v769_v19 = vadd.f32 %v754_v7, %v753_v6  ;;  %v7159_v28 = vor.u32 %v9791_v13, %v7158_v11  ;;  %2381 = vmatpush.bf16.msra.mxu0 %v6903_v21  ;;  %v749_v6 = vunpack.c.l.bf16 %v11277_v46 }
  0x68   : > { %v6886_v23 = vld [vmem:[#allocation8 + $0x20] sm:$0xf]  ;;  %v9723_v24 = vld [vmem:[#allocation8 + $0x2c] sm:$0xf0]  ;;  %v7287_v29 = vor.u32 %v9823_v15, %v7286_v14  ;;  %2395 = vmatpush.bf16.msra.mxu1 %v7031_v22  ;;  %v750_v14 = vunpack.c.h.bf16 %v11277_v46 }
  0x69   : > { %v7014_v25 = vld [vmem:[#allocation8 + $0x120] sm:$0xf]  ;;  %v770_v27 = vadd.f32 %v769_v19, %v755_v8  ;;  %v733_v32 = vld [vmem:[#allocation5 + $0x30] sm:$0xff]  ;;  %v6887_v43 = vor.u32 %v9723_v24, %v6886_v23  ;;  %2409 = vmatpush.bf16.msra.mxu2 %v7159_v28  ;;  %v767_v28 = vmul.f32 %v749_v6, %v749_v6  ;;  %v6840_v6 = vld [vmem:[#allocation5 + $0x20] sm:$0xf0] }
  0x6a   : > { %v731_v30 = vld [vmem:[#allocation5 + $0x20] sm:$0xff]  ;;  %v9755_v33 = vld [vmem:[#allocation8 + $0x12c] sm:$0xf0]  ;;  %v747_v47 = vunpack.c.l.bf16 %v733_v32  ;;  %2423 = vmatpush.bf16.msra.mxu3 %v7287_v29  ;;  %v748_v59 = vunpack.c.h.bf16 %v733_v32  ;;  %v768_v38 = vmul.f32 %v750_v14, %v750_v14 }
  0x6b   : > { %v7142_v34 = vld [vmem:[#allocation8 + $0x220] sm:$0xf]  ;;  %v9787_v35 = vld [vmem:[#allocation8 + $0x22c] sm:$0xf0]  ;;  %v743_v36 = vunpack.c.l.bf16 %v731_v30  ;;  %v744_v37 = vunpack.c.h.bf16 %v731_v30  ;;  %v771_v42 = vadd.f32 %v770_v27, %v756_v18  ;;  %v7015_v53 = vor.u32 %v9755_v33, %v7014_v25  ;;  %2382 = vmatpush.bf16.msra.mxu0 %v6887_v43 }
  0x6c   : > { %v7270_v44 = vld [vmem:[#allocation8 + $0x320] sm:$0xf]  ;;  %v9819_v45 = vld [vmem:[#allocation8 + $0x32c] sm:$0xf0]  ;;  %v7143_v54 = vor.u32 %v9787_v35, %v7142_v34  ;;  %v765_v7 = vmul.f32 %v747_v47, %v747_v47  ;;  %v766_v19 = vmul.f32 %v748_v59, %v748_v59 }
  0x6d   : > { %v761_v48 = vmul.f32 %v743_v36, %v743_v36  ;;  %v762_v49 = vmul.f32 %v744_v37, %v744_v37  ;;  %v6870_v51 = vld [vmem:[#allocation8] sm:$0xf]  ;;  %v772_v52 = vadd.f32 %v771_v42, %v757_v20  ;;  %v9719_v55 = vld [vmem:[#allocation8 + $0xc] sm:$0xf0]  ;;  %v7271_v58 = vor.u32 %v9819_v45, %v7270_v44  ;;  %2396 = vmatpush.bf16.msra.mxu1 %v7015_v53  ;;  %v9714_v53 = vld [vmem:[#allocation5 + $0x24] sm:$0xf0] }
  0x6e   : > { %v6998_v56 = vld [vmem:[#allocation8 + $0x100] sm:$0xf]  ;;  %v9751_v57 = vld [vmem:[#allocation8 + $0x10c] sm:$0xf0]  ;;  %v6871_v9 = vor.u32 %v9719_v55, %v6870_v51  ;;  %2410 = vmatpush.bf16.msra.mxu2 %v7143_v54 }
  0x6f   : > { %v778_v61 = vadd.f32 %v762_v49, %v761_v48  ;;  %v7126_v62 = vld [vmem:[#allocation8 + $0x200] sm:$0xf]  ;;  %v9783_v63 = vld [vmem:[#allocation8 + $0x20c] sm:$0xf0]  ;;  %v773_v2 = vadd.f32 %v772_v52, %v758_v40  ;;  %v6999_v15 = vor.u32 %v9751_v57, %v6998_v56  ;;  %2424 = vmatpush.bf16.msra.mxu3 %v7271_v58  ;;  %v6846_v52 = vld [vmem:[#allocation5 + $0x8] sm:$0xf] }
  0x70   : > { %v7254_v0 = vld [vmem:[#allocation8 + $0x300] sm:$0xf]  ;;  %v9815_v3 = vld [vmem:[#allocation8 + $0x30c] sm:$0xf0]  ;;  %v7127_v21 = vor.u32 %v9783_v63, %v7126_v62  ;;  %2383 = vmatpush.bf16.msra.mxu0 %v6871_v9  ;;  %v11283_v62 = vor.u32 %v9714_v53, %v6846_v52 }
  0x71   : > { %v7494_v4 = vld [vmem:[#allocation8 + $0x4e0] sm:$0xf]  ;;  %v9875_v5 = vld [vmem:[#allocation8 + $0x4ec] sm:$0xf0]  ;;  %v779_v8 = vadd.f32 %v778_v61, %v763_v50  ;;  %v774_v13 = vadd.f32 %v773_v2, %v759_v41  ;;  %v7255_v22 = vor.u32 %v9815_v3, %v7254_v0  ;;  %2397 = vmatpush.bf16.msra.mxu1 %v6999_v15  ;;  %v9709_v3 = vld [vmem:[#allocation5 + $0x4] sm:$0xf] }
  0x72   : > { %v7622_v10 = vld [vmem:[#allocation8 + $0x5e0] sm:$0xf]  ;;  %v9907_v11 = vld [vmem:[#allocation8 + $0x5ec] sm:$0xf0]  ;;  %v7495_v24 = vor.u32 %v9875_v5, %v7494_v4  ;;  %2411 = vmatpush.bf16.msra.mxu2 %v7127_v21 }
  0x73   : > { %v7750_v12 = vld [vmem:[#allocation8 + $0x6e0] sm:$0xf]  ;;  %v9939_v16 = vld [vmem:[#allocation8 + $0x6ec] sm:$0xf0]  ;;  %v780_v20 = vadd.f32 %v779_v8, %v764_v60  ;;  %v775_v23 = vadd.f32 %v774_v13, %v760_v1  ;;  %v7623_v25 = vor.u32 %v9907_v11, %v7622_v10  ;;  %2425 = vmatpush.bf16.msra.mxu3 %v7255_v22  ;;  %v6848_v8 = vld [vmem:[#allocation5 + $0x28] sm:$0xf0] }
  0x74   : > { %v7878_v17 = vld [vmem:[#allocation8 + $0x7e0] sm:$0xf]  ;;  %v9971_v18 = vld [vmem:[#allocation8 + $0x7ec] sm:$0xf0]  ;;  %v7751_v30 = vor.u32 %v9939_v16, %v7750_v12  ;;  %2432 = vmatpush.bf16.msrb.mxu0 %v7495_v24  ;;  %v11286_v12 = vor.u32 %v9709_v3, %v6840_v6  ;;  %v7112_v3 = vld [vmem:[#allocation8 + $0x1f0] sm:$0xf0] }
  0x75   : > { %v7478_v26 = vld [vmem:[#allocation8 + $0x4c0] sm:$0xf]  ;;  %v9871_v27 = vld [vmem:[#allocation8 + $0x4cc] sm:$0xf0]  ;;  %v781_v29 = vadd.f32 %v780_v20, %v765_v7  ;;  %v7879_v31 = vor.u32 %v9971_v18, %v7878_v17  ;;  %776 = vadd.xlane.f32.xlu0 %v775_v23  ;;  %2446 = vmatpush.bf16.msrb.mxu1 %v7623_v25  ;;  %v9710_v7 = vld [vmem:[#allocation5 + $0xc] sm:$0xf] }
  0x76   : > { %v7606_v32 = vld [vmem:[#allocation8 + $0x5c0] sm:$0xf]  ;;  %v9903_v33 = vld [vmem:[#allocation8 + $0x5cc] sm:$0xf0]  ;;  %v7479_v43 = vor.u32 %v9871_v27, %v7478_v26  ;;  %2460 = vmatpush.bf16.msrb.mxu2 %v7751_v30  ;;  %v11288_v13 = vor.u32 %v9710_v7, %v6848_v8  ;;  %2398 = vmatmul.bf16.vlgmr.msra.gmra.mxu1 %v11286_v12  ;;  %v9841_v6 = vld [vmem:[#allocation8 + $0x3e4] sm:$0xf] }
  0x77   : > { %v7734_v34 = vld [vmem:[#allocation8 + $0x6c0] sm:$0xf]  ;;  %v9935_v35 = vld [vmem:[#allocation8 + $0x6cc] sm:$0xf0]  ;;  %v782_v39 = vadd.f32 %v781_v29, %v766_v19  ;;  %v7607_v44 = vor.u32 %v9903_v33, %v7606_v32  ;;  %2474 = vmatpush.bf16.msrb.mxu3 %v7879_v31  ;;  %2412 = vmatmul.bf16.vlgmr.msra.gmra.mxu2 %v11283_v62  ;;  %v7368_v7 = vld [vmem:[#allocation8 + $0x3f0] sm:$0xf0] }
  0x78   : > { %v7862_v36 = vld [vmem:[#allocation8 + $0x7c0] sm:$0xf]  ;;  %v9967_v37 = vld [vmem:[#allocation8 + $0x7cc] sm:$0xf0]  ;;  %v7735_v49 = vor.u32 %v9935_v35, %v7734_v34  ;;  %2433 = vmatpush.bf16.msrb.mxu0 %v7479_v43  ;;  %2426 = vmatmul.bf16.vlgmr.msra.gmra.mxu3 %v11288_v13 }
  0x79   : > { %v7462_v40 = vld [vmem:[#allocation8 + $0x4a0] sm:$0xf]  ;;  %v9867_v41 = vld [vmem:[#allocation8 + $0x4ac] sm:$0xf0]  ;;  %v783_v48 = vadd.f32 %v782_v39, %v767_v28  ;;  %v7863_v50 = vor.u32 %v9967_v37, %v7862_v36  ;;  %2447 = vmatpush.bf16.msrb.mxu1 %v7607_v44 }
  0x7a   : > { %v7590_v42 = vld [vmem:[#allocation8 + $0x5a0] sm:$0xf]  ;;  %v9899_v45 = vld [vmem:[#allocation8 + $0x5ac] sm:$0xf0]  ;;  %v7463_v63 = vor.u32 %v9867_v41, %v7462_v40  ;;  %2461 = vmatpush.bf16.msrb.mxu2 %v7735_v49 }
  0x7b   : > { %v7718_v46 = vld [vmem:[#allocation8 + $0x6a0] sm:$0xf]  ;;  %v9931_v54 = vld [vmem:[#allocation8 + $0x6ac] sm:$0xf0]  ;;  %v784_v58 = vadd.f32 %v783_v48, %v768_v38  ;;  %v7591_v0 = vor.u32 %v9899_v45, %v7590_v42  ;;  %2475 = vmatpush.bf16.msrb.mxu3 %v7863_v50 }
  0x7c   : > { %v6838_v47 = vld [vmem:[#allocation5] sm:$0xf]  ;;  %v9963_v56 = vld [vmem:[#allocation8 + $0x7ac] sm:$0xf0]  ;;  %v7719_v4 = vor.u32 %v9931_v54, %v7718_v46  ;;  %2434 = vmatpush.bf16.msrb.mxu0 %v7463_v63 }
  0x7d   : > { %v9713_v51 = vld [vmem:[#allocation5 + $0x1c] sm:$0xf0]  ;;  %v9863_v60 = vld [vmem:[#allocation8 + $0x48c] sm:$0xf0]  ;;  %785 = vadd.xlane.f32.xlu0 %v784_v58  ;;  %2448 = vmatpush.bf16.msrb.mxu1 %v7591_v0  ;;  %v9745_v0 = vld [vmem:[#allocation8 + $0xe4] sm:$0xf] }
  0x7e   : > { %v7846_v55 = vld [vmem:[#allocation8 + $0x7a0] sm:$0xf]  ;;  %v11281_v57 = vor.u32 %v9713_v51, %v6838_v47  ;;  %v9895_v1 = vld [vmem:[#allocation8 + $0x58c] sm:$0xf0]  ;;  %2462 = vmatpush.bf16.msrb.mxu2 %v7719_v4  ;;  %v9809_v4 = vld [vmem:[#allocation8 + $0x2e4] sm:$0xf] }
  0x7f   : > { %v7446_v59 = vld [vmem:[#allocation8 + $0x480] sm:$0xf]  ;;  %v7847_v5 = vor.u32 %v9963_v56, %v7846_v55  ;;  %v9927_v9 = vld [vmem:[#allocation8 + $0x68c] sm:$0xf0] }
  0x80   : > { %v7574_v61 = vld [vmem:[#allocation8 + $0x580] sm:$0xf]  ;;  %v9959_v11 = vld [vmem:[#allocation8 + $0x78c] sm:$0xf0]  ;;  %2384 = vmatmul.bf16.vlgmr.msra.gmra.mxu0 %v11281_v57  ;;  %v7447_v14 = vor.u32 %v9863_v60, %v7446_v59 }
  0x81   : > { %v7702_v2 = vld [vmem:[#allocation8 + $0x680] sm:$0xf]  ;;  %v7575_v15 = vor.u32 %v9895_v1, %v7574_v61  ;;  %v9859_v17 = vld [vmem:[#allocation8 + $0x46c] sm:$0xf0]  ;;  %2476 = vmatpush.bf16.msrb.mxu3 %v7847_v5  ;;  %v6984_v1 = vld [vmem:[#allocation8 + $0xf0] sm:$0xf0] }
  0x82   : > { %v7830_v10 = vld [vmem:[#allocation8 + $0x780] sm:$0xf]  ;;  %v7703_v18 = vor.u32 %v9927_v9, %v7702_v2  ;;  %v9891_v21 = vld [vmem:[#allocation8 + $0x56c] sm:$0xf0]  ;;  %2435 = vmatpush.bf16.msrb.mxu0 %v7447_v14  ;;  %v9777_v2 = vld [vmem:[#allocation8 + $0x1e4] sm:$0xf] }
  0x83   : > { %v7430_v16 = vld [vmem:[#allocation8 + $0x460] sm:$0xf]  ;;  %v7831_v19 = vor.u32 %v9959_v11, %v7830_v10  ;;  %v9923_v23 = vld [vmem:[#allocation8 + $0x66c] sm:$0xf0]  ;;  %2449 = vmatpush.bf16.msrb.mxu1 %v7575_v15  ;;  %v7240_v5 = vld [vmem:[#allocation8 + $0x2f0] sm:$0xf0] }
  0x84   : > { %v7558_v20 = vld [vmem:[#allocation8 + $0x560] sm:$0xf]  ;;  %v9955_v25 = vld [vmem:[#allocation8 + $0x76c] sm:$0xf0]  ;;  %v7431_v26 = vor.u32 %v9859_v17, %v7430_v16  ;;  %2463 = vmatpush.bf16.msrb.mxu2 %v7703_v18  ;;  %v6862_v14 = vld [vmem:[#allocation5 + $0x18] sm:$0xf] }
  0x85   : > { %v7686_v22 = vld [vmem:[#allocation8 + $0x660] sm:$0xf]  ;;  %v7559_v27 = vor.u32 %v9891_v21, %v7558_v20  ;;  %v9855_v29 = vld [vmem:[#allocation8 + $0x44c] sm:$0xf0]  ;;  %2477 = vmatpush.bf16.msrb.mxu3 %v7831_v19  ;;  %v9716_v15 = vld [vmem:[#allocation5 + $0x34] sm:$0xf0]  ;;  %v6987_v21 = vor.u32 %v9745_v0, %v6984_v1 }
  0x86   : > { %v7814_v24 = vld [vmem:[#allocation8 + $0x760] sm:$0xf]  ;;  %v7687_v30 = vor.u32 %v9923_v23, %v7686_v22  ;;  %v9887_v33 = vld [vmem:[#allocation8 + $0x54c] sm:$0xf0]  ;;  %2436 = vmatpush.bf16.msrb.mxu0 %v7431_v26  ;;  %v9711_v18 = vld [vmem:[#allocation5 + $0x14] sm:$0xf]  ;;  %v7115_v22 = vor.u32 %v9777_v2, %v7112_v3  ;;  %v7243_v26 = vor.u32 %v9809_v4, %v7240_v5 }
  0x87   : > { %v7414_v28 = vld [vmem:[#allocation8 + $0x440] sm:$0xf]  ;;  %v7815_v31 = vor.u32 %v9955_v25, %v7814_v24  ;;  %v9919_v35 = vld [vmem:[#allocation8 + $0x64c] sm:$0xf0]  ;;  %2450 = vmatpush.bf16.msrb.mxu1 %v7559_v27  ;;  %v6856_v19 = vld [vmem:[#allocation5 + $0x30] sm:$0xf0]  ;;  %v7371_v27 = vor.u32 %v9841_v6, %v7368_v7 }
  0x88   : > { %v7542_v32 = vld [vmem:[#allocation8 + $0x540] sm:$0xf]  ;;  %v9951_v37 = vld [vmem:[#allocation8 + $0x74c] sm:$0xf0]  ;;  %v7415_v38 = vor.u32 %v9855_v29, %v7414_v28  ;;  %2464 = vmatpush.bf16.msrb.mxu2 %v7687_v30  ;;  %v9712_v20 = vld [vmem:[#allocation5 + $0x1c] sm:$0xf] }
  0x89   : > { %v7670_v34 = vld [vmem:[#allocation8 + $0x640] sm:$0xf]  ;;  %v7543_v39 = vor.u32 %v9887_v33, %v7542_v32  ;;  %v9851_v41 = vld [vmem:[#allocation8 + $0x42c] sm:$0xf0]  ;;  %2478 = vmatpush.bf16.msrb.mxu3 %v7815_v31  ;;  %v6864_v23 = vld [vmem:[#allocation5 + $0x38] sm:$0xf0]  ;;  %v11295_v32 = vor.u32 %v9716_v15, %v6862_v14 }
  0x8a   : > { %v7798_v36 = vld [vmem:[#allocation8 + $0x740] sm:$0xf]  ;;  %v7671_v42 = vor.u32 %v9919_v35, %v7670_v34  ;;  %v9883_v45 = vld [vmem:[#allocation8 + $0x52c] sm:$0xf0]  ;;  %2437 = vmatpush.bf16.msrb.mxu0 %v7415_v38  ;;  %v9741_v24 = vld [vmem:[#allocation8 + $0xc4] sm:$0xf] }
  0x8b   : > { %v7398_v40 = vld [vmem:[#allocation8 + $0x420] sm:$0xf]  ;;  %v7799_v43 = vor.u32 %v9951_v37, %v7798_v36  ;;  %v9915_v47 = vld [vmem:[#allocation8 + $0x62c] sm:$0xf0]  ;;  %2451 = vmatpush.bf16.msrb.mxu1 %v7543_v39  ;;  %v6968_v25 = vld [vmem:[#allocation8 + $0xd0] sm:$0xf0]  ;;  %v11297_v36 = vor.u32 %v9711_v18, %v6856_v19  ;;  %v11299_v37 = vor.u32 %v9712_v20, %v6864_v23 }
  0x8c   : > { %v7526_v44 = vld [vmem:[#allocation8 + $0x520] sm:$0xf]  ;;  %v9947_v49 = vld [vmem:[#allocation8 + $0x72c] sm:$0xf0]  ;;  %v7399_v54 = vor.u32 %v9851_v41, %v7398_v40  ;;  %2465 = vmatpush.bf16.msrb.mxu2 %v7671_v42  ;;  %v9773_v28 = vld [vmem:[#allocation8 + $0x1c4] sm:$0xf]  ;;  %v6971_v38 = vor.u32 %v9741_v24, %v6968_v25 }
  0x8d   : > { %v7654_v46 = vld [vmem:[#allocation8 + $0x620] sm:$0xf]  ;;  %v9847_v51 = vld [vmem:[#allocation8 + $0x40c] sm:$0xf0]  ;;  %v7527_v55 = vor.u32 %v9883_v45, %v7526_v44  ;;  %2479 = vmatpush.bf16.msrb.mxu3 %v7799_v43  ;;  %v7096_v29 = vld [vmem:[#allocation8 + $0x1d0] sm:$0xf0] }
  0x8e   : > { %v7782_v48 = vld [vmem:[#allocation8 + $0x720] sm:$0xf]  ;;  %v9879_v53 = vld [vmem:[#allocation8 + $0x50c] sm:$0xf0]  ;;  %v7655_v61 = vor.u32 %v9915_v47, %v7654_v46  ;;  %2438 = vmatpush.bf16.msrb.mxu0 %v7399_v54  ;;  %v9805_v30 = vld [vmem:[#allocation8 + $0x2c4] sm:$0xf]  ;;  %v7099_v39 = vor.u32 %v9773_v28, %v7096_v29 }
  0x8f   : > { %v7382_v50 = vld [vmem:[#allocation8 + $0x400] sm:$0xf]  ;;  %v9911_v58 = vld [vmem:[#allocation8 + $0x60c] sm:$0xf0]  ;;  %v7783_v63 = vor.u32 %v9947_v49, %v7782_v48  ;;  %2452 = vmatpush.bf16.msrb.mxu1 %v7527_v55  ;;  %v7224_v33 = vld [vmem:[#allocation8 + $0x2d0] sm:$0xf0] }
  0x90   : > { %v7510_v52 = vld [vmem:[#allocation8 + $0x500] sm:$0xf]  ;;  %v9943_v60 = vld [vmem:[#allocation8 + $0x70c] sm:$0xf0]  ;;  %v7383_v9 = vor.u32 %v9847_v51, %v7382_v50  ;;  %2466 = vmatpush.bf16.msrb.mxu2 %v7655_v61  ;;  %v9837_v34 = vld [vmem:[#allocation8 + $0x3c4] sm:$0xf]  ;;  %v7227_v42 = vor.u32 %v9805_v30, %v7224_v33 }
  0x91   : > { %v7638_v56 = vld [vmem:[#allocation8 + $0x600] sm:$0xf]  ;;  %v6854_v8 = vld [vmem:[#allocation5 + $0x10] sm:$0xf]  ;;  %v7511_v10 = vor.u32 %v9879_v53, %v7510_v52  ;;  %2480 = vmatpush.bf16.msrb.mxu3 %v7783_v63  ;;  %v7352_v35 = vld [vmem:[#allocation8 + $0x3d0] sm:$0xf0] }
  0x92   : > { %v7766_v59 = vld [vmem:[#allocation8 + $0x700] sm:$0xf]  ;;  %v9715_v11 = vld [vmem:[#allocation5 + $0x2c] sm:$0xf0]  ;;  %v7639_v16 = vor.u32 %v9911_v58, %v7638_v56  ;;  %2439 = vmatpush.bf16.msrb.mxu0 %v7383_v9  ;;  %v9737_v40 = vld [vmem:[#allocation8 + $0xa4] sm:$0xf]  ;;  %v7355_v43 = vor.u32 %v9837_v34, %v7352_v35 }
  0x93   : > { %v7767_v17 = vor.u32 %v9943_v60, %v7766_v59  ;;  %2453 = vmatpush.bf16.msrb.mxu1 %v7511_v10  ;;  %v11293_v31 = vor.u32 %v9715_v11, %v6854_v8  ;;  %v6952_v41 = vld [vmem:[#allocation8 + $0xb0] sm:$0xf0]  ;;  %v9769_v44 = vld [vmem:[#allocation8 + $0x1a4] sm:$0xf] }
  0x94   : > { %2467 = vmatpush.bf16.msrb.mxu2 %v7639_v16  ;;  %v7080_v45 = vld [vmem:[#allocation8 + $0x1b0] sm:$0xf0]  ;;  %v9801_v46 = vld [vmem:[#allocation8 + $0x2a4] sm:$0xf]  ;;  %v6955_v50 = vor.u32 %v9737_v40, %v6952_v41 }
  0x95   : > { %2481 = vmatpush.bf16.msrb.mxu3 %v7767_v17  ;;  %2440 = vmatmul.bf16.vlgmr.msrb.gmra.mxu0 %v11293_v31  ;;  %v7208_v47 = vld [vmem:[#allocation8 + $0x2b0] sm:$0xf0]  ;;  %v9833_v48 = vld [vmem:[#allocation8 + $0x3a4] sm:$0xf]  ;;  %v7083_v51 = vor.u32 %v9769_v44, %v7080_v45 }
  0x96   : > { %2488 = vmatpush.bf16.msra.mxu0 %v6987_v21  ;;  %v7336_v49 = vld [vmem:[#allocation8 + $0x3b0] sm:$0xf0]  ;;  %2454 = vmatmul.bf16.vlgmr.msrb.gmra.mxu1 %v11297_v36  ;;  %v9733_v52 = vld [vmem:[#allocation8 + $0x84] sm:$0xf]  ;;  %v7211_v54 = vor.u32 %v9801_v46, %v7208_v47 }
  0x97   : > { %2502 = vmatpush.bf16.msra.mxu1 %v7115_v22  ;;  %2468 = vmatmul.bf16.vlgmr.msrb.gmra.mxu2 %v11295_v32  ;;  %v6936_v53 = vld [vmem:[#allocation8 + $0x90] sm:$0xf0]  ;;  %v7339_v55 = vor.u32 %v9833_v48, %v7336_v49  ;;  %v9765_v56 = vld [vmem:[#allocation8 + $0x184] sm:$0xf] }
  0x98   : > { %2516 = vmatpush.bf16.msra.mxu2 %v7243_v26  ;;  %2482 = vmatmul.bf16.vlgmr.msrb.gmra.mxu3 %v11299_v37  ;;  %v7064_v58 = vld [vmem:[#allocation8 + $0x190] sm:$0xf0]  ;;  %v9797_v59 = vld [vmem:[#allocation8 + $0x284] sm:$0xf]  ;;  %v6939_v0 = vor.u32 %v9733_v52, %v6936_v53 }
  0x99   : > { %2530 = vmatpush.bf16.msra.mxu3 %v7371_v27  ;;  %v7192_v60 = vld [vmem:[#allocation8 + $0x290] sm:$0xf0]  ;;  %v9829_v61 = vld [vmem:[#allocation8 + $0x384] sm:$0xf]  ;;  %v7067_v1 = vor.u32 %v9765_v56, %v7064_v58 }
  0x9a   : > { %2489 = vmatpush.bf16.msra.mxu0 %v6971_v38  ;;  %v7320_v63 = vld [vmem:[#allocation8 + $0x390] sm:$0xf0]  ;;  %v9729_v2 = vld [vmem:[#allocation8 + $0x64] sm:$0xf]  ;;  %v7195_v4 = vor.u32 %v9797_v59, %v7192_v60 }
  0x9b   : > { %2503 = vmatpush.bf16.msra.mxu1 %v7099_v39  ;;  %v6920_v3 = vld [vmem:[#allocation8 + $0x70] sm:$0xf0]  ;;  %v7323_v5 = vor.u32 %v9829_v61, %v7320_v63  ;;  %v9761_v6 = vld [vmem:[#allocation8 + $0x164] sm:$0xf] }
  0x9c   : > { %2517 = vmatpush.bf16.msra.mxu2 %v7227_v42  ;;  %v7048_v7 = vld [vmem:[#allocation8 + $0x170] sm:$0xf0]  ;;  %v9793_v8 = vld [vmem:[#allocation8 + $0x264] sm:$0xf]  ;;  %v6923_v14 = vor.u32 %v9729_v2, %v6920_v3 }
  0x9d   : > { %2531 = vmatpush.bf16.msra.mxu3 %v7355_v43  ;;  %v7176_v9 = vld [vmem:[#allocation8 + $0x270] sm:$0xf0]  ;;  %v9825_v10 = vld [vmem:[#allocation8 + $0x364] sm:$0xf]  ;;  %v7051_v15 = vor.u32 %v9761_v6, %v7048_v7 }
  0x9e   : > { %2490 = vmatpush.bf16.msra.mxu0 %v6955_v50  ;;  %v7304_v11 = vld [vmem:[#allocation8 + $0x370] sm:$0xf0]  ;;  %v9725_v16 = vld [vmem:[#allocation8 + $0x44] sm:$0xf]  ;;  %v7179_v18 = vor.u32 %v9793_v8, %v7176_v9 }
  0x9f   : > { %2504 = vmatpush.bf16.msra.mxu1 %v7083_v51  ;;  %v6904_v17 = vld [vmem:[#allocation8 + $0x50] sm:$0xf0]  ;;  %v7307_v19 = vor.u32 %v9825_v10, %v7304_v11  ;;  %v9757_v20 = vld [vmem:[#allocation8 + $0x144] sm:$0xf] }
  0xa0   : > { %2518 = vmatpush.bf16.msra.mxu2 %v7211_v54  ;;  %v7032_v21 = vld [vmem:[#allocation8 + $0x150] sm:$0xf0]  ;;  %v9789_v22 = vld [vmem:[#allocation8 + $0x244] sm:$0xf]  ;;  %v6907_v26 = vor.u32 %v9725_v16, %v6904_v17 }
  0xa1   : > { %2532 = vmatpush.bf16.msra.mxu3 %v7339_v55  ;;  %v7160_v23 = vld [vmem:[#allocation8 + $0x250] sm:$0xf0]  ;;  %v9821_v24 = vld [vmem:[#allocation8 + $0x344] sm:$0xf]  ;;  %v7035_v27 = vor.u32 %v9757_v20, %v7032_v21 }
  0xa2   : > { %2491 = vmatpush.bf16.msra.mxu0 %v6939_v0  ;;  %v7288_v25 = vld [vmem:[#allocation8 + $0x350] sm:$0xf0]  ;;  %v9721_v28 = vld [vmem:[#allocation8 + $0x24] sm:$0xf]  ;;  %v7163_v30 = vor.u32 %v9789_v22, %v7160_v23 }
  0xa3   : > { %2505 = vmatpush.bf16.msra.mxu1 %v7067_v1  ;;  %v6888_v29 = vld [vmem:[#allocation8 + $0x30] sm:$0xf0]  ;;  %v7291_v33 = vor.u32 %v9821_v24, %v7288_v25  ;;  %v9753_v34 = vld [vmem:[#allocation8 + $0x124] sm:$0xf] }
  0xa4   : > { %2519 = vmatpush.bf16.msra.mxu2 %v7195_v4  ;;  %v7016_v35 = vld [vmem:[#allocation8 + $0x130] sm:$0xf0]  ;;  %v9785_v38 = vld [vmem:[#allocation8 + $0x224] sm:$0xf]  ;;  %v6891_v43 = vor.u32 %v9721_v28, %v6888_v29 }
  0xa5   : > { %2533 = vmatpush.bf16.msra.mxu3 %v7323_v5  ;;  %v7144_v39 = vld [vmem:[#allocation8 + $0x230] sm:$0xf0]  ;;  %v9817_v40 = vld [vmem:[#allocation8 + $0x324] sm:$0xf]  ;;  %v7019_v44 = vor.u32 %v9753_v34, %v7016_v35 }
  0xa6   : > { %2492 = vmatpush.bf16.msra.mxu0 %v6923_v14  ;;  %v7272_v41 = vld [vmem:[#allocation8 + $0x330] sm:$0xf0]  ;;  %v9717_v42 = vld [vmem:[#allocation8 + $0x4] sm:$0xf]  ;;  %v7147_v48 = vor.u32 %v9785_v38, %v7144_v39 }
  0xa7   : > { %2506 = vmatpush.bf16.msra.mxu1 %v7051_v15  ;;  %v6872_v45 = vld [vmem:[#allocation8 + $0x10] sm:$0xf0]  ;;  %v9749_v46 = vld [vmem:[#allocation8 + $0x104] sm:$0xf]  ;;  %v7275_v49 = vor.u32 %v9817_v40, %v7272_v41 }
  0xa8   : > { %2520 = vmatpush.bf16.msra.mxu2 %v7179_v18  ;;  %v7000_v47 = vld [vmem:[#allocation8 + $0x110] sm:$0xf0]  ;;  %v9781_v50 = vld [vmem:[#allocation8 + $0x204] sm:$0xf]  ;;  %v6875_v60 = vor.u32 %v9717_v42, %v6872_v45 }
  0xa9   : > { %2534 = vmatpush.bf16.msra.mxu3 %v7307_v19  ;;  %v7128_v51 = vld [vmem:[#allocation8 + $0x210] sm:$0xf0]  ;;  %v9813_v52 = vld [vmem:[#allocation8 + $0x304] sm:$0xf]  ;;  %v7003_v61 = vor.u32 %v9749_v46, %v7000_v47 }
  0xaa   : > { %2493 = vmatpush.bf16.msra.mxu0 %v6907_v26  ;;  %v7256_v53 = vld [vmem:[#allocation8 + $0x310] sm:$0xf0]  ;;  %v9873_v54 = vld [vmem:[#allocation8 + $0x4e4] sm:$0xf]  ;;  %v7131_v2 = vor.u32 %v9781_v50, %v7128_v51 }
  0xab   : > { %2507 = vmatpush.bf16.msra.mxu1 %v7035_v27  ;;  %v7496_v55 = vld [vmem:[#allocation8 + $0x4f0] sm:$0xf0]  ;;  %v9905_v56 = vld [vmem:[#allocation8 + $0x5e4] sm:$0xf]  ;;  %v7259_v3 = vor.u32 %v9813_v52, %v7256_v53 }
  0xac   : > { %2521 = vmatpush.bf16.msra.mxu2 %v7163_v30  ;;  %v7624_v58 = vld [vmem:[#allocation8 + $0x5f0] sm:$0xf0]  ;;  %v9937_v59 = vld [vmem:[#allocation8 + $0x6e4] sm:$0xf]  ;;  %v7499_v4 = vor.u32 %v9873_v54, %v7496_v55 }
  0xad   : > { %2535 = vmatpush.bf16.msra.mxu3 %v7291_v33  ;;  %v7752_v63 = vld [vmem:[#allocation8 + $0x6f0] sm:$0xf0]  ;;  %v9969_v0 = vld [vmem:[#allocation8 + $0x7e4] sm:$0xf]  ;;  %v7627_v5 = vor.u32 %v9905_v56, %v7624_v58 }
  0xae   : > { %2494 = vmatpush.bf16.msra.mxu0 %v6891_v43  ;;  %v7880_v1 = vld [vmem:[#allocation8 + $0x7f0] sm:$0xf0]  ;;  %v9869_v6 = vld [vmem:[#allocation8 + $0x4c4] sm:$0xf]  ;;  %v7755_v8 = vor.u32 %v9937_v59, %v7752_v63 }
  0xaf   : > { %2508 = vmatpush.bf16.msra.mxu1 %v7019_v44  ;;  %v7480_v7 = vld [vmem:[#allocation8 + $0x4d0] sm:$0xf0]  ;;  %v7883_v9 = vor.u32 %v9969_v0, %v7880_v1  ;;  %v9901_v10 = vld [vmem:[#allocation8 + $0x5c4] sm:$0xf] }
  0xb0   : > { %2522 = vmatpush.bf16.msra.mxu2 %v7147_v48  ;;  %v7608_v11 = vld [vmem:[#allocation8 + $0x5d0] sm:$0xf0]  ;;  %v9933_v14 = vld [vmem:[#allocation8 + $0x6c4] sm:$0xf]  ;;  %v7483_v18 = vor.u32 %v9869_v6, %v7480_v7 }
  0xb1   : > { %2536 = vmatpush.bf16.msra.mxu3 %v7275_v49  ;;  %v7736_v15 = vld [vmem:[#allocation8 + $0x6d0] sm:$0xf0]  ;;  %v9965_v16 = vld [vmem:[#allocation8 + $0x7c4] sm:$0xf]  ;;  %v7611_v19 = vor.u32 %v9901_v10, %v7608_v11 }
  0xb2   : > { %2495 = vmatpush.bf16.msra.mxu0 %v6875_v60  ;;  %v7864_v17 = vld [vmem:[#allocation8 + $0x7d0] sm:$0xf0]  ;;  %v9865_v20 = vld [vmem:[#allocation8 + $0x4a4] sm:$0xf]  ;;  %v7739_v22 = vor.u32 %v9933_v14, %v7736_v15 }
  0xb3   : > { %2509 = vmatpush.bf16.msra.mxu1 %v7003_v61  ;;  %v7464_v21 = vld [vmem:[#allocation8 + $0x4b0] sm:$0xf0]  ;;  %v7867_v23 = vor.u32 %v9965_v16, %v7864_v17  ;;  %v9897_v24 = vld [vmem:[#allocation8 + $0x5a4] sm:$0xf] }
  0xb4   : > { %2523 = vmatpush.bf16.msra.mxu2 %v7131_v2  ;;  %v7592_v25 = vld [vmem:[#allocation8 + $0x5b0] sm:$0xf0]  ;;  %v9929_v26 = vld [vmem:[#allocation8 + $0x6a4] sm:$0xf]  ;;  %v7467_v30 = vor.u32 %v9865_v20, %v7464_v21 }
  0xb5   : > { %2537 = vmatpush.bf16.msra.mxu3 %v7259_v3  ;;  %v7720_v27 = vld [vmem:[#allocation8 + $0x6b0] sm:$0xf0]  ;;  %v9961_v28 = vld [vmem:[#allocation8 + $0x7a4] sm:$0xf]  ;;  %2496 = vmatmul.bf16.vlgmr.msra.gmra.mxu0 %v11281_v57  ;;  %v7595_v33 = vor.u32 %v9897_v24, %v7592_v25 }
  0xb6   : > { %2544 = vmatpush.bf16.msrb.mxu0 %v7499_v4  ;;  %v7848_v29 = vld [vmem:[#allocation8 + $0x7b0] sm:$0xf0]  ;;  %2510 = vmatmul.bf16.vlgmr.msra.gmra.mxu1 %v11286_v12  ;;  %v9861_v34 = vld [vmem:[#allocation8 + $0x484] sm:$0xf]  ;;  %v7723_v38 = vor.u32 %v9929_v26, %v7720_v27 }
  0xb7   : > { %2558 = vmatpush.bf16.msrb.mxu1 %v7627_v5  ;;  %2524 = vmatmul.bf16.vlgmr.msra.gmra.mxu2 %v11283_v62  ;;  %v7448_v35 = vld [vmem:[#allocation8 + $0x490] sm:$0xf0]  ;;  %v7851_v39 = vor.u32 %v9961_v28, %v7848_v29  ;;  %v9893_v40 = vld [vmem:[#allocation8 + $0x584] sm:$0xf] }
  0xb8   : > { %2572 = vmatpush.bf16.msrb.mxu2 %v7755_v8  ;;  %2538 = vmatmul.bf16.vlgmr.msra.gmra.mxu3 %v11288_v13  ;;  %v7576_v41 = vld [vmem:[#allocation8 + $0x590] sm:$0xf0]  ;;  %v9925_v42 = vld [vmem:[#allocation8 + $0x684] sm:$0xf]  ;;  %v7451_v46 = vor.u32 %v9861_v34, %v7448_v35  ;;  %v11051_v8 = vmov 0.0  }
  0xb9   : > { %2586 = vmatpush.bf16.msrb.mxu3 %v7883_v9  ;;  %v7704_v43 = vld [vmem:[#allocation8 + $0x690] sm:$0xf0]  ;;  %v9957_v44 = vld [vmem:[#allocation8 + $0x784] sm:$0xf]  ;;  %v7579_v47 = vor.u32 %v9893_v40, %v7576_v41  ;;  %725 = vst.msk [vmem:[#allocation3] sm:$0xff] %vm724_vm0, %v11051_v8 }
  0xba   : > { %2545 = vmatpush.bf16.msrb.mxu0 %v7483_v18  ;;  %v7832_v45 = vld [vmem:[#allocation8 + $0x790] sm:$0xf0]  ;;  %v9857_v48 = vld [vmem:[#allocation8 + $0x464] sm:$0xf]  ;;  %v7707_v50 = vor.u32 %v9925_v42, %v7704_v43  ;;  %726 = vst.msk [vmem:[#allocation3 + $0x8] sm:$0xff] %vm724_vm0, %v11051_v8 }
  0xbb   : > { %2559 = vmatpush.bf16.msrb.mxu1 %v7611_v19  ;;  %v7432_v49 = vld [vmem:[#allocation8 + $0x470] sm:$0xf0]  ;;  %v7835_v51 = vor.u32 %v9957_v44, %v7832_v45  ;;  %v9889_v52 = vld [vmem:[#allocation8 + $0x564] sm:$0xf]  ;;  %v9748_v40 = vld [vmem:[#allocation8 + $0xf4] sm:$0xf0] }
  0xbc   : > { %2573 = vmatpush.bf16.msrb.mxu2 %v7739_v22  ;;  %v7560_v53 = vld [vmem:[#allocation8 + $0x570] sm:$0xf0]  ;;  %v9921_v54 = vld [vmem:[#allocation8 + $0x664] sm:$0xf]  ;;  %v7435_v60 = vor.u32 %v9857_v48, %v7432_v49  ;;  %v7118_v41 = vld [vmem:[#allocation8 + $0x1e8] sm:$0xf] }
  0xbd   : > { %2587 = vmatpush.bf16.msrb.mxu3 %v7867_v23  ;;  %v7688_v55 = vld [vmem:[#allocation8 + $0x670] sm:$0xf0]  ;;  %v9953_v56 = vld [vmem:[#allocation8 + $0x764] sm:$0xf]  ;;  %v7563_v61 = vor.u32 %v9889_v52, %v7560_v53  ;;  %v9780_v42 = vld [vmem:[#allocation8 + $0x1f4] sm:$0xf0] }
  0xbe   : > { %2546 = vmatpush.bf16.msrb.mxu0 %v7467_v30  ;;  %v7816_v58 = vld [vmem:[#allocation8 + $0x770] sm:$0xf0]  ;;  %v9853_v59 = vld [vmem:[#allocation8 + $0x444] sm:$0xf]  ;;  %v7691_v2 = vor.u32 %v9921_v54, %v7688_v55  ;;  %v7246_v43 = vld [vmem:[#allocation8 + $0x2e8] sm:$0xf]  ;;  %v7119_v52 = vor.u32 %v9780_v42, %v7118_v41 }
  0xbf   : > { %2560 = vmatpush.bf16.msrb.mxu1 %v7595_v33  ;;  %v7416_v63 = vld [vmem:[#allocation8 + $0x450] sm:$0xf0]  ;;  %v9885_v0 = vld [vmem:[#allocation8 + $0x544] sm:$0xf]  ;;  %v7819_v3 = vor.u32 %v9953_v56, %v7816_v58  ;;  %v9844_v48 = vld [vmem:[#allocation8 + $0x3f4] sm:$0xf0] }
  0xc0   : > { %2574 = vmatpush.bf16.msrb.mxu2 %v7723_v38  ;;  %v7544_v1 = vld [vmem:[#allocation8 + $0x550] sm:$0xf0]  ;;  %v9917_v4 = vld [vmem:[#allocation8 + $0x644] sm:$0xf]  ;;  %v7419_v9 = vor.u32 %v9853_v59, %v7416_v63  ;;  %v6974_v53 = vld [vmem:[#allocation8 + $0xc8] sm:$0xf] }
  0xc1   : > { %2588 = vmatpush.bf16.msrb.mxu3 %v7851_v39  ;;  %v7672_v5 = vld [vmem:[#allocation8 + $0x650] sm:$0xf0]  ;;  %v9949_v6 = vld [vmem:[#allocation8 + $0x744] sm:$0xf]  ;;  %v7547_v10 = vor.u32 %v9885_v0, %v7544_v1  ;;  %v6990_v39 = vld [vmem:[#allocation8 + $0xe8] sm:$0xf] }
  0xc2   : > { %2547 = vmatpush.bf16.msrb.mxu0 %v7451_v46  ;;  %v7800_v7 = vld [vmem:[#allocation8 + $0x750] sm:$0xf0]  ;;  %v9849_v11 = vld [vmem:[#allocation8 + $0x424] sm:$0xf]  ;;  %v7675_v15 = vor.u32 %v9917_v4, %v7672_v5  ;;  %v9812_v46 = vld [vmem:[#allocation8 + $0x2f4] sm:$0xf0] }
  0xc3   : > { %2561 = vmatpush.bf16.msrb.mxu1 %v7579_v47  ;;  %v7400_v14 = vld [vmem:[#allocation8 + $0x430] sm:$0xf0]  ;;  %v7803_v16 = vor.u32 %v9949_v6, %v7800_v7  ;;  %v9881_v17 = vld [vmem:[#allocation8 + $0x524] sm:$0xf]  ;;  %v7374_v47 = vld [vmem:[#allocation8 + $0x3e8] sm:$0xf]  ;;  %v7247_v55 = vor.u32 %v9812_v46, %v7246_v43 }
  0xc4   : > { %2575 = vmatpush.bf16.msrb.mxu2 %v7707_v50  ;;  %v7528_v18 = vld [vmem:[#allocation8 + $0x530] sm:$0xf0]  ;;  %v9913_v19 = vld [vmem:[#allocation8 + $0x624] sm:$0xf]  ;;  %v7403_v24 = vor.u32 %v9849_v11, %v7400_v14  ;;  %v9744_v54 = vld [vmem:[#allocation8 + $0xd4] sm:$0xf0]  ;;  %v7375_v56 = vor.u32 %v9844_v48, %v7374_v47 }
  0xc5   : > { %2589 = vmatpush.bf16.msrb.mxu3 %v7835_v51  ;;  %v7656_v20 = vld [vmem:[#allocation8 + $0x630] sm:$0xf0]  ;;  %v9945_v21 = vld [vmem:[#allocation8 + $0x724] sm:$0xf]  ;;  %v7531_v25 = vor.u32 %v9881_v17, %v7528_v18  ;;  %v6991_v51 = vor.u32 %v9748_v40, %v6990_v39  ;;  %v7102_v58 = vld [vmem:[#allocation8 + $0x1c8] sm:$0xf]  ;;  %v6975_v1 = vor.u32 %v9744_v54, %v6974_v53 }
  0xc6   : > { %2548 = vmatpush.bf16.msrb.mxu0 %v7435_v60  ;;  %v7784_v22 = vld [vmem:[#allocation8 + $0x730] sm:$0xf0]  ;;  %v9845_v23 = vld [vmem:[#allocation8 + $0x404] sm:$0xf]  ;;  %v7659_v29 = vor.u32 %v9913_v19, %v7656_v20  ;;  %v9776_v59 = vld [vmem:[#allocation8 + $0x1d4] sm:$0xf0] }
  0xc7   : > { %2562 = vmatpush.bf16.msrb.mxu1 %v7563_v61  ;;  %v7384_v26 = vld [vmem:[#allocation8 + $0x410] sm:$0xf0]  ;;  %v9877_v27 = vld [vmem:[#allocation8 + $0x504] sm:$0xf]  ;;  %v7787_v30 = vor.u32 %v9945_v21, %v7784_v22  ;;  %v7230_v60 = vld [vmem:[#allocation8 + $0x2c8] sm:$0xf] }
  0xc8   : > { %2576 = vmatpush.bf16.msrb.mxu2 %v7691_v2  ;;  %v7512_v28 = vld [vmem:[#allocation8 + $0x510] sm:$0xf0]  ;;  %v9909_v33 = vld [vmem:[#allocation8 + $0x604] sm:$0xf]  ;;  %v7387_v44 = vor.u32 %v9845_v23, %v7384_v26  ;;  %v9808_v61 = vld [vmem:[#allocation8 + $0x2d4] sm:$0xf0]  ;;  %v7103_v2 = vor.u32 %v9776_v59, %v7102_v58 }
  0xc9   : > { %2590 = vmatpush.bf16.msrb.mxu3 %v7819_v3  ;;  %v7640_v34 = vld [vmem:[#allocation8 + $0x610] sm:$0xf0]  ;;  %v9941_v35 = vld [vmem:[#allocation8 + $0x704] sm:$0xf]  ;;  %v7515_v45 = vor.u32 %v9877_v27, %v7512_v28  ;;  %v7358_v63 = vld [vmem:[#allocation8 + $0x3c8] sm:$0xf]  ;;  %v7231_v5 = vor.u32 %v9808_v61, %v7230_v60 }
  0xca   : > { %2549 = vmatpush.bf16.msrb.mxu0 %v7419_v9  ;;  %v7768_v38 = vld [vmem:[#allocation8 + $0x710] sm:$0xf0]  ;;  %v7643_v49 = vor.u32 %v9909_v33, %v7640_v34  ;;  %v9840_v0 = vld [vmem:[#allocation8 + $0x3d4] sm:$0xf0]  ;;  %v6958_v3 = vld [vmem:[#allocation8 + $0xa8] sm:$0xf] }
  0xcb   : > { %2563 = vmatpush.bf16.msrb.mxu1 %v7547_v10  ;;  %v7771_v50 = vor.u32 %v9941_v35, %v7768_v38  ;;  %v9740_v4 = vld [vmem:[#allocation8 + $0xb4] sm:$0xf0]  ;;  %v7359_v6 = vor.u32 %v9840_v0, %v7358_v63  ;;  %v7086_v7 = vld [vmem:[#allocation8 + $0x1a8] sm:$0xf] }
  0xcc   : > { %2577 = vmatpush.bf16.msrb.mxu2 %v7675_v15  ;;  %v9772_v8 = vld [vmem:[#allocation8 + $0x1b4] sm:$0xf0]  ;;  %v7214_v9 = vld [vmem:[#allocation8 + $0x2a8] sm:$0xf]  ;;  %v6959_v15 = vor.u32 %v9740_v4, %v6958_v3 }
  0xcd   : > { %2591 = vmatpush.bf16.msrb.mxu3 %v7803_v16  ;;  %v9804_v10 = vld [vmem:[#allocation8 + $0x2b4] sm:$0xf0]  ;;  %v7342_v11 = vld [vmem:[#allocation8 + $0x3a8] sm:$0xf]  ;;  %v7087_v16 = vor.u32 %v9772_v8, %v7086_v7 }
  0xce   : > { %2550 = vmatpush.bf16.msrb.mxu0 %v7403_v24  ;;  %v9836_v14 = vld [vmem:[#allocation8 + $0x3b4] sm:$0xf0]  ;;  %v6942_v17 = vld [vmem:[#allocation8 + $0x88] sm:$0xf]  ;;  %v7215_v19 = vor.u32 %v9804_v10, %v7214_v9 }
  0xcf   : > { %2564 = vmatpush.bf16.msrb.mxu1 %v7531_v25  ;;  %v9736_v18 = vld [vmem:[#allocation8 + $0x94] sm:$0xf0]  ;;  %v7343_v20 = vor.u32 %v9836_v14, %v7342_v11  ;;  %v7070_v21 = vld [vmem:[#allocation8 + $0x188] sm:$0xf] }
  0xd0   : > { %2578 = vmatpush.bf16.msrb.mxu2 %v7659_v29  ;;  %v9768_v22 = vld [vmem:[#allocation8 + $0x194] sm:$0xf0]  ;;  %v7198_v23 = vld [vmem:[#allocation8 + $0x288] sm:$0xf]  ;;  %v6943_v27 = vor.u32 %v9736_v18, %v6942_v17 }
  0xd1   : > { %2592 = vmatpush.bf16.msrb.mxu3 %v7787_v30  ;;  %v9800_v24 = vld [vmem:[#allocation8 + $0x294] sm:$0xf0]  ;;  %v7326_v25 = vld [vmem:[#allocation8 + $0x388] sm:$0xf]  ;;  %v7071_v28 = vor.u32 %v9768_v22, %v7070_v21 }
  0xd2   : > { %2551 = vmatpush.bf16.msrb.mxu0 %v7387_v44  ;;  %v9832_v26 = vld [vmem:[#allocation8 + $0x394] sm:$0xf0]  ;;  %v6926_v29 = vld [vmem:[#allocation8 + $0x68] sm:$0xf]  ;;  %v7199_v33 = vor.u32 %v9800_v24, %v7198_v23 }
  0xd3   : > { %2565 = vmatpush.bf16.msrb.mxu1 %v7515_v45  ;;  %v9732_v30 = vld [vmem:[#allocation8 + $0x74] sm:$0xf0]  ;;  %v7327_v34 = vor.u32 %v9832_v26, %v7326_v25  ;;  %v7054_v35 = vld [vmem:[#allocation8 + $0x168] sm:$0xf] }
  0xd4   : > { %2579 = vmatpush.bf16.msrb.mxu2 %v7643_v49  ;;  %v9764_v38 = vld [vmem:[#allocation8 + $0x174] sm:$0xf0]  ;;  %v7182_v39 = vld [vmem:[#allocation8 + $0x268] sm:$0xf]  ;;  %v6927_v43 = vor.u32 %v9732_v30, %v6926_v29 }
  0xd5   : > { %2593 = vmatpush.bf16.msrb.mxu3 %v7771_v50  ;;  %2552 = vmatmul.bf16.vlgmr.msrb.gmra.mxu0 %v11293_v31  ;;  %v9796_v40 = vld [vmem:[#allocation8 + $0x274] sm:$0xf0]  ;;  %v7310_v41 = vld [vmem:[#allocation8 + $0x368] sm:$0xf]  ;;  %v7055_v44 = vor.u32 %v9764_v38, %v7054_v35 }
  0xd6   : > { %2600 = vmatpush.bf16.msra.mxu0 %v6991_v51  ;;  %2566 = vmatmul.bf16.vlgmr.msrb.gmra.mxu1 %v11297_v36  ;;  %v9828_v42 = vld [vmem:[#allocation8 + $0x374] sm:$0xf0]  ;;  %v6910_v45 = vld [vmem:[#allocation8 + $0x48] sm:$0xf]  ;;  %v7183_v48 = vor.u32 %v9796_v40, %v7182_v39 }
  0xd7   : > { %2614 = vmatpush.bf16.msra.mxu1 %v7119_v52  ;;  %2580 = vmatmul.bf16.vlgmr.msrb.gmra.mxu2 %v11295_v32  ;;  %v9728_v46 = vld [vmem:[#allocation8 + $0x54] sm:$0xf0]  ;;  %v7038_v47 = vld [vmem:[#allocation8 + $0x148] sm:$0xf]  ;;  %v7311_v49 = vor.u32 %v9828_v42, %v7310_v41 }
  0xd8   : > { %2628 = vmatpush.bf16.msra.mxu2 %v7247_v55  ;;  %2594 = vmatmul.bf16.vlgmr.msrb.gmra.mxu3 %v11299_v37  ;;  %v9760_v50 = vld [vmem:[#allocation8 + $0x154] sm:$0xf0]  ;;  %v7166_v51 = vld [vmem:[#allocation8 + $0x248] sm:$0xf]  ;;  %v11052_v55 = vmov 0  }
  0xd9   : > { %2642 = vmatpush.bf16.msra.mxu3 %v7375_v56  ;;  %v9792_v52 = vld [vmem:[#allocation8 + $0x254] sm:$0xf0]  ;;  %v7294_v53 = vld [vmem:[#allocation8 + $0x348] sm:$0xf]  ;;  %10578 = vset.pattern.permute.xlu1 %v11052_v55  ;;  %v6911_v56 = vor.u32 %v9728_v46, %v6910_v45  ;;  %v7039_v58 = vor.u32 %v9760_v50, %v7038_v47 }
  0xda   : > { %2601 = vmatpush.bf16.msra.mxu0 %v6975_v1  ;;  %v9824_v54 = vld [vmem:[#allocation8 + $0x354] sm:$0xf0]  ;;  %10579 = vset.pattern.permute.xlu0 %v11052_v55  ;;  %v6894_v59 = vld [vmem:[#allocation8 + $0x28] sm:$0xf]  ;;  %v7167_v61 = vor.u32 %v9792_v52, %v7166_v51 }
  0xdb   : > { %2615 = vmatpush.bf16.msra.mxu1 %v7103_v2  ;;  %v9724_v60 = vld [vmem:[#allocation8 + $0x34] sm:$0xf0]  ;;  %v7295_v63 = vor.u32 %v9824_v54, %v7294_v53  ;;  %v7022_v0 = vld [vmem:[#allocation8 + $0x128] sm:$0xf] }
  0xdc   : > { %2629 = vmatpush.bf16.msra.mxu2 %v7231_v5  ;;  %v9756_v1 = vld [vmem:[#allocation8 + $0x134] sm:$0xf0]  ;;  %v7150_v2 = vld [vmem:[#allocation8 + $0x228] sm:$0xf]  ;;  %v6895_v8 = vor.u32 %v9724_v60, %v6894_v59 }
  0xdd   : > { %2643 = vmatpush.bf16.msra.mxu3 %v7359_v6  ;;  %v9788_v3 = vld [vmem:[#allocation8 + $0x234] sm:$0xf0]  ;;  %v7278_v4 = vld [vmem:[#allocation8 + $0x328] sm:$0xf]  ;;  %v751_v6 = vld [vmem:[#allocation3] sm:$0xff]  ;;  %v7023_v9 = vor.u32 %v9756_v1, %v7022_v0 }
  0xde   : > { %2602 = vmatpush.bf16.msra.mxu0 %v6959_v15  ;;  %v9820_v5 = vld [vmem:[#allocation8 + $0x334] sm:$0xf0]  ;;  %v6878_v7 = vld [vmem:[#allocation8 + $0x8] sm:$0xf]  ;;  %v7151_v15 = vor.u32 %v9788_v3, %v7150_v2 }
  0xdf   : > { %2616 = vmatpush.bf16.msra.mxu1 %v7087_v16  ;;  %v9720_v10 = vld [vmem:[#allocation8 + $0x14] sm:$0xf0]  ;;  %v7006_v11 = vld [vmem:[#allocation8 + $0x108] sm:$0xf]  ;;  %v7279_v16 = vor.u32 %v9820_v5, %v7278_v4 }
  0xe0   : > { %2630 = vmatpush.bf16.msra.mxu2 %v7215_v19  ;;  %v9752_v14 = vld [vmem:[#allocation8 + $0x114] sm:$0xf0]  ;;  %v7134_v17 = vld [vmem:[#allocation8 + $0x208] sm:$0xf] }
  0xe1   : > { %2644 = vmatpush.bf16.msra.mxu3 %v7343_v20  ;;  %v9784_v18 = vld [vmem:[#allocation8 + $0x214] sm:$0xf0]  ;;  %v7262_v19 = vld [vmem:[#allocation8 + $0x308] sm:$0xf]  ;;  %v7007_v29 = vor.u32 %v9752_v14, %v7006_v11 }
  0xe2   : > { %2603 = vmatpush.bf16.msra.mxu0 %v6943_v27  ;;  %v9816_v20 = vld [vmem:[#allocation8 + $0x314] sm:$0xf0]  ;;  %v7502_v21 = vld [vmem:[#allocation8 + $0x4e8] sm:$0xf]  ;;  %v7135_v35 = vor.u32 %v9784_v18, %v7134_v17 }
  0xe3   : > { %2617 = vmatpush.bf16.msra.mxu1 %v7071_v28  ;;  %v9876_v22 = vld [vmem:[#allocation8 + $0x4f4] sm:$0xf0]  ;;  %v7630_v24 = vld [vmem:[#allocation8 + $0x5e8] sm:$0xf]  ;;  %v6879_v28 = vor.u32 %v9720_v10, %v6878_v7  ;;  %v7263_v38 = vor.u32 %v9816_v20, %v7262_v19 }
  0xe4   : > { %2631 = vmatpush.bf16.msra.mxu2 %v7199_v33  ;;  %v9908_v25 = vld [vmem:[#allocation8 + $0x5f4] sm:$0xf0]  ;;  %v7758_v26 = vld [vmem:[#allocation8 + $0x6e8] sm:$0xf]  ;;  %v7503_v39 = vor.u32 %v9876_v22, %v7502_v21 }
  0xe5   : > { %2645 = vmatpush.bf16.msra.mxu3 %v7327_v34  ;;  %v9940_v30 = vld [vmem:[#allocation8 + $0x6f4] sm:$0xf0]  ;;  %v7886_v33 = vld [vmem:[#allocation8 + $0x7e8] sm:$0xf]  ;;  %v7631_v40 = vor.u32 %v9908_v25, %v7630_v24 }
  0xe6   : > { %2604 = vmatpush.bf16.msra.mxu0 %v6927_v43  ;;  %v9972_v34 = vld [vmem:[#allocation8 + $0x7f4] sm:$0xf0]  ;;  %v7486_v41 = vld [vmem:[#allocation8 + $0x4c8] sm:$0xf]  ;;  %v7759_v43 = vor.u32 %v9940_v30, %v7758_v26 }
  0xe7   : > { %2618 = vmatpush.bf16.msra.mxu1 %v7055_v44  ;;  %v9872_v42 = vld [vmem:[#allocation8 + $0x4d4] sm:$0xf0]  ;;  %v7887_v44 = vor.u32 %v9972_v34, %v7886_v33  ;;  %v7614_v45 = vld [vmem:[#allocation8 + $0x5c8] sm:$0xf] }
  0xe8   : > { %2632 = vmatpush.bf16.msra.mxu2 %v7183_v48  ;;  %v777_v23 = vpop.xlane.xlu0 %776  ;;  %v9904_v46 = vld [vmem:[#allocation8 + $0x5d4] sm:$0xf0]  ;;  %v7742_v47 = vld [vmem:[#allocation8 + $0x6c8] sm:$0xf]  ;;  %v7487_v52 = vor.u32 %v9872_v42, %v7486_v41 }
  0xe9   : > { %2646 = vmatpush.bf16.msra.mxu3 %v7311_v49  ;;  %v787_v27 = vadd.f32 %v777_v23, %v751_v6  ;;  %v9936_v48 = vld [vmem:[#allocation8 + $0x6d4] sm:$0xf0]  ;;  %v7870_v49 = vld [vmem:[#allocation8 + $0x7c8] sm:$0xf]  ;;  %v7615_v53 = vor.u32 %v9904_v46, %v7614_v45 }
  0xea   : > { %2605 = vmatpush.bf16.msra.mxu0 %v6911_v56  ;;  %v9968_v50 = vld [vmem:[#allocation8 + $0x7d4] sm:$0xf0]  ;;  %v7470_v54 = vld [vmem:[#allocation8 + $0x4a8] sm:$0xf] }
  0xeb   : > { %2619 = vmatpush.bf16.msra.mxu1 %v7039_v58  ;;  %790 = vst.msk [vmem:[#allocation3] sm:$0xff] %vm724_vm0, %v787_v27  ;;  %v752_v51 = vld [vmem:[#allocation3 + $0x8] sm:$0xff]  ;;  %v7743_v58 = vor.u32 %v9936_v48, %v7742_v47  ;;  %v7871_v59 = vor.u32 %v9968_v50, %v7870_v49  ;;  %v7598_v60 = vld [vmem:[#allocation8 + $0x5a8] sm:$0xf] }
  0xec   : > { %2633 = vmatpush.bf16.msra.mxu2 %v7167_v61  ;;  %v9868_v55 = vld [vmem:[#allocation8 + $0x4b4] sm:$0xf0]  ;;  %v7854_v2 = vld [vmem:[#allocation8 + $0x7a8] sm:$0xf] }
  0xed   : > { %2647 = vmatpush.bf16.msra.mxu3 %v7295_v63  ;;  %v9900_v61 = vld [vmem:[#allocation8 + $0x5b4] sm:$0xf0]  ;;  %v7726_v63 = vld [vmem:[#allocation8 + $0x6a8] sm:$0xf]  ;;  %v7471_v6 = vor.u32 %v9868_v55, %v7470_v54 }
  0xee   : > { %2606 = vmatpush.bf16.msra.mxu0 %v6895_v8  ;;  %v9932_v1 = vld [vmem:[#allocation8 + $0x6b4] sm:$0xf0]  ;;  %v7454_v4 = vld [vmem:[#allocation8 + $0x488] sm:$0xf]  ;;  %v7599_v7 = vor.u32 %v9900_v61, %v7598_v60 }
  0xef   : > { %2620 = vmatpush.bf16.msra.mxu1 %v7023_v9  ;;  %v9964_v3 = vld [vmem:[#allocation8 + $0x7b4] sm:$0xf0]  ;;  %v7727_v10 = vor.u32 %v9932_v1, %v7726_v63  ;;  %v7582_v14 = vld [vmem:[#allocation8 + $0x588] sm:$0xf] }
  0xf0   : > { %2634 = vmatpush.bf16.msra.mxu2 %v7151_v15  ;;  %v786_v56 = vpop.xlane.xlu0 %785  ;;  %v9864_v8 = vld [vmem:[#allocation8 + $0x494] sm:$0xf0]  ;;  %v7855_v11 = vor.u32 %v9964_v3, %v7854_v2  ;;  %v7838_v18 = vld [vmem:[#allocation8 + $0x788] sm:$0xf] }
  0xf1   : > { %2648 = vmatpush.bf16.msra.mxu3 %v7279_v16  ;;  %v788_v0 = vadd.f32 %v786_v56, %v752_v51  ;;  %v9896_v15 = vld [vmem:[#allocation8 + $0x594] sm:$0xf0]  ;;  %v7710_v16 = vld [vmem:[#allocation8 + $0x688] sm:$0xf]  ;;  %v7455_v20 = vor.u32 %v9864_v8, %v7454_v4 }
  0xf2   : > { %2607 = vmatpush.bf16.msra.mxu0 %v6879_v28  ;;  %v2843_v5 = vld [vmem:[#allocation3] sm:$0xff]  ;;  %v9928_v17 = vld [vmem:[#allocation8 + $0x694] sm:$0xf0]  ;;  %v7583_v21 = vor.u32 %v9896_v15, %v7582_v14  ;;  %v7438_v22 = vld [vmem:[#allocation8 + $0x468] sm:$0xf] }
  0xf3   : > { %2621 = vmatpush.bf16.msra.mxu1 %v7007_v29  ;;  %791 = vst.msk [vmem:[#allocation3 + $0x8] sm:$0xff] %vm724_vm0, %v788_v0  ;;  %v11321_v9 = vmax.f32 %v2843_v5, 1e-24  ;;  %v9960_v19 = vld [vmem:[#allocation8 + $0x794] sm:$0xf0]  ;;  %v7711_v24 = vor.u32 %v9928_v17, %v7710_v16 }
  0xf4   : > { %2635 = vmatpush.bf16.msra.mxu2 %v7135_v35  ;;  %v9860_v23 = vld [vmem:[#allocation8 + $0x474] sm:$0xf0]  ;;  %v7839_v25 = vor.u32 %v9960_v19, %v7838_v18  ;;  %v7566_v26 = vld [vmem:[#allocation8 + $0x568] sm:$0xf] }
  0xf5   : > { %2649 = vmatpush.bf16.msra.mxu3 %v7263_v38  ;;  %2608 = vmatmul.bf16.vlgmr.msra.gmra.mxu0 %v11281_v57  ;;  %10580 = vrsqrt.f32 %v11321_v9  ;;  %v9892_v27 = vld [vmem:[#allocation8 + $0x574] sm:$0xf0]  ;;  %v7694_v28 = vld [vmem:[#allocation8 + $0x668] sm:$0xf]  ;;  %vm2853_vm1 = vweird.f32 %v11321_v9 }
  0xf6   : > { %2656 = vmatpush.bf16.msrb.mxu0 %v7503_v39  ;;  %2622 = vmatmul.bf16.vlgmr.msra.gmra.mxu1 %v11286_v12  ;;  %v9924_v29 = vld [vmem:[#allocation8 + $0x674] sm:$0xf0]  ;;  %v7822_v30 = vld [vmem:[#allocation8 + $0x768] sm:$0xf]  ;;  %v7439_v39 = vor.u32 %v9860_v23, %v7438_v22 }
  0xf7   : > { %2670 = vmatpush.bf16.msrb.mxu1 %v7631_v40  ;;  %2636 = vmatmul.bf16.vlgmr.msra.gmra.mxu2 %v11283_v62  ;;  %v9956_v33 = vld [vmem:[#allocation8 + $0x774] sm:$0xf0]  ;;  %v7422_v34 = vld [vmem:[#allocation8 + $0x448] sm:$0xf]  ;;  %v7567_v40 = vor.u32 %v9892_v27, %v7566_v26  ;;  %v6992_v26 = vld [vmem:[#allocation8 + $0xf8] sm:$0xf0] }
  0xf8   : > { %2684 = vmatpush.bf16.msrb.mxu2 %v7759_v43  ;;  %2650 = vmatmul.bf16.vlgmr.msra.gmra.mxu3 %v11288_v13  ;;  %v9856_v41 = vld [vmem:[#allocation8 + $0x454] sm:$0xf0]  ;;  %v7550_v42 = vld [vmem:[#allocation8 + $0x548] sm:$0xf]  ;;  %v7823_v45 = vor.u32 %v9956_v33, %v7822_v30  ;;  %v9778_v27 = vld [vmem:[#allocation8 + $0x1ec] sm:$0xf] }
  0xf9   : > { %2698 = vmatpush.bf16.msrb.mxu3 %v7887_v44  ;;  %v7695_v44 = vor.u32 %v9924_v29, %v7694_v28  ;;  %v9888_v47 = vld [vmem:[#allocation8 + $0x554] sm:$0xf0]  ;;  %v7678_v48 = vld [vmem:[#allocation8 + $0x648] sm:$0xf]  ;;  %v7120_v30 = vld [vmem:[#allocation8 + $0x1f8] sm:$0xf0] }
  0xfa   : > { %2657 = vmatpush.bf16.msrb.mxu0 %v7487_v52  ;;  %v2844_v35 = vld [vmem:[#allocation3 + $0x8] sm:$0xff]  ;;  %v7806_v50 = vld [vmem:[#allocation8 + $0x748] sm:$0xf]  ;;  %v7551_v54 = vor.u32 %v9888_v47, %v7550_v42  ;;  %v9810_v33 = vld [vmem:[#allocation8 + $0x2ec] sm:$0xf] }
  0xfb   : > { %2671 = vmatpush.bf16.msrb.mxu1 %v7615_v53  ;;  %v11324_v38 = vpop.eup %10580  ;;  %v11326_v43 = vmax.f32 %v2844_v35, 1e-24  ;;  %v9920_v49 = vld [vmem:[#allocation8 + $0x654] sm:$0xf0]  ;;  %v7423_v53 = vor.u32 %v9856_v41, %v7422_v34  ;;  %v7406_v56 = vld [vmem:[#allocation8 + $0x428] sm:$0xf] }
  0xfc   : > { %2685 = vmatpush.bf16.msrb.mxu2 %v7743_v58  ;;  %v2848_v46 = vmul.f32 %v11324_v38, %v11321_v9  ;;  %v9952_v51 = vld [vmem:[#allocation8 + $0x754] sm:$0xf0]  ;;  %v7679_v55 = vor.u32 %v9920_v49, %v7678_v48  ;;  %vm2854_vm2 = vweird.f32 %v11324_v38  ;;  %v7534_v61 = vld [vmem:[#allocation8 + $0x528] sm:$0xf]  ;;  %v7248_v34 = vld [vmem:[#allocation8 + $0x2f8] sm:$0xf0] }
  0xfd   : > { %2699 = vmatpush.bf16.msrb.mxu3 %v7871_v59  ;;  %10582 = vrsqrt.f32 %v11326_v43  ;;  %v9852_v58 = vld [vmem:[#allocation8 + $0x434] sm:$0xf0]  ;;  %v7807_v60 = vor.u32 %v9952_v51, %v7806_v50  ;;  %v7662_v0 = vld [vmem:[#allocation8 + $0x628] sm:$0xf]  ;;  %vm11336_vm3 = vmor %vm2853_vm1, %vm2854_vm2  ;;  %vm2863_vm4 = vweird.f32 %v11326_v43  ;;  %v7251_v47 = vor.u32 %v9810_v33, %v7248_v34 }
  0xfe   : > { %2658 = vmatpush.bf16.msrb.mxu0 %v7471_v6  ;;  %v2849_v52 = vmul.f32 %v11324_v38, %v2848_v46  ;;  %v9884_v63 = vld [vmem:[#allocation8 + $0x534] sm:$0xf0]  ;;  %v7790_v3 = vld [vmem:[#allocation8 + $0x728] sm:$0xf]  ;;  %v7123_v46 = vor.u32 %v9778_v27, %v7120_v30  ;;  %v6976_v48 = vld [vmem:[#allocation8 + $0xd8] sm:$0xf0] }
  0xff   : > { %2672 = vmatpush.bf16.msrb.mxu1 %v7599_v7  ;;  %v9916_v1 = vld [vmem:[#allocation8 + $0x634] sm:$0xf0]  ;;  %v7407_v7 = vor.u32 %v9852_v58, %v7406_v56  ;;  %v7535_v8 = vor.u32 %v9884_v63, %v7534_v61  ;;  %v7390_v9 = vld [vmem:[#allocation8 + $0x408] sm:$0xf]  ;;  %v9774_v49 = vld [vmem:[#allocation8 + $0x1cc] sm:$0xf] }
 0x100   : > { %2686 = vmatpush.bf16.msrb.mxu2 %v7727_v10  ;;  %v2850_v59 = vmul.f32 0.5, %v2849_v52  ;;  %v9948_v4 = vld [vmem:[#allocation8 + $0x734] sm:$0xf0]  ;;  %v7663_v14 = vor.u32 %v9916_v1, %v7662_v0  ;;  %v7518_v16 = vld [vmem:[#allocation8 + $0x508] sm:$0xf] }
 0x101   : > { %2700 = vmatpush.bf16.msrb.mxu3 %v7855_v11  ;;  %v9848_v10 = vld [vmem:[#allocation8 + $0x414] sm:$0xf0]  ;;  %v7646_v18 = vld [vmem:[#allocation8 + $0x608] sm:$0xf]  ;;  %v7791_v19 = vor.u32 %v9948_v4, %v7790_v3  ;;  %v7104_v51 = vld [vmem:[#allocation8 + $0x1d8] sm:$0xf0] }
 0x102   : > { %2659 = vmatpush.bf16.msrb.mxu0 %v7455_v20  ;;  %v2851_v2 = vsub.f32 1.5, %v2850_v59  ;;  %v9880_v17 = vld [vmem:[#allocation8 + $0x514] sm:$0xf0]  ;;  %v7391_v28 = vor.u32 %v9848_v10, %v7390_v9  ;;  %v9806_v52 = vld [vmem:[#allocation8 + $0x2cc] sm:$0xf] }
 0x103   : > { %2673 = vmatpush.bf16.msrb.mxu1 %v7583_v21  ;;  %v11334_v5 = vpop.eup %10582  ;;  %v9912_v20 = vld [vmem:[#allocation8 + $0x614] sm:$0xf0]  ;;  %v7774_v21 = vld [vmem:[#allocation8 + $0x708] sm:$0xf]  ;;  %v7519_v29 = vor.u32 %v9880_v17, %v7518_v16  ;;  %v7360_v56 = vld [vmem:[#allocation8 + $0x3d8] sm:$0xf0] }
 0x104   : > { %2687 = vmatpush.bf16.msrb.mxu2 %v7711_v24  ;;  %v2852_v11 = vmul.f32 %v11324_v38, %v2851_v2  ;;  %v2858_v15 = vmul.f32 %v11334_v5, %v11326_v43  ;;  %v9944_v22 = vld [vmem:[#allocation8 + $0x714] sm:$0xf0]  ;;  %vm2864_vm5 = vweird.f32 %v11334_v5  ;;  %v9738_v61 = vld [vmem:[#allocation8 + $0xac] sm:$0xf]  ;;  %v6960_v63 = vld [vmem:[#allocation8 + $0xb8] sm:$0xf0] }
 0x105   : > { %2701 = vmatpush.bf16.msrb.mxu3 %v7839_v25  ;;  %v9746_v25 = vld [vmem:[#allocation8 + $0xec] sm:$0xf]  ;;  %v7775_v41 = vor.u32 %v9944_v22, %v7774_v21  ;;  %vm11349_vm6 = vmor %vm2863_vm4, %vm2864_vm5  ;;  %v7088_v3 = vld [vmem:[#allocation8 + $0x1b8] sm:$0xf0] }
 0x106   : > { %2660 = vmatpush.bf16.msrb.mxu0 %v7439_v39  ;;  %v2856_v23 = vsel %vm11336_vm3, %v11324_v38, %v2852_v11  ;;  %v2859_v24 = vmul.f32 %v11334_v5, %v2858_v15  ;;  %v7647_v38 = vor.u32 %v9912_v20, %v7646_v18  ;;  %v9842_v39 = vld [vmem:[#allocation8 + $0x3ec] sm:$0xf]  ;;  %v6995_v42 = vor.u32 %v9746_v25, %v6992_v26  ;;  %v7216_v6 = vld [vmem:[#allocation8 + $0x2b8] sm:$0xf0] }
 0x107   : > { %2674 = vmatpush.bf16.msrb.mxu1 %v7567_v40  ;;  %2877 = vperm.xlu1 %10578, %v2856_v23   ;;  %v7376_v40 = vld [vmem:[#allocation8 + $0x3f8] sm:$0xf0]  ;;  %v9770_v2 = vld [vmem:[#allocation8 + $0x1ac] sm:$0xf] }
 0x108   : > { %2688 = vmatpush.bf16.msrb.mxu2 %v7695_v44  ;;  %v2860_v35 = vmul.f32 0.5, %v2859_v24  ;;  %v9742_v44 = vld [vmem:[#allocation8 + $0xcc] sm:$0xf]  ;;  %v7379_v43 = vor.u32 %v9842_v39, %v7376_v40  ;;  %v7091_v9 = vor.u32 %v9770_v2, %v7088_v3  ;;  %v6944_v11 = vld [vmem:[#allocation8 + $0x98] sm:$0xf0] }
 0x109   : > { %2702 = vmatpush.bf16.msrb.mxu3 %v7823_v45  ;;  %v6979_v59 = vor.u32 %v9742_v44, %v6976_v48  ;;  %v9802_v4 = vld [vmem:[#allocation8 + $0x2ac] sm:$0xf]  ;;  %v7072_v17 = vld [vmem:[#allocation8 + $0x198] sm:$0xf0] }
 0x10a   : > { %2661 = vmatpush.bf16.msrb.mxu0 %v7423_v53  ;;  %v2861_v45 = vsub.f32 1.5, %v2860_v35  ;;  %v9734_v10 = vld [vmem:[#allocation8 + $0x8c] sm:$0xf]  ;;  %v7328_v21 = vld [vmem:[#allocation8 + $0x398] sm:$0xf0] }
 0x10b   : > { %2675 = vmatpush.bf16.msrb.mxu1 %v7551_v54  ;;  %v7232_v54 = vld [vmem:[#allocation8 + $0x2d8] sm:$0xf0]  ;;  %v9766_v16 = vld [vmem:[#allocation8 + $0x18c] sm:$0xf]  ;;  %v6947_v22 = vor.u32 %v9734_v10, %v6944_v11 }
 0x10c   : > { %2689 = vmatpush.bf16.msrb.mxu2 %v7679_v55  ;;  %v2862_v53 = vmul.f32 %v11334_v5, %v2861_v45  ;;  %v9838_v55 = vld [vmem:[#allocation8 + $0x3cc] sm:$0xf]  ;;  %v7235_v0 = vor.u32 %v9806_v52, %v7232_v54  ;;  %v7075_v23 = vor.u32 %v9766_v16, %v7072_v17  ;;  %v6928_v25 = vld [vmem:[#allocation8 + $0x78] sm:$0xf0] }
 0x10d   : > { %2703 = vmatpush.bf16.msrb.mxu3 %v7807_v60  ;;  %v7107_v60 = vor.u32 %v9774_v49, %v7104_v51  ;;  %v7363_v1 = vor.u32 %v9838_v55, %v7360_v56  ;;  %v9798_v18 = vld [vmem:[#allocation8 + $0x28c] sm:$0xf]  ;;  %v7184_v33 = vld [vmem:[#allocation8 + $0x278] sm:$0xf0] }
 0x10e   : > { %2662 = vmatpush.bf16.msrb.mxu0 %v7407_v7  ;;  %v2866_v58 = vsel %vm11349_vm6, %v11334_v5, %v2862_v53  ;;  %v9834_v7 = vld [vmem:[#allocation8 + $0x3ac] sm:$0xf]  ;;  %v7344_v5 = vld [vmem:[#allocation8 + $0x3b8] sm:$0xf0] }
 0x10f   : > { %2676 = vmatpush.bf16.msrb.mxu1 %v7535_v8  ;;  %2882 = vperm.xlu1 %10578, %v2866_v58   ;;  %v6963_v8 = vor.u32 %v9738_v61, %v6960_v63  ;;  %v7347_v15 = vor.u32 %v9834_v7, %v7344_v5  ;;  %v9830_v20 = vld [vmem:[#allocation8 + $0x38c] sm:$0xf]  ;;  %v7312_v35 = vld [vmem:[#allocation8 + $0x378] sm:$0xf0] }
 0x110   : > { %2690 = vmatpush.bf16.msrb.mxu2 %v7663_v14  ;;  %v7219_v14 = vor.u32 %v9802_v4, %v7216_v6  ;;  %v9730_v24 = vld [vmem:[#allocation8 + $0x6c] sm:$0xf]  ;;  %v7331_v27 = vor.u32 %v9830_v20, %v7328_v21  ;;  %v7168_v48 = vld [vmem:[#allocation8 + $0x258] sm:$0xf0] }
 0x111   : > { %2704 = vmatpush.bf16.msrb.mxu3 %v7791_v19  ;;  %v7200_v19 = vld [vmem:[#allocation8 + $0x298] sm:$0xf0]  ;;  %v9794_v30 = vld [vmem:[#allocation8 + $0x26c] sm:$0xf] }
 0x112   : > { %2663 = vmatpush.bf16.msrb.mxu0 %v7391_v28  ;;  %v7203_v26 = vor.u32 %v9798_v18, %v7200_v19  ;;  %v9762_v28 = vld [vmem:[#allocation8 + $0x16c] sm:$0xf]  ;;  %v7296_v50 = vld [vmem:[#allocation8 + $0x358] sm:$0xf0] }
 0x113   : > { %2677 = vmatpush.bf16.msrb.mxu1 %v7519_v29  ;;  %v7056_v29 = vld [vmem:[#allocation8 + $0x178] sm:$0xf0]  ;;  %v9826_v34 = vld [vmem:[#allocation8 + $0x36c] sm:$0xf] }
 0x114   : > { %2691 = vmatpush.bf16.msrb.mxu2 %v7647_v38  ;;  %v6931_v38 = vor.u32 %v9730_v24, %v6928_v25  ;;  %v7059_v39 = vor.u32 %v9762_v28, %v7056_v29  ;;  %v9726_v40 = vld [vmem:[#allocation8 + $0x4c] sm:$0xf]  ;;  %v7315_v44 = vor.u32 %v9826_v34, %v7312_v35  ;;  %v6896_v53 = vld [vmem:[#allocation8 + $0x38] sm:$0xf0] }
 0x115   : > { %2705 = vmatpush.bf16.msrb.mxu3 %v7775_v41  ;;  %2664 = vmatmul.bf16.vlgmr.msrb.gmra.mxu0 %v11293_v31  ;;  %v6912_v41 = vld [vmem:[#allocation8 + $0x58] sm:$0xf0]  ;;  %v9758_v45 = vld [vmem:[#allocation8 + $0x14c] sm:$0xf] }
 0x116   : > { %2712 = vmatpush.bf16.msra.mxu0 %v6995_v42  ;;  %2678 = vmatmul.bf16.vlgmr.msrb.gmra.mxu1 %v11297_v36  ;;  %v7187_v42 = vor.u32 %v9794_v30, %v7184_v33  ;;  %v9822_v49 = vld [vmem:[#allocation8 + $0x34c] sm:$0xf]  ;;  %v7024_v58 = vld [vmem:[#allocation8 + $0x138] sm:$0xf0] }
 0x117   : > { %2726 = vmatpush.bf16.msra.mxu1 %v7123_v46  ;;  %2692 = vmatmul.bf16.vlgmr.msrb.gmra.mxu2 %v11295_v32  ;;  %v7040_v46 = vld [vmem:[#allocation8 + $0x158] sm:$0xf0]  ;;  %v9722_v52 = vld [vmem:[#allocation8 + $0x2c] sm:$0xf]  ;;  %v7299_v55 = vor.u32 %v9822_v49, %v7296_v50 }
 0x118   : > { %2740 = vmatpush.bf16.msra.mxu2 %v7251_v47  ;;  %2706 = vmatmul.bf16.vlgmr.msrb.gmra.mxu3 %v11299_v37  ;;  %v9790_v47 = vld [vmem:[#allocation8 + $0x24c] sm:$0xf]  ;;  %v7043_v51 = vor.u32 %v9758_v45, %v7040_v46  ;;  %v7280_v63 = vld [vmem:[#allocation8 + $0x338] sm:$0xf0] }
 0x119   : > { %2754 = vmatpush.bf16.msra.mxu3 %v7379_v43  ;;  %v6915_v43 = vor.u32 %v9726_v40, %v6912_v41  ;;  %v7171_v54 = vor.u32 %v9790_v47, %v7168_v48  ;;  %v9754_v56 = vld [vmem:[#allocation8 + $0x12c] sm:$0xf]  ;;  %v6880_v3 = vld [vmem:[#allocation8 + $0x18] sm:$0xf0]  ;;  %v11361_v47 = vpop.f32.mrf.mxu0 }
 0x11a   : > { %2713 = vmatpush.bf16.msra.mxu0 %v6979_v59  ;;  %v9786_v59 = vld [vmem:[#allocation8 + $0x22c] sm:$0xf]  ;;  %v7027_v2 = vor.u32 %v9754_v56, %v7024_v58  ;;  %v7008_v6 = vld [vmem:[#allocation8 + $0x118] sm:$0xf0] }
 0x11b   : > { %2727 = vmatpush.bf16.msra.mxu1 %v7107_v60  ;;  %v7152_v60 = vld [vmem:[#allocation8 + $0x238] sm:$0xf0]  ;;  %v9818_v61 = vld [vmem:[#allocation8 + $0x32c] sm:$0xf] }
 0x11c   : > { %2741 = vmatpush.bf16.msra.mxu2 %v7235_v0  ;;  %v9718_v0 = vld [vmem:[#allocation8 + $0xc] sm:$0xf]  ;;  %v7155_v7 = vor.u32 %v9786_v59, %v7152_v60  ;;  %v7283_v5 = vor.u32 %v9818_v61, %v7280_v63  ;;  %v7264_v11 = vld [vmem:[#allocation8 + $0x318] sm:$0xf0] }
 0x11d   : > { %2755 = vmatpush.bf16.msra.mxu3 %v7363_v1  ;;  %v6899_v1 = vor.u32 %v9722_v52, %v6896_v53  ;;  %v9750_v4 = vld [vmem:[#allocation8 + $0x10c] sm:$0xf]  ;;  %v7632_v17 = vld [vmem:[#allocation8 + $0x5f8] sm:$0xf0]  ;;  %v6883_v19 = vor.u32 %v9718_v0, %v6880_v3  ;;  %v11363_v52 = vpop.f32.mrf.mxu1 }
 0x11e   : > { %2714 = vmatpush.bf16.msra.mxu0 %v6963_v8  ;;  %v9782_v8 = vld [vmem:[#allocation8 + $0x20c] sm:$0xf]  ;;  %v7011_v20 = vor.u32 %v9750_v4, %v7008_v6  ;;  %v7760_v21 = vld [vmem:[#allocation8 + $0x6f8] sm:$0xf0]  ;;  %v11369_v4 = vpop.f32.mrf.mxu2 }
 0x11f   : > { %2728 = vmatpush.bf16.msra.mxu1 %v7091_v9  ;;  %v7136_v9 = vld [vmem:[#allocation8 + $0x218] sm:$0xf0]  ;;  %v9814_v10 = vld [vmem:[#allocation8 + $0x30c] sm:$0xf] }
 0x120   : > { %2742 = vmatpush.bf16.msra.mxu2 %v7219_v14  ;;  %v9874_v14 = vld [vmem:[#allocation8 + $0x4ec] sm:$0xf]  ;;  %v7139_v24 = vor.u32 %v9782_v8, %v7136_v9  ;;  %v7267_v25 = vor.u32 %v9814_v10, %v7264_v11  ;;  %v7488_v29 = vld [vmem:[#allocation8 + $0x4d8] sm:$0xf0] }
 0x121   : > { %2756 = vmatpush.bf16.msra.mxu3 %v7347_v15  ;;  %v7504_v15 = vld [vmem:[#allocation8 + $0x4f8] sm:$0xf0]  ;;  %v9906_v16 = vld [vmem:[#allocation8 + $0x5ec] sm:$0xf] }
 0x122   : > { %2715 = vmatpush.bf16.msra.mxu0 %v6947_v22  ;;  %v9938_v18 = vld [vmem:[#allocation8 + $0x6ec] sm:$0xf]  ;;  %v7616_v35 = vld [vmem:[#allocation8 + $0x5d8] sm:$0xf0] }
 0x123   : > { %2729 = vmatpush.bf16.msra.mxu1 %v7075_v23  ;;  %v9970_v22 = vld [vmem:[#allocation8 + $0x7ec] sm:$0xf]  ;;  %v7888_v23 = vld [vmem:[#allocation8 + $0x7f8] sm:$0xf0]  ;;  %v7763_v30 = vor.u32 %v9938_v18, %v7760_v21  ;;  %v11373_v18 = vpop.f32.mrf.mxu0 }
 0x124   : > { %2743 = vmatpush.bf16.msra.mxu2 %v7203_v26  ;;  %v7507_v26 = vor.u32 %v9874_v14, %v7504_v15  ;;  %v9870_v28 = vld [vmem:[#allocation8 + $0x4cc] sm:$0xf]  ;;  %v7891_v33 = vor.u32 %v9970_v22, %v7888_v23  ;;  %v7872_v41 = vld [vmem:[#allocation8 + $0x7d8] sm:$0xf0] }
 0x125   : > { %2757 = vmatpush.bf16.msra.mxu3 %v7331_v27  ;;  %v7635_v27 = vor.u32 %v9906_v16, %v7632_v17  ;;  %v9902_v34 = vld [vmem:[#allocation8 + $0x5cc] sm:$0xf]  ;;  %v7472_v46 = vld [vmem:[#allocation8 + $0x4b8] sm:$0xf0] }
 0x126   : > { %2716 = vmatpush.bf16.msra.mxu0 %v6931_v38  ;;  %v9934_v38 = vld [vmem:[#allocation8 + $0x6cc] sm:$0xf]  ;;  %v7728_v53 = vld [vmem:[#allocation8 + $0x6b8] sm:$0xf0] }
 0x127   : > { %2730 = vmatpush.bf16.msra.mxu1 %v7059_v39  ;;  %v7744_v39 = vld [vmem:[#allocation8 + $0x6d8] sm:$0xf0]  ;;  %v9966_v40 = vld [vmem:[#allocation8 + $0x7cc] sm:$0xf] }
 0x128   : > { %2744 = vmatpush.bf16.msra.mxu2 %v7187_v42  ;;  %v7491_v42 = vor.u32 %v9870_v28, %v7488_v29  ;;  %v9866_v45 = vld [vmem:[#allocation8 + $0x4ac] sm:$0xf]  ;;  %v7747_v48 = vor.u32 %v9934_v38, %v7744_v39  ;;  %v7875_v49 = vor.u32 %v9966_v40, %v7872_v41  ;;  %v7456_v60 = vld [vmem:[#allocation8 + $0x498] sm:$0xf0]  ;;  %v11377_v40 = vpop.f32.mrf.mxu2 }
 0x129   : > { %2758 = vmatpush.bf16.msra.mxu3 %v7315_v44  ;;  %v7619_v44 = vor.u32 %v9902_v34, %v7616_v35  ;;  %v9898_v50 = vld [vmem:[#allocation8 + $0x5ac] sm:$0xf]  ;;  %v7475_v56 = vor.u32 %v9866_v45, %v7472_v46  ;;  %v7584_v0 = vld [vmem:[#allocation8 + $0x598] sm:$0xf0] }
 0x12a   : > { %2717 = vmatpush.bf16.msra.mxu0 %v6915_v43  ;;  %v7600_v43 = vld [vmem:[#allocation8 + $0x5b8] sm:$0xf0]  ;;  %v9862_v59 = vld [vmem:[#allocation8 + $0x48c] sm:$0xf] }
 0x12b   : > { %2731 = vmatpush.bf16.msra.mxu1 %v7043_v51  ;;  %v9930_v51 = vld [vmem:[#allocation8 + $0x6ac] sm:$0xf]  ;;  %v7603_v58 = vor.u32 %v9898_v50, %v7600_v43  ;;  %v7840_v3 = vld [vmem:[#allocation8 + $0x798] sm:$0xf0] }
 0x12c   : > { %2745 = vmatpush.bf16.msra.mxu2 %v7171_v54  ;;  %v9962_v54 = vld [vmem:[#allocation8 + $0x7ac] sm:$0xf]  ;;  %v7731_v61 = vor.u32 %v9930_v51, %v7728_v53  ;;  %v7568_v11 = vld [vmem:[#allocation8 + $0x578] sm:$0xf0] }
 0x12d   : > { %2759 = vmatpush.bf16.msra.mxu3 %v7299_v55  ;;  %v7856_v55 = vld [vmem:[#allocation8 + $0x7b8] sm:$0xf0]  ;;  %v9890_v10 = vld [vmem:[#allocation8 + $0x56c] sm:$0xf] }
 0x12e   : > { %2718 = vmatpush.bf16.msra.mxu0 %v6899_v1  ;;  %v7859_v63 = vor.u32 %v9962_v54, %v7856_v55  ;;  %v7712_v1 = vld [vmem:[#allocation8 + $0x698] sm:$0xf0]  ;;  %v9922_v14 = vld [vmem:[#allocation8 + $0x66c] sm:$0xf]  ;;  %v7571_v21 = vor.u32 %v9890_v10, %v7568_v11 }
 0x12f   : > { %2732 = vmatpush.bf16.msra.mxu1 %v7027_v2  ;;  %v9958_v2 = vld [vmem:[#allocation8 + $0x78c] sm:$0xf]  ;;  %v7696_v15 = vld [vmem:[#allocation8 + $0x678] sm:$0xf0] }
 0x130   : > { %2746 = vmatpush.bf16.msra.mxu2 %v7155_v7  ;;  %v9858_v7 = vld [vmem:[#allocation8 + $0x46c] sm:$0xf]  ;;  %v7843_v9 = vor.u32 %v9958_v2, %v7840_v3  ;;  %v7824_v17 = vld [vmem:[#allocation8 + $0x778] sm:$0xf0]  ;;  %v8006_v2 = vld [vmem:[#allocation11 + $0xe0] sm:$0xf] }
 0x131   : > { %2760 = vmatpush.bf16.msra.mxu3 %v7283_v5  ;;  %v7440_v5 = vld [vmem:[#allocation8 + $0x478] sm:$0xf0]  ;;  %v9954_v16 = vld [vmem:[#allocation8 + $0x76c] sm:$0xf]  ;;  %v10003_v3 = vld [vmem:[#allocation11 + $0xec] sm:$0xf0] }
 0x132   : > { %2719 = vmatpush.bf16.msra.mxu0 %v6883_v19  ;;  %v11375_v19 = vpop.f32.mrf.mxu1  ;;  %v9854_v22 = vld [vmem:[#allocation8 + $0x44c] sm:$0xf]  ;;  %v7424_v23 = vld [vmem:[#allocation8 + $0x458] sm:$0xf0]  ;;  %v8007_v10 = vor.u32 %v10003_v3, %v8006_v2  ;;  %v7910_v3 = vld [vmem:[#allocation11 + $0x20] sm:$0xf] }
 0x133   : > { %2733 = vmatpush.bf16.msra.mxu1 %v7011_v20  ;;  %v7443_v20 = vor.u32 %v9858_v7, %v7440_v5  ;;  %v9918_v28 = vld [vmem:[#allocation8 + $0x64c] sm:$0xf]  ;;  %v7680_v29 = vld [vmem:[#allocation8 + $0x658] sm:$0xf0]  ;;  %v7427_v34 = vor.u32 %v9854_v22, %v7424_v23 }
 0x134   : > { %2747 = vmatpush.bf16.msra.mxu2 %v7139_v24  ;;  %v7699_v24 = vor.u32 %v9922_v14, %v7696_v15  ;;  %v9850_v38 = vld [vmem:[#allocation8 + $0x42c] sm:$0xf]  ;;  %v7408_v39 = vld [vmem:[#allocation8 + $0x438] sm:$0xf0]  ;;  %v7683_v41 = vor.u32 %v9918_v28, %v7680_v29  ;;  %v7990_v14 = vld [vmem:[#allocation11 + $0xc0] sm:$0xf]  ;;  %v11385_v15 = vpop.f32.mrf.mxu2 }
 0x135   : > { %2761 = vmatpush.bf16.msra.mxu3 %v7267_v25  ;;  %2720 = vmatmul.bf16.vlgmr.msra.gmra.mxu0 %v11281_v57  ;;  %v11371_v57 = vpop.f32.mrf.mxu3  ;;  %v7827_v25 = vor.u32 %v9954_v16, %v7824_v17  ;;  %v7536_v45 = vld [vmem:[#allocation8 + $0x538] sm:$0xf0]  ;;  %v9914_v46 = vld [vmem:[#allocation8 + $0x62c] sm:$0xf]  ;;  %v7411_v51 = vor.u32 %v9850_v38, %v7408_v39  ;;  %v9999_v16 = vld [vmem:[#allocation11 + $0xcc] sm:$0xf0] }
 0x136   : > { %2768 = vmatpush.bf16.msrb.mxu0 %v7507_v26  ;;  %2734 = vmatmul.bf16.vlgmr.msra.gmra.mxu1 %v11286_v12  ;;  %v7459_v12 = vor.u32 %v9862_v59, %v7456_v60  ;;  %v9886_v26 = vld [vmem:[#allocation8 + $0x54c] sm:$0xf]  ;;  %v7792_v43 = vld [vmem:[#allocation8 + $0x738] sm:$0xf0]  ;;  %v8118_v17 = vld [vmem:[#allocation11 + $0x1c0] sm:$0xf]  ;;  %v7991_v22 = vor.u32 %v9999_v16, %v7990_v14 }
 0x137   : > { %2782 = vmatpush.bf16.msrb.mxu1 %v7635_v27  ;;  %2748 = vmatmul.bf16.vlgmr.msra.gmra.mxu2 %v11283_v62  ;;  %v9894_v62 = vld [vmem:[#allocation8 + $0x58c] sm:$0xf]  ;;  %v7552_v27 = vld [vmem:[#allocation8 + $0x558] sm:$0xf0]  ;;  %v10027_v28 = vld [vmem:[#allocation11 + $0x1ac] sm:$0xf0] }
 0x138   : > { %2796 = vmatpush.bf16.msrb.mxu2 %v7763_v30  ;;  %2762 = vmatmul.bf16.vlgmr.msra.gmra.mxu3 %v11288_v13  ;;  %v9926_v13 = vld [vmem:[#allocation8 + $0x68c] sm:$0xf]  ;;  %v7587_v6 = vor.u32 %v9894_v62, %v7584_v0  ;;  %v7555_v35 = vor.u32 %v9886_v26, %v7552_v27  ;;  %v7392_v55 = vld [vmem:[#allocation8 + $0x418] sm:$0xf0]  ;;  %v8102_v27 = vld [vmem:[#allocation11 + $0x1a0] sm:$0xf] }
 0x139   : > { %2810 = vmatpush.bf16.msrb.mxu3 %v7891_v33  ;;  %v7715_v8 = vor.u32 %v9926_v13, %v7712_v1  ;;  %v9950_v30 = vld [vmem:[#allocation8 + $0x74c] sm:$0xf]  ;;  %v7808_v33 = vld [vmem:[#allocation8 + $0x758] sm:$0xf0]  ;;  %v8262_v29 = vld [vmem:[#allocation11 + $0x2e0] sm:$0xf]  ;;  %v8103_v38 = vor.u32 %v10027_v28, %v8102_v27 }
 0x13a   : > { %2769 = vmatpush.bf16.msrb.mxu0 %v7491_v42  ;;  %v7811_v42 = vor.u32 %v9950_v30, %v7808_v33  ;;  %v9946_v50 = vld [vmem:[#allocation8 + $0x72c] sm:$0xf]  ;;  %v7648_v62 = vld [vmem:[#allocation8 + $0x618] sm:$0xf0]  ;;  %v11383_v0 = vpop.f32.mrf.mxu1  ;;  %v10067_v33 = vld [vmem:[#allocation11 + $0x2ec] sm:$0xf0] }
 0x13b   : > { %2783 = vmatpush.bf16.msrb.mxu1 %v7619_v44  ;;  %v9882_v44 = vld [vmem:[#allocation8 + $0x52c] sm:$0xf]  ;;  %v7795_v60 = vor.u32 %v9946_v50, %v7792_v43  ;;  %v7776_v1 = vld [vmem:[#allocation8 + $0x718] sm:$0xf0]  ;;  %v7958_v39 = vld [vmem:[#allocation11 + $0x80] sm:$0xf] }
 0x13c   : > { %2797 = vmatpush.bf16.msrb.mxu2 %v7747_v48  ;;  %v7539_v53 = vor.u32 %v9882_v44, %v7536_v45  ;;  %v9846_v54 = vld [vmem:[#allocation8 + $0x40c] sm:$0xf]  ;;  %v8070_v50 = vld [vmem:[#allocation11 + $0x160] sm:$0xf]  ;;  %v10019_v43 = vld [vmem:[#allocation11 + $0x16c] sm:$0xf0] }
 0x13d   : > { %2811 = vmatpush.bf16.msrb.mxu3 %v7875_v49  ;;  %v11379_v48 = vpop.f32.mrf.mxu3  ;;  %v7664_v49 = vld [vmem:[#allocation8 + $0x638] sm:$0xf0]  ;;  %v9942_v13 = vld [vmem:[#allocation8 + $0x70c] sm:$0xf]  ;;  %v7395_v7 = vor.u32 %v9846_v54, %v7392_v55  ;;  %v8071_v54 = vor.u32 %v10019_v43, %v8070_v50  ;;  %v7926_v55 = vld [vmem:[#allocation11 + $0x40] sm:$0xf] }
 0x13e   : > { %2770 = vmatpush.bf16.msrb.mxu0 %v7475_v56  ;;  %v9878_v56 = vld [vmem:[#allocation8 + $0x50c] sm:$0xf]  ;;  %v7667_v59 = vor.u32 %v9914_v46, %v7664_v49  ;;  %v9987_v49 = vld [vmem:[#allocation11 + $0x6c] sm:$0xf0]  ;;  %v8008_v27 = vld [vmem:[#allocation11 + $0xf0] sm:$0xf0] }
 0x13f   : > { %2784 = vmatpush.bf16.msrb.mxu1 %v7603_v58  ;;  %v11381_v58 = vpop.f32.mrf.mxu0  ;;  %v10033_v28 = vld [vmem:[#allocation11 + $0x1e4] sm:$0xf]  ;;  %v7992_v50 = vld [vmem:[#allocation11 + $0xd0] sm:$0xf0] }
 0x140   : > { %2798 = vmatpush.bf16.msrb.mxu2 %v7731_v61  ;;  %v7520_v61 = vld [vmem:[#allocation8 + $0x518] sm:$0xf0]  ;;  %v10029_v43 = vld [vmem:[#allocation11 + $0x1c4] sm:$0xf] }
 0x141   : > { %2812 = vmatpush.bf16.msrb.mxu3 %v7859_v63  ;;  %v9910_v63 = vld [vmem:[#allocation8 + $0x60c] sm:$0xf]  ;;  %v7523_v5 = vor.u32 %v9878_v56, %v7520_v61  ;;  %v9983_v56 = vld [vmem:[#allocation11 + $0x4c] sm:$0xf0] }
 0x142   : > { %2771 = vmatpush.bf16.msrb.mxu0 %v7459_v12  ;;  %v8134_v12 = vld [vmem:[#allocation11 + $0x1e0] sm:$0xf]  ;;  %v11393_v30 = vpop.f32.mrf.mxu1 }
 0x143   : > { %2785 = vmatpush.bf16.msrb.mxu1 %v7587_v6  ;;  %v10035_v6 = vld [vmem:[#allocation11 + $0x1ec] sm:$0xf0] }
 0x144   : > { %2799 = vmatpush.bf16.msrb.mxu2 %v7715_v8  ;;  %v7651_v8 = vor.u32 %v9910_v63, %v7648_v62  ;;  %v8135_v11 = vor.u32 %v10035_v6, %v8134_v12  ;;  %v8246_v63 = vld [vmem:[#allocation11 + $0x2c0] sm:$0xf]  ;;  %v10063_v62 = vld [vmem:[#allocation11 + $0x2cc] sm:$0xf0] }
 0x145   : > { %2813 = vmatpush.bf16.msrb.mxu3 %v7843_v9  ;;  %v7779_v9 = vor.u32 %v9942_v13, %v7776_v1  ;;  %v7927_v1 = vor.u32 %v9983_v56, %v7926_v55  ;;  %v9979_v12 = vld [vmem:[#allocation11 + $0x2c] sm:$0xf0]  ;;  %v8038_v6 = vld [vmem:[#allocation11 + $0x120] sm:$0xf] }
 0x146   : > { %2772 = vmatpush.bf16.msrb.mxu0 %v7443_v20  ;;  %v10031_v20 = vld [vmem:[#allocation11 + $0x1cc] sm:$0xf0]  ;;  %v7911_v16 = vor.u32 %v9979_v12, %v7910_v3  ;;  %v8182_v3 = vld [vmem:[#allocation11 + $0x240] sm:$0xf] }
 0x147   : > { %2786 = vmatpush.bf16.msrb.mxu1 %v7571_v21  ;;  %v11387_v21 = vpop.f32.mrf.mxu3  ;;  %v8119_v23 = vor.u32 %v10031_v20, %v8118_v17  ;;  %v11389_v26 = vpop.f32.mrf.mxu0  ;;  %v7894_v20 = vld [vmem:[#allocation11] sm:$0xf]  ;;  %v10047_v12 = vld [vmem:[#allocation11 + $0x24c] sm:$0xf0] }
 0x148   : > { %2800 = vmatpush.bf16.msrb.mxu2 %v7699_v24  ;;  %v7974_v24 = vld [vmem:[#allocation11 + $0xa0] sm:$0xf] }
 0x149   : > { %2814 = vmatpush.bf16.msrb.mxu3 %v7827_v25  ;;  %v9995_v25 = vld [vmem:[#allocation11 + $0xac] sm:$0xf0] }
 0x14a   : > { %2773 = vmatpush.bf16.msrb.mxu0 %v7427_v34  ;;  %v8263_v34 = vor.u32 %v10067_v33, %v8262_v29  ;;  %v8136_v29 = vld [vmem:[#allocation11 + $0x1f0] sm:$0xf0]  ;;  %v2400_v33 = vadd.f32 %v11363_v52, %v11361_v47 }
 0x14b   : > { %2787 = vmatpush.bf16.msrb.mxu1 %v7555_v35  ;;  %v7975_v35 = vor.u32 %v9995_v25, %v7974_v24  ;;  %v10007_v24 = vld [vmem:[#allocation11 + $0x10c] sm:$0xf0]  ;;  %v10001_v25 = vld [vmem:[#allocation11 + $0xe4] sm:$0xf] }
 0x14c   : > { %2801 = vmatpush.bf16.msrb.mxu2 %v7683_v41  ;;  %v9991_v41 = vld [vmem:[#allocation11 + $0x8c] sm:$0xf0]  ;;  %v2414_v47 = vadd.f32 %v11369_v4, %v2400_v33  ;;  %v8183_v4 = vor.u32 %v10047_v12, %v8182_v3  ;;  %v8072_v33 = vld [vmem:[#allocation11 + $0x170] sm:$0xf0]  ;;  %v10061_v12 = vld [vmem:[#allocation11 + $0x2c4] sm:$0xf] }
 0x14d   : > { %2815 = vmatpush.bf16.msrb.mxu3 %v7811_v42  ;;  %v10023_v42 = vld [vmem:[#allocation11 + $0x18c] sm:$0xf0]  ;;  %v8040_v3 = vld [vmem:[#allocation11 + $0x130] sm:$0xf0] }
 0x14e   : > { %2774 = vmatpush.bf16.msrb.mxu0 %v7411_v51  ;;  %v2511_v51 = vpop.f32.mrf.mxu1 }
 0x14f   : > { %2788 = vmatpush.bf16.msrb.mxu1 %v7539_v53  ;;  %v11399_v44 = vpop.f32.mrf.mxu3  ;;  %v2497_v46 = vpop.f32.mrf.mxu0 }
 0x150   : > { %2802 = vmatpush.bf16.msrb.mxu2 %v7667_v59  ;;  %v8054_v59 = vld [vmem:[#allocation11 + $0x140] sm:$0xf] }
 0x151   : > { %2816 = vmatpush.bf16.msrb.mxu3 %v7795_v60  ;;  %v10015_v60 = vld [vmem:[#allocation11 + $0x14c] sm:$0xf0] }
 0x152   : > { %2775 = vmatpush.bf16.msrb.mxu0 %v7395_v7  ;;  %v8055_v2 = vor.u32 %v10015_v60, %v8054_v59  ;;  %v8247_v7 = vor.u32 %v10063_v62, %v8246_v63  ;;  %v9993_v59 = vld [vmem:[#allocation11 + $0xa4] sm:$0xf]  ;;  %v7976_v60 = vld [vmem:[#allocation11 + $0xb0] sm:$0xf0] }
 0x153   : > { %2789 = vmatpush.bf16.msrb.mxu1 %v7523_v5  ;;  %v10011_v5 = vld [vmem:[#allocation11 + $0x12c] sm:$0xf0]  ;;  %v10025_v63 = vld [vmem:[#allocation11 + $0x1a4] sm:$0xf] }
 0x154   : > { %2803 = vmatpush.bf16.msrb.mxu2 %v7651_v8  ;;  %v8230_v8 = vld [vmem:[#allocation11 + $0x2a0] sm:$0xf]  ;;  %v8039_v17 = vor.u32 %v10011_v5, %v8038_v6 }
 0x155   : > { %2817 = vmatpush.bf16.msrb.mxu3 %v7779_v9  ;;  %2776 = vmatmul.bf16.vlgmr.msrb.gmra.mxu0 %v11293_v31  ;;  %v8086_v31 = vld [vmem:[#allocation11 + $0x180] sm:$0xf]  ;;  %v10059_v9 = vld [vmem:[#allocation11 + $0x2ac] sm:$0xf0] }
 0x156   : > { %3701 = vmatpush.bf16.msra.mxu0 %v8007_v10  ;;  %2790 = vmatmul.bf16.vlgmr.msrb.gmra.mxu1 %v11297_v36  ;;  %v11397_v36 = vpop.f32.mrf.mxu2  ;;  %v8087_v45 = vor.u32 %v10023_v42, %v8086_v31  ;;  %v8231_v10 = vor.u32 %v10059_v9, %v8230_v8  ;;  %v2513_v14 = vpop.f32.mrf.mxu1  ;;  %v8011_v42 = vor.u32 %v10001_v25, %v8008_v27  ;;  %v9989_v8 = vld [vmem:[#allocation11 + $0x84] sm:$0xf] }
 0x157   : > { %3715 = vmatpush.bf16.msra.mxu1 %v8135_v11  ;;  %2804 = vmatmul.bf16.vlgmr.msrb.gmra.mxu2 %v11295_v32  ;;  %v7959_v32 = vor.u32 %v9991_v41, %v7958_v39  ;;  %v11401_v13 = vpop.f32.mrf.mxu3  ;;  %v2499_v11 = vpop.f32.mrf.mxu0  ;;  %v8214_v39 = vld [vmem:[#allocation11 + $0x280] sm:$0xf]  ;;  %v10055_v41 = vld [vmem:[#allocation11 + $0x28c] sm:$0xf0]  ;;  %v2402_v9 = vadd.f32 %v11375_v19, %v11373_v18  ;;  %v9985_v27 = vld [vmem:[#allocation11 + $0x64] sm:$0xf] }
 0x158   : > { %2818 = vmatmul.bf16.vlgmr.msrb.gmra.mxu3 %v11299_v37  ;;  %3729 = vmatpush.bf16.msra.mxu2 %v8263_v34  ;;  %v7942_v37 = vld [vmem:[#allocation11 + $0x60] sm:$0xf]  ;;  %v2512_v34 = vadd.f32 %v2511_v51, %v2497_v46  ;;  %v10051_v51 = vld [vmem:[#allocation11 + $0x26c] sm:$0xf0] }
 0x159   : > { %v7943_v53 = vor.u32 %v9987_v49, %v7942_v37  ;;  %v8215_v37 = vor.u32 %v10055_v41, %v8214_v39  ;;  %v8198_v46 = vld [vmem:[#allocation11 + $0x260] sm:$0xf]  ;;  %v2416_v18 = vadd.f32 %v11377_v40, %v2402_v9  ;;  %v9981_v39 = vld [vmem:[#allocation11 + $0x44] sm:$0xf]  ;;  %v7928_v41 = vld [vmem:[#allocation11 + $0x50] sm:$0xf0] }
 0x15a   : > { %3702 = vmatpush.bf16.msra.mxu0 %v7991_v22  ;;  %v9975_v22 = vld [vmem:[#allocation11 + $0xc] sm:$0xf0]  ;;  %v8199_v62 = vor.u32 %v10051_v51, %v8198_v46 }
 0x15b   : > { %3716 = vmatpush.bf16.msra.mxu1 %v8119_v23  ;;  %v8022_v23 = vld [vmem:[#allocation11 + $0x100] sm:$0xf]  ;;  %v10039_v40 = vld [vmem:[#allocation11 + $0x20c] sm:$0xf0] }
 0x15c   : > { %3730 = vmatpush.bf16.msra.mxu2 %v8247_v7  ;;  %v7979_v7 = vor.u32 %v9993_v59, %v7976_v60 }
 0x15e   : > { %3703 = vmatpush.bf16.msra.mxu0 %v7975_v35  ;;  %v2525_v61 = vpop.f32.mrf.mxu2  ;;  %v7895_v35 = vor.u32 %v9975_v22, %v7894_v20  ;;  %v8088_v20 = vld [vmem:[#allocation11 + $0x190] sm:$0xf0] }
 0x15f   : > { %3717 = vmatpush.bf16.msra.mxu1 %v8103_v38  ;;  %v8023_v38 = vor.u32 %v10007_v24, %v8022_v23  ;;  %v11405_v49 = vpop.f32.mrf.mxu3  ;;  %v2526_v52 = vadd.f32 %v2525_v61, %v2512_v34  ;;  %v2428_v61 = vadd.f32 %v11371_v57, %v2414_v47 }
 0x160   : > { %3731 = vmatpush.bf16.msra.mxu2 %v8231_v10  ;;  %v2514_v10 = vadd.f32 %v2513_v14, %v2499_v11  ;;  %v7944_v11 = vld [vmem:[#allocation11 + $0x70] sm:$0xf0]  ;;  %v10017_v14 = vld [vmem:[#allocation11 + $0x164] sm:$0xf] }
 0x161   : > { %v2540_v6 = vadd.f32 %v11401_v13, %v2526_v52  ;;  %v2442_v23 = vadd.f32 %v11381_v58, %v2428_v61  ;;  %v10065_v52 = vld [vmem:[#allocation11 + $0x2e4] sm:$0xf] }
 0x162   : > { %3704 = vmatpush.bf16.msra.mxu0 %v7959_v32  ;;  %v8139_v32 = vor.u32 %v10033_v28, %v8136_v29  ;;  %v8166_v28 = vld [vmem:[#allocation11 + $0x220] sm:$0xf]  ;;  %v10043_v29 = vld [vmem:[#allocation11 + $0x22c] sm:$0xf0] }
 0x163   : > { %3718 = vmatpush.bf16.msra.mxu1 %v8087_v45  ;;  %v9997_v45 = vld [vmem:[#allocation11 + $0xc4] sm:$0xf]  ;;  %v8167_v34 = vor.u32 %v10043_v29, %v8166_v28  ;;  %v2456_v58 = vadd.f32 %v11383_v0, %v2442_v23  ;;  %v8264_v0 = vld [vmem:[#allocation11 + $0x2f0] sm:$0xf0] }
 0x164   : > { %3732 = vmatpush.bf16.msra.mxu2 %v8215_v37  ;;  %v7995_v55 = vor.u32 %v9997_v45, %v7992_v50  ;;  %v8075_v45 = vor.u32 %v10017_v14, %v8072_v33  ;;  %v10013_v37 = vld [vmem:[#allocation11 + $0x144] sm:$0xf]  ;;  %v8150_v50 = vld [vmem:[#allocation11 + $0x200] sm:$0xf]  ;;  %v8267_v46 = vor.u32 %v10065_v52, %v8264_v0  ;;  %v8184_v0 = vld [vmem:[#allocation11 + $0x250] sm:$0xf0] }
 0x165   : > { %v8151_v47 = vor.u32 %v10039_v40, %v8150_v50  ;;  %v2470_v51 = vadd.f32 %v11385_v15, %v2456_v58  ;;  %v8248_v15 = vld [vmem:[#allocation11 + $0x2d0] sm:$0xf0]  ;;  %v10005_v23 = vld [vmem:[#allocation11 + $0x104] sm:$0xf] }
 0x166   : > { %3705 = vmatpush.bf16.msra.mxu0 %v7943_v53  ;;  %v2527_v31 = vpop.f32.mrf.mxu2  ;;  %v8120_v53 = vld [vmem:[#allocation11 + $0x1d0] sm:$0xf0]  ;;  %v8251_v61 = vor.u32 %v10061_v12, %v8248_v15  ;;  %v10045_v52 = vld [vmem:[#allocation11 + $0x244] sm:$0xf] }
 0x167   : > { %3719 = vmatpush.bf16.msra.mxu1 %v8071_v54  ;;  %v2553_v54 = vpop.f32.mrf.mxu0  ;;  %v8123_v56 = vor.u32 %v10029_v43, %v8120_v53  ;;  %v11413_v24 = vpop.f32.mrf.mxu3  ;;  %v2528_v19 = vadd.f32 %v2527_v31, %v2514_v10  ;;  %v2430_v31 = vadd.f32 %v11379_v48, %v2416_v18  ;;  %v8056_v53 = vld [vmem:[#allocation11 + $0x150] sm:$0xf0]  ;;  %v7931_v48 = vor.u32 %v9981_v39, %v7928_v41  ;;  %v10041_v12 = vld [vmem:[#allocation11 + $0x224] sm:$0xf] }
 0x168   : > { %3733 = vmatpush.bf16.msra.mxu2 %v8199_v62  ;;  %v2554_v57 = vadd.f32 %v2553_v54, %v2540_v6  ;;  %v7912_v62 = vld [vmem:[#allocation11 + $0x30] sm:$0xf0]  ;;  %v2484_v6 = vadd.f32 %v11387_v21, %v2470_v51  ;;  %v10004_v51 = vld [vmem:[#allocation11 + $0xf4] sm:$0xf0] }
 0x169   : > { %v2542_v43 = vadd.f32 %v11405_v49, %v2528_v19  ;;  %v2444_v54 = vadd.f32 %v11389_v26, %v2430_v31  ;;  %v9977_v49 = vld [vmem:[#allocation11 + $0x24] sm:$0xf]  ;;  %v8216_v58 = vld [vmem:[#allocation11 + $0x290] sm:$0xf0] }
 0x16a   : > { %3706 = vmatpush.bf16.msra.mxu0 %v7927_v1  ;;  %v2567_v1 = vpop.f32.mrf.mxu1  ;;  %v10049_v31 = vld [vmem:[#allocation11 + $0x264] sm:$0xf]  ;;  %v8168_v15 = vld [vmem:[#allocation11 + $0x230] sm:$0xf0] }
 0x16b   : > { %3720 = vmatpush.bf16.msra.mxu1 %v8055_v2  ;;  %v8104_v2 = vld [vmem:[#allocation11 + $0x1b0] sm:$0xf0] }
 0x16c   : > { %v8107_v5 = vor.u32 %v10025_v63, %v8104_v2  ;;  %3734 = vmatpush.bf16.msra.mxu2 %v8183_v4  ;;  %v8059_v63 = vor.u32 %v10013_v37, %v8056_v53 }
 0x16e   : > { %3707 = vmatpush.bf16.msra.mxu0 %v7911_v16  ;;  %v7960_v16 = vld [vmem:[#allocation11 + $0x90] sm:$0xf0]  ;;  %v2581_v22 = vpop.f32.mrf.mxu2 }
 0x16f   : > { %3721 = vmatpush.bf16.msra.mxu1 %v8039_v17  ;;  %v10021_v17 = vld [vmem:[#allocation11 + $0x184] sm:$0xf]  ;;  %v7963_v13 = vor.u32 %v9989_v8, %v7960_v16  ;;  %v2597_v2 = vpop.f32.mrf.mxu3  ;;  %v7915_v16 = vor.u32 %v9977_v49, %v7912_v62 }
 0x170   : > { %v8091_v25 = vor.u32 %v10021_v17, %v8088_v20  ;;  %3735 = vmatpush.bf16.msra.mxu2 %v8167_v34  ;;  %v9973_v20 = vld [vmem:[#allocation11 + $0x4] sm:$0xf] }
 0x172   : > { %3708 = vmatpush.bf16.msra.mxu0 %v7895_v35  ;;  %v2555_v35 = vpop.f32.mrf.mxu0 }
 0x173   : > { %3722 = vmatpush.bf16.msra.mxu1 %v8023_v38  ;;  %v2569_v38 = vpop.f32.mrf.mxu1 }
 0x174   : > { %3736 = vmatpush.bf16.msra.mxu2 %v8151_v47 }
 0x176   : > { %3757 = vmatpush.bf16.msrb.mxu0 %v8011_v42  ;;  %v2568_v42 = vadd.f32 %v2567_v1, %v2554_v57  ;;  %v2583_v60 = vpop.f32.mrf.mxu2  ;;  %v10009_v1 = vld [vmem:[#allocation11 + $0x124] sm:$0xf] }
 0x177   : > { %3771 = vmatpush.bf16.msrb.mxu1 %v8139_v32  ;;  %v7947_v32 = vor.u32 %v9985_v27, %v7944_v11  ;;  %v8043_v17 = vor.u32 %v10009_v1, %v8040_v3  ;;  %v8232_v27 = vld [vmem:[#allocation11 + $0x2b0] sm:$0xf0] }
 0x178   : > { %v2582_v59 = vadd.f32 %v2581_v22, %v2568_v42  ;;  %3785 = vmatpush.bf16.msrb.mxu2 %v8267_v46  ;;  %v7896_v22 = vld [vmem:[#allocation11 + $0x10] sm:$0xf0]  ;;  %v8014_v46 = vld [vmem:[#allocation11 + $0xe8] sm:$0xf] }
 0x179   : > { %v11423_v4 = vpop.permute.xlu1 %2877  ;;  %v7899_v19 = vor.u32 %v9973_v20, %v7896_v22  ;;  %v8015_v3 = vor.u32 %v10004_v51, %v8014_v46  ;;  %v10032_v20 = vld [vmem:[#allocation11 + $0x1d4] sm:$0xf0]  ;;  %v8358_v51 = vld [vmem:[#allocation11 + $0x3a0] sm:$0xf] }
 0x17a   : > { %3758 = vmatpush.bf16.msrb.mxu0 %v7995_v55  ;;  %v2556_v55 = vadd.f32 %v2555_v35, %v2542_v43  ;;  %v2609_v26 = vpop.f32.mrf.mxu0  ;;  %v2596_v10 = vadd.f32 %v11413_v24, %v2582_v59  ;;  %v2885_v21 = vmul.f32 %v11423_v4, %v2484_v6  ;;  %v10053_v35 = vld [vmem:[#allocation11 + $0x284] sm:$0xf]  ;;  %v8200_v43 = vld [vmem:[#allocation11 + $0x270] sm:$0xf0]  ;;  %v9988_v46 = vld [vmem:[#allocation11 + $0x74] sm:$0xf0] }
 0x17b   : > { %3772 = vmatpush.bf16.msrb.mxu1 %v8123_v56  ;;  %v11421_v56 = vld [vmem:[#allocation10] sm:$0xf]  ;;  %v2623_v9 = vpop.f32.mrf.mxu1  ;;  %v2651_v34 = vpop.f32.mrf.mxu3  ;;  %v8219_v41 = vor.u32 %v10053_v35, %v8216_v58  ;;  %v8203_v53 = vor.u32 %v10049_v31, %v8200_v43 }
 0x17c   : > { %v2895_v8 = vperm.slane %v11421_v56, 0  ;;  %3786 = vmatpush.bf16.msrb.mxu2 %v8251_v61  ;;  %v2886_v28 = vmul.f32 %v11423_v4, %v2596_v10  ;;  %v2896_v24 = vperm.slane %v11421_v56, 1 }
 0x17e   : > { %3759 = vmatpush.bf16.msrb.mxu0 %v7979_v7  ;;  %v2458_v7 = vadd.f32 %v11393_v30, %v2444_v54  ;;  %v10057_v30 = vld [vmem:[#allocation11 + $0x2a4] sm:$0xf]  ;;  %v2637_v18 = vpop.f32.mrf.mxu2  ;;  %v2903_v33 = vadd.f32 %v2895_v8, %v2885_v21  ;;  %v7982_v21 = vld [vmem:[#allocation11 + $0xa8] sm:$0xf] }
 0x17f   : > { %3773 = vmatpush.bf16.msrb.mxu1 %v8107_v5  ;;  %v2570_v5 = vadd.f32 %v2569_v38, %v2556_v55  ;;  %v8235_v29 = vor.u32 %v10057_v30, %v8232_v27  ;;  %v2904_v38 = vadd.f32 %v2896_v24, %v2886_v28  ;;  %v8187_v55 = vor.u32 %v10045_v52, %v8184_v0  ;;  %v8152_v30 = vld [vmem:[#allocation11 + $0x210] sm:$0xf0]  ;;  %v9996_v28 = vld [vmem:[#allocation11 + $0xb4] sm:$0xf0]  ;;  %v7950_v52 = vld [vmem:[#allocation11 + $0x68] sm:$0xf] }
 0x180   : > { %v2472_v57 = vadd.f32 %v11397_v36, %v2458_v7  ;;  %10584 = vtanh.f32 %v2903_v33 }
 0x181   : > { %3787 = vmatpush.bf16.msrb.mxu2 %v8235_v29  ;;  %v11434_v39 = vpop.permute.xlu1 %2882  ;;  %10586 = vtanh.f32 %v2904_v38  ;;  %v8390_v29 = vld [vmem:[#allocation11 + $0x3e0] sm:$0xf]  ;;  %v7966_v38 = vld [vmem:[#allocation11 + $0x88] sm:$0xf] }
 0x182   : > { %3760 = vmatpush.bf16.msrb.mxu0 %v7963_v13  ;;  %v2584_v13 = vadd.f32 %v2583_v60, %v2570_v5  ;;  %v2486_v14 = vadd.f32 %v11399_v44, %v2472_v57  ;;  %v2611_v37 = vpop.f32.mrf.mxu0  ;;  %v7998_v5 = vld [vmem:[#allocation11 + $0xc8] sm:$0xf] }
 0x183   : > { %3774 = vmatpush.bf16.msrb.mxu1 %v8091_v25  ;;  %v8024_v25 = vld [vmem:[#allocation11 + $0x110] sm:$0xf0]  ;;  %v2625_v40 = vpop.f32.mrf.mxu1  ;;  %v2653_v49 = vpop.f32.mrf.mxu3 }
 0x184   : > { %v8027_v11 = vor.u32 %v10005_v23, %v8024_v25  ;;  %v2598_v36 = vadd.f32 %v2597_v2, %v2584_v13  ;;  %v2889_v42 = vmul.f32 %v11434_v39, %v2486_v14  ;;  %v2626_v2 = vadd.f32 %v2625_v40, %v2611_v37  ;;  %v10037_v25 = vld [vmem:[#allocation11 + $0x204] sm:$0xf]  ;;  %v10095_v37 = vld [vmem:[#allocation11 + $0x3cc] sm:$0xf0]  ;;  %v10024_v40 = vld [vmem:[#allocation11 + $0x194] sm:$0xf0] }
 0x185   : > { %3788 = vmatpush.bf16.msrb.mxu2 %v8219_v41 }
 0x186   : > { %3761 = vmatpush.bf16.msrb.mxu0 %v7947_v32  ;;  %v2890_v32 = vmul.f32 %v11434_v39, %v2598_v36  ;;  %v2907_v44 = vadd.f32 %v2895_v8, %v2889_v42  ;;  %v2639_v54 = vpop.f32.mrf.mxu2  ;;  %v10585_v59 = vpop.eup %10584  ;;  %v10000_v8 = vld [vmem:[#allocation11 + $0xd4] sm:$0xf0] }
 0x187   : > { %3775 = vmatpush.bf16.msrb.mxu1 %v8075_v45  ;;  %v2624_v45 = vadd.f32 %v2623_v9, %v2609_v26  ;;  %v10587_v62 = vpop.eup %10586  ;;  %v8171_v9 = vor.u32 %v10041_v12, %v8168_v15  ;;  %v2640_v23 = vadd.f32 %v2639_v54, %v2626_v2  ;;  %v7999_v57 = vor.u32 %v10000_v8, %v7998_v5  ;;  %v10091_v54 = vld [vmem:[#allocation11 + $0x3ac] sm:$0xf0]  ;;  %v7934_v12 = vld [vmem:[#allocation11 + $0x48] sm:$0xf] }
 0x188   : > { %v2908_v50 = vadd.f32 %v2896_v24, %v2890_v32  ;;  %10588 = vtanh.f32 %v2907_v44  ;;  %v8155_v24 = vor.u32 %v10037_v25, %v8152_v30  ;;  %v9992_v32 = vld [vmem:[#allocation11 + $0x94] sm:$0xf0]  ;;  %v8062_v8 = vld [vmem:[#allocation11 + $0x148] sm:$0xf]  ;;  %v10083_v25 = vld [vmem:[#allocation11 + $0x36c] sm:$0xf0] }
 0x189   : > { %v2638_v47 = vadd.f32 %v2637_v18, %v2624_v45  ;;  %3789 = vmatpush.bf16.msrb.mxu2 %v8203_v53  ;;  %v10099_v18 = vld [vmem:[#allocation11 + $0x3ec] sm:$0xf0]  ;;  %v2654_v33 = vadd.f32 %v2653_v49, %v2640_v23  ;;  %v8374_v45 = vld [vmem:[#allocation11 + $0x3c0] sm:$0xf]  ;;  %v2897_v49 = vperm.slane %v11421_v56, 2 }
 0x18a   : > { %3762 = vmatpush.bf16.msrb.mxu0 %v7931_v48  ;;  %10590 = vtanh.f32 %v2908_v50  ;;  %v8142_v48 = vld [vmem:[#allocation11 + $0x1e8] sm:$0xf]  ;;  %v8391_v14 = vor.u32 %v10099_v18, %v8390_v29  ;;  %v8375_v31 = vor.u32 %v10095_v37, %v8374_v45  ;;  %v10068_v37 = vld [vmem:[#allocation11 + $0x2f4] sm:$0xf0] }
 0x18b   : > { %3776 = vmatpush.bf16.msrb.mxu1 %v8059_v63  ;;  %v2652_v60 = vadd.f32 %v2651_v34, %v2638_v47  ;;  %v10036_v63 = vld [vmem:[#allocation11 + $0x1f4] sm:$0xf0]  ;;  %v7983_v34 = vor.u32 %v9996_v28, %v7982_v21  ;;  %v8094_v50 = vld [vmem:[#allocation11 + $0x188] sm:$0xf]  ;;  %v7967_v47 = vor.u32 %v9992_v32, %v7966_v38  ;;  %v8326_v21 = vld [vmem:[#allocation11 + $0x360] sm:$0xf] }
 0x18c   : > { %v8143_v6 = vor.u32 %v10036_v63, %v8142_v48  ;;  %3743 = vmatpush.bf16.msra.mxu3 %v8391_v14  ;;  %v8095_v0 = vor.u32 %v10024_v40, %v8094_v50  ;;  %v8359_v48 = vor.u32 %v10091_v54, %v8358_v51  ;;  %v7918_v23 = vld [vmem:[#allocation11 + $0x28] sm:$0xf]  ;;  %v10012_v28 = vld [vmem:[#allocation11 + $0x134] sm:$0xf0]  ;;  %v8128_v51 = vld [vmem:[#allocation11 + $0x1d8] sm:$0xf0] }
 0x18d   : > { %3790 = vmatpush.bf16.msrb.mxu2 %v8187_v55  ;;  %v7902_v18 = vld [vmem:[#allocation11 + $0x8] sm:$0xf] }
 0x18e   : > { %3763 = vmatpush.bf16.msrb.mxu0 %v7915_v16  ;;  %v10589_v1 = vpop.eup %10588  ;;  %v8030_v14 = vld [vmem:[#allocation11 + $0x108] sm:$0xf] }
 0x18f   : > { %3777 = vmatpush.bf16.msrb.mxu1 %v8043_v17  ;;  %v11438_v61 = vpack.c.bf16 %v10589_v1, %v10585_v59  ;;  %v8126_v17 = vld [vmem:[#allocation11 + $0x1c8] sm:$0xf]  ;;  %v7951_v1 = vor.u32 %v9988_v46, %v7950_v52  ;;  %v9998_v52 = vld [vmem:[#allocation11 + $0xcc] sm:$0xf] }
 0x190   : > { %v10591_v26 = vpop.eup %10590  ;;  %v8127_v27 = vor.u32 %v10032_v20, %v8126_v17  ;;  %3744 = vmatpush.bf16.msra.mxu3 %v8375_v31  ;;  %v8078_v59 = vld [vmem:[#allocation11 + $0x168] sm:$0xf]  ;;  %v8294_v31 = vld [vmem:[#allocation11 + $0x320] sm:$0xf]  ;;  %v10030_v46 = vld [vmem:[#allocation11 + $0x1cc] sm:$0xf] }
 0x191   : > { %v11440_v10 = vpack.c.bf16 %v10591_v26, %v10587_v62  ;;  %3709 = vmatmul.bf16.vlgmr.msra.gmra.mxu0 %v11438_v61  ;;  %3791 = vmatpush.bf16.msrb.mxu2 %v8171_v9  ;;  %v9984_v26 = vld [vmem:[#allocation11 + $0x54] sm:$0xf0]  ;;  %v8270_v45 = vld [vmem:[#allocation11 + $0x2e8] sm:$0xf] }
 0x192   : > { %3764 = vmatpush.bf16.msrb.mxu0 %v7899_v19  ;;  %v2665_v7 = vpop.f32.mrf.mxu0  ;;  %v8110_v19 = vld [vmem:[#allocation11 + $0x1a8] sm:$0xf]  ;;  %v10016_v9 = vld [vmem:[#allocation11 + $0x154] sm:$0xf0] }
 0x193   : > { %3778 = vmatpush.bf16.msrb.mxu1 %v8027_v11  ;;  %v2666_v16 = vadd.f32 %v2665_v7, %v2652_v60  ;;  %v2679_v22 = vpop.f32.mrf.mxu1  ;;  %v10028_v11 = vld [vmem:[#allocation11 + $0x1b4] sm:$0xf0]  ;;  %v10087_v7 = vld [vmem:[#allocation11 + $0x38c] sm:$0xf0] }
 0x194   : > { %3723 = vmatmul.bf16.vlgmr.msra.gmra.mxu1 %v11440_v10  ;;  %v8111_v41 = vor.u32 %v10028_v11, %v8110_v19  ;;  %v10020_v60 = vld [vmem:[#allocation11 + $0x174] sm:$0xf0]  ;;  %3745 = vmatpush.bf16.msra.mxu3 %v8359_v48 }
 0x195   : > { %v2680_v13 = vadd.f32 %v2679_v22, %v2666_v16  ;;  %3792 = vmatpush.bf16.msrb.mxu2 %v8155_v24  ;;  %v8079_v15 = vor.u32 %v10020_v60, %v8078_v59  ;;  %v7935_v22 = vor.u32 %v9984_v26, %v7934_v12  ;;  %v8327_v24 = vor.u32 %v10083_v25, %v8326_v21  ;;  %v9976_v19 = vld [vmem:[#allocation11 + $0x14] sm:$0xf0]  ;;  %v8254_v59 = vld [vmem:[#allocation11 + $0x2c8] sm:$0xf]  ;;  %v10097_v12 = vld [vmem:[#allocation11 + $0x3e4] sm:$0xf] }
 0x196   : > { %3813 = vmatpush.bf16.msra.mxu0 %v8015_v3  ;;  %v7903_v32 = vor.u32 %v9976_v19, %v7902_v18  ;;  %v10064_v60 = vld [vmem:[#allocation11 + $0x2d4] sm:$0xf0]  ;;  %v10026_v26 = vld [vmem:[#allocation11 + $0x1ac] sm:$0xf]  ;;  %v8096_v25 = vld [vmem:[#allocation11 + $0x198] sm:$0xf0] }
 0x197   : > { %3827 = vmatpush.bf16.msra.mxu1 %v8143_v6  ;;  %v8342_v6 = vld [vmem:[#allocation11 + $0x380] sm:$0xf]  ;;  %v10022_v21 = vld [vmem:[#allocation11 + $0x18c] sm:$0xf] }
 0x198   : > { %v8343_v16 = vor.u32 %v10087_v7, %v8342_v6  ;;  %v8112_v6 = vld [vmem:[#allocation11 + $0x1b8] sm:$0xf0]  ;;  %v8255_v7 = vor.u32 %v10064_v60, %v8254_v59  ;;  %v9978_v59 = vld [vmem:[#allocation11 + $0x2c] sm:$0xf] }
 0x19a   : > { %v2693_v36 = vpop.f32.mrf.mxu2  ;;  %3814 = vmatpush.bf16.msra.mxu0 %v7999_v57  ;;  %v2667_v42 = vpop.f32.mrf.mxu0  ;;  %v8063_v57 = vor.u32 %v10016_v9, %v8062_v8  ;;  %3746 = vmatpush.bf16.msra.mxu3 %v8343_v16  ;;  %v10060_v8 = vld [vmem:[#allocation11 + $0x2b4] sm:$0xf0] }
 0x19b   : > { %v2694_v35 = vadd.f32 %v2693_v36, %v2680_v13  ;;  %v2707_v58 = vpop.f32.mrf.mxu3  ;;  %3828 = vmatpush.bf16.msra.mxu1 %v8127_v27  ;;  %v2668_v44 = vadd.f32 %v2667_v42, %v2654_v33  ;;  %v2681_v53 = vpop.f32.mrf.mxu1  ;;  %v9980_v13 = vld [vmem:[#allocation11 + $0x34] sm:$0xf0]  ;;  %v8046_v27 = vld [vmem:[#allocation11 + $0x128] sm:$0xf]  ;;  %v8310_v36 = vld [vmem:[#allocation11 + $0x340] sm:$0xf] }
 0x19c   : > { %v7919_v29 = vor.u32 %v9980_v13, %v7918_v23  ;;  %v8047_v11 = vor.u32 %v10012_v28, %v8046_v27  ;;  %v10079_v33 = vld [vmem:[#allocation11 + $0x34c] sm:$0xf0]  ;;  %v8144_v42 = vld [vmem:[#allocation11 + $0x1f8] sm:$0xf0]  ;;  %v8376_v13 = vld [vmem:[#allocation11 + $0x3d0] sm:$0xf0] }
 0x19d   : > { %v2708_v43 = vadd.f32 %v2707_v58, %v2694_v35  ;;  %v2682_v55 = vadd.f32 %v2681_v53, %v2668_v44  ;;  %v10002_v35 = vld [vmem:[#allocation11 + $0xec] sm:$0xf]  ;;  %v8016_v58 = vld [vmem:[#allocation11 + $0xf8] sm:$0xf0]  ;;  %v8311_v38 = vor.u32 %v10079_v33, %v8310_v36  ;;  %v8222_v27 = vld [vmem:[#allocation11 + $0x288] sm:$0xf] }
 0x19e   : > { %3815 = vmatpush.bf16.msra.mxu0 %v7983_v34  ;;  %3747 = vmatpush.bf16.msra.mxu3 %v8327_v24  ;;  %v10008_v34 = vld [vmem:[#allocation11 + $0x114] sm:$0xf0]  ;;  %v8019_v40 = vor.u32 %v10002_v35, %v8016_v58  ;;  %v7968_v23 = vld [vmem:[#allocation11 + $0x98] sm:$0xf0]  ;;  %v10089_v36 = vld [vmem:[#allocation11 + $0x3a4] sm:$0xf] }
 0x19f   : > { %3829 = vmatpush.bf16.msra.mxu1 %v8111_v41  ;;  %v2887_v63 = vmul.f32 %v11423_v4, %v2708_v43  ;;  %v10034_v41 = vld [vmem:[#allocation11 + $0x1ec] sm:$0xf]  ;;  %v8031_v50 = vor.u32 %v10008_v34, %v8030_v14  ;;  %v10075_v43 = vld [vmem:[#allocation11 + $0x32c] sm:$0xf0]  ;;  %v10056_v28 = vld [vmem:[#allocation11 + $0x294] sm:$0xf0] }
 0x1a0   : > { %v8295_v48 = vor.u32 %v10075_v43, %v8294_v31  ;;  %v7952_v14 = vld [vmem:[#allocation11 + $0x78] sm:$0xf0]  ;;  %v8360_v33 = vld [vmem:[#allocation11 + $0x3b0] sm:$0xf0]  ;;  %v10018_v34 = vld [vmem:[#allocation11 + $0x16c] sm:$0xf]  ;;  %v8223_v58 = vor.u32 %v10056_v28, %v8222_v27 }
 0x1a1   : > { %v2905_v17 = vadd.f32 %v2897_v49, %v2887_v63  ;;  %3765 = vmatmul.bf16.vlgmr.msrb.gmra.mxu0 %v11438_v61  ;;  %v8080_v35 = vld [vmem:[#allocation11 + $0x178] sm:$0xf0]  ;;  %v8344_v31 = vld [vmem:[#allocation11 + $0x390] sm:$0xf0]  ;;  %v10014_v43 = vld [vmem:[#allocation11 + $0x14c] sm:$0xf] }
 0x1a2   : > { %v2695_v62 = vpop.f32.mrf.mxu2  ;;  %3816 = vmatpush.bf16.msra.mxu0 %v7967_v47  ;;  %3748 = vmatpush.bf16.msra.mxu3 %v8311_v38  ;;  %v8147_v47 = vor.u32 %v10034_v41, %v8144_v42  ;;  %v8206_v38 = vld [vmem:[#allocation11 + $0x268] sm:$0xf]  ;;  %v10052_v41 = vld [vmem:[#allocation11 + $0x274] sm:$0xf0]  ;;  %v10066_v28 = vld [vmem:[#allocation11 + $0x2ec] sm:$0xf] }
 0x1a3   : > { %v2696_v2 = vadd.f32 %v2695_v62, %v2682_v55  ;;  %v2709_v3 = vpop.f32.mrf.mxu3  ;;  %3830 = vmatpush.bf16.msra.mxu1 %v8095_v0  ;;  %10592 = vtanh.f32 %v2905_v17  ;;  %v8000_v0 = vld [vmem:[#allocation11 + $0xd8] sm:$0xf0]  ;;  %v8271_v55 = vor.u32 %v10068_v37, %v8270_v45  ;;  %v8278_v62 = vld [vmem:[#allocation11 + $0x300] sm:$0xf]  ;;  %v9990_v17 = vld [vmem:[#allocation11 + $0x8c] sm:$0xf]  ;;  %v8363_v37 = vor.u32 %v10089_v36, %v8360_v33 }
 0x1a4   : > { %3779 = vmatmul.bf16.vlgmr.msrb.gmra.mxu1 %v11440_v10  ;;  %v8003_v63 = vor.u32 %v9998_v52, %v8000_v0  ;;  %v7971_v24 = vor.u32 %v9990_v17, %v7968_v23  ;;  %v9982_v45 = vld [vmem:[#allocation11 + $0x4c] sm:$0xf]  ;;  %v8190_v52 = vld [vmem:[#allocation11 + $0x248] sm:$0xf]  ;;  %v10048_v0 = vld [vmem:[#allocation11 + $0x254] sm:$0xf0] }
 0x1a5   : > { %v2710_v5 = vadd.f32 %v2709_v3, %v2696_v2  ;;  %v8131_v2 = vor.u32 %v10030_v46, %v8128_v51  ;;  %v7984_v3 = vld [vmem:[#allocation11 + $0xb8] sm:$0xf0]  ;;  %v10077_v17 = vld [vmem:[#allocation11 + $0x344] sm:$0xf]  ;;  %v10006_v23 = vld [vmem:[#allocation11 + $0x10c] sm:$0xf] }
 0x1a6   : > { %3817 = vmatpush.bf16.msra.mxu0 %v7951_v1  ;;  %v10071_v1 = vld [vmem:[#allocation11 + $0x30c] sm:$0xf0]  ;;  %3749 = vmatpush.bf16.msra.mxu3 %v8295_v48 }
 0x1a7   : > { %v2891_v20 = vmul.f32 %v11434_v39, %v2710_v5  ;;  %3831 = vmatpush.bf16.msra.mxu1 %v8079_v15  ;;  %v8392_v15 = vld [vmem:[#allocation11 + $0x3f0] sm:$0xf0]  ;;  %v8238_v5 = vld [vmem:[#allocation11 + $0x2a8] sm:$0xf]  ;;  %v8279_v9 = vor.u32 %v10071_v1, %v8278_v62  ;;  %v10010_v1 = vld [vmem:[#allocation11 + $0x12c] sm:$0xf] }
 0x1a8   : > { %v8328_v62 = vld [vmem:[#allocation11 + $0x370] sm:$0xf0] }
 0x1a9   : > { %v2909_v30 = vadd.f32 %v2897_v49, %v2891_v20  ;;  %v10593_v44 = vpop.eup %10592  ;;  %v9994_v49 = vld [vmem:[#allocation11 + $0xac] sm:$0xf]  ;;  %v8395_v20 = vor.u32 %v10097_v12, %v8392_v15 }
 0x1aa   : > { %3818 = vmatpush.bf16.msra.mxu0 %v7935_v22  ;;  %v7987_v16 = vor.u32 %v9994_v49, %v7984_v3  ;;  %v8115_v22 = vor.u32 %v10026_v26, %v8112_v6  ;;  %3750 = vmatpush.bf16.msra.mxu3 %v8279_v9  ;;  %v10081_v49 = vld [vmem:[#allocation11 + $0x364] sm:$0xf]  ;;  %v8191_v3 = vor.u32 %v10048_v0, %v8190_v52  ;;  %v8174_v26 = vld [vmem:[#allocation11 + $0x228] sm:$0xf]  ;;  %v10044_v6 = vld [vmem:[#allocation11 + $0x234] sm:$0xf0] }
 0x1ab   : > { %10594 = vtanh.f32 %v2909_v30  ;;  %3832 = vmatpush.bf16.msra.mxu1 %v8063_v57  ;;  %v10093_v57 = vld [vmem:[#allocation11 + $0x3c4] sm:$0xf]  ;;  %v8239_v30 = vor.u32 %v10060_v8, %v8238_v5  ;;  %v9974_v5 = vld [vmem:[#allocation11 + $0xc] sm:$0xf]  ;;  %v8331_v8 = vor.u32 %v10081_v49, %v8328_v62 }
 0x1ac   : > { %v8379_v18 = vor.u32 %v10093_v57, %v8376_v13  ;;  %v8032_v57 = vld [vmem:[#allocation11 + $0x118] sm:$0xf0]  ;;  %v8175_v13 = vor.u32 %v10044_v6, %v8174_v26 }
 0x1ae   : > { %3819 = vmatpush.bf16.msra.mxu0 %v7919_v29  ;;  %v9986_v29 = vld [vmem:[#allocation11 + $0x6c] sm:$0xf]  ;;  %3799 = vmatpush.bf16.msrb.mxu3 %v8395_v20  ;;  %v8312_v20 = vld [vmem:[#allocation11 + $0x350] sm:$0xf0] }
 0x1af   : > { %3833 = vmatpush.bf16.msra.mxu1 %v8047_v11  ;;  %v8099_v11 = vor.u32 %v10022_v21, %v8096_v25  ;;  %v8158_v25 = vld [vmem:[#allocation11 + $0x208] sm:$0xf] }
 0x1b1   : > { %v10595_v53 = vpop.eup %10594 }
 0x1b2   : > { %v11449_v54 = vpack.c.bf16 %v10595_v53, %v10593_v44  ;;  %3820 = vmatpush.bf16.msra.mxu0 %v7903_v32  ;;  %v2721_v19 = vpop.f32.mrf.mxu0  ;;  %v7955_v32 = vor.u32 %v9986_v29, %v7952_v14  ;;  %3800 = vmatpush.bf16.msrb.mxu3 %v8379_v18  ;;  %v8083_v44 = vor.u32 %v10018_v34, %v8080_v35  ;;  %v8064_v53 = vld [vmem:[#allocation11 + $0x158] sm:$0xf0] }
 0x1b3   : > { %3834 = vmatpush.bf16.msra.mxu1 %v8031_v50  ;;  %v2735_v42 = vpop.f32.mrf.mxu1  ;;  %v7936_v50 = vld [vmem:[#allocation11 + $0x58] sm:$0xf0]  ;;  %v8067_v48 = vor.u32 %v10014_v43, %v8064_v53  ;;  %v8315_v29 = vor.u32 %v10077_v17, %v8312_v20  ;;  %v8035_v18 = vor.u32 %v10006_v23, %v8032_v57  ;;  %v10058_v43 = vld [vmem:[#allocation11 + $0x2ac] sm:$0xf] }
 0x1b4   : > { %3737 = vmatmul.bf16.vlgmr.msra.gmra.mxu2 %v11449_v54  ;;  %v2736_v12 = vadd.f32 %v2735_v42, %v2721_v19  ;;  %v10073_v19 = vld [vmem:[#allocation11 + $0x324] sm:$0xf]  ;;  %v8256_v42 = vld [vmem:[#allocation11 + $0x2d8] sm:$0xf0]  ;;  %v10042_v23 = vld [vmem:[#allocation11 + $0x22c] sm:$0xf] }
 0x1b5   : > { %3821 = vmatmul.bf16.vlgmr.msra.gmra.mxu0 %v11438_v61  ;;  %3841 = vmatpush.bf16.msra.mxu2 %v8271_v55  ;;  %v7939_v55 = vor.u32 %v9982_v45, %v7936_v50  ;;  %v8240_v53 = vld [vmem:[#allocation11 + $0x2b8] sm:$0xf0] }
 0x1b6   : > { %3869 = vmatpush.bf16.msrb.mxu0 %v8019_v40  ;;  %3835 = vmatmul.bf16.vlgmr.msra.gmra.mxu1 %v11440_v10  ;;  %v10085_v40 = vld [vmem:[#allocation11 + $0x384] sm:$0xf]  ;;  %v8176_v57 = vld [vmem:[#allocation11 + $0x238] sm:$0xf0] }
 0x1b7   : > { %3883 = vmatpush.bf16.msrb.mxu1 %v8147_v47  ;;  %v8207_v47 = vor.u32 %v10052_v41, %v8206_v38  ;;  %3801 = vmatpush.bf16.msrb.mxu3 %v8363_v37  ;;  %v8347_v60 = vor.u32 %v10085_v40, %v8344_v31  ;;  %v10062_v41 = vld [vmem:[#allocation11 + $0x2cc] sm:$0xf]  ;;  %v10069_v37 = vld [vmem:[#allocation11 + $0x304] sm:$0xf] }
 0x1b8   : > { %v8259_v31 = vor.u32 %v10062_v41, %v8256_v42  ;;  %v10084_v41 = vld [vmem:[#allocation11 + $0x374] sm:$0xf0] }
 0x1b9   : > { %3842 = vmatpush.bf16.msra.mxu2 %v8255_v7 }
 0x1ba   : > { %3870 = vmatpush.bf16.msrb.mxu0 %v8003_v63  ;;  %v2749_v46 = vpop.f32.mrf.mxu2  ;;  %v7920_v63 = vld [vmem:[#allocation11 + $0x38] sm:$0xf0]  ;;  %v2723_v15 = vpop.f32.mrf.mxu0 }
 0x1bb   : > { %3884 = vmatpush.bf16.msrb.mxu1 %v8131_v2  ;;  %v2763_v51 = vpop.f32.mrf.mxu3  ;;  %v8048_v2 = vld [vmem:[#allocation11 + $0x138] sm:$0xf0]  ;;  %v7923_v7 = vor.u32 %v9978_v59, %v7920_v63  ;;  %3802 = vmatpush.bf16.msrb.mxu3 %v8347_v60  ;;  %v2750_v21 = vadd.f32 %v2749_v46, %v2736_v12  ;;  %v8243_v60 = vor.u32 %v10058_v43, %v8240_v53  ;;  %v10098_v43 = vld [vmem:[#allocation11 + $0x3ec] sm:$0xf] }
 0x1bc   : > { %v8051_v9 = vor.u32 %v10010_v1, %v8048_v2  ;;  %v10050_v1 = vld [vmem:[#allocation11 + $0x26c] sm:$0xf]  ;;  %v8208_v2 = vld [vmem:[#allocation11 + $0x278] sm:$0xf0] }
 0x1bd   : > { %3843 = vmatpush.bf16.msra.mxu2 %v8239_v30  ;;  %v10040_v30 = vld [vmem:[#allocation11 + $0x214] sm:$0xf0]  ;;  %v2764_v34 = vadd.f32 %v2763_v51, %v2750_v21  ;;  %v8160_v21 = vld [vmem:[#allocation11 + $0x218] sm:$0xf0] }
 0x1be   : > { %3871 = vmatpush.bf16.msrb.mxu0 %v7987_v16  ;;  %v7904_v16 = vld [vmem:[#allocation11 + $0x18] sm:$0xf0]  ;;  %v8159_v33 = vor.u32 %v10040_v30, %v8158_v25  ;;  %v8398_v25 = vld [vmem:[#allocation11 + $0x3e8] sm:$0xf]  ;;  %v10100_v30 = vld [vmem:[#allocation11 + $0x3f4] sm:$0xf0] }
 0x1bf   : > { %3885 = vmatpush.bf16.msrb.mxu1 %v8115_v22  ;;  %v2737_v22 = vpop.f32.mrf.mxu1  ;;  %v7907_v27 = vor.u32 %v9974_v5, %v7904_v16  ;;  %3803 = vmatpush.bf16.msrb.mxu3 %v8331_v8  ;;  %v10046_v8 = vld [vmem:[#allocation11 + $0x24c] sm:$0xf]  ;;  %v8400_v53 = vld [vmem:[#allocation11 + $0x3f8] sm:$0xf0] }
 0x1c0   : > { %v2738_v35 = vadd.f32 %v2737_v22, %v2723_v15  ;;  %v2898_v15 = vperm.slane %v11421_v56, 3  ;;  %v8179_v56 = vor.u32 %v10042_v23, %v8176_v57  ;;  %v10129_v23 = vld [vmem:[#allocation16 + $0xe4] sm:$0xf] }
 0x1c1   : > { %3844 = vmatpush.bf16.msra.mxu2 %v8223_v58 }
 0x1c2   : > { %3872 = vmatpush.bf16.msrb.mxu0 %v7971_v24  ;;  %v8272_v24 = vld [vmem:[#allocation11 + $0x2f8] sm:$0xf0]  ;;  %v2751_v14 = vpop.f32.mrf.mxu2 }
 0x1c3   : > { %3886 = vmatpush.bf16.msrb.mxu1 %v8099_v11  ;;  %v8296_v11 = vld [vmem:[#allocation11 + $0x330] sm:$0xf0]  ;;  %v2765_v36 = vpop.f32.mrf.mxu3  ;;  %v8275_v38 = vor.u32 %v10066_v28, %v8272_v24  ;;  %3804 = vmatpush.bf16.msrb.mxu3 %v8315_v29  ;;  %v2752_v40 = vadd.f32 %v2751_v14, %v2738_v35  ;;  %v8399_v29 = vor.u32 %v10100_v30, %v8398_v25  ;;  %v8366_v14 = vld [vmem:[#allocation11 + $0x3a8] sm:$0xf]  ;;  %v10088_v35 = vld [vmem:[#allocation11 + $0x394] sm:$0xf0] }
 0x1c4   : > { %3793 = vmatmul.bf16.vlgmr.msrb.gmra.mxu2 %v11449_v54  ;;  %v10125_v25 = vld [vmem:[#allocation16 + $0xc4] sm:$0xf]  ;;  %v8504_v30 = vld [vmem:[#allocation16 + $0xd0] sm:$0xf0] }
 0x1c5   : > { %3845 = vmatpush.bf16.msra.mxu2 %v8207_v47  ;;  %v2766_v51 = vadd.f32 %v2765_v36, %v2752_v40  ;;  %v10092_v36 = vld [vmem:[#allocation11 + $0x3b4] sm:$0xf0]  ;;  %v8286_v40 = vld [vmem:[#allocation11 + $0x308] sm:$0xf] }
 0x1c6   : > { %3873 = vmatpush.bf16.msrb.mxu0 %v7955_v32  ;;  %v8299_v32 = vor.u32 %v10073_v19, %v8296_v11  ;;  %v10096_v19 = vld [vmem:[#allocation11 + $0x3d4] sm:$0xf0] }
 0x1c7   : > { %3887 = vmatpush.bf16.msrb.mxu1 %v8083_v44  ;;  %v8280_v44 = vld [vmem:[#allocation11 + $0x310] sm:$0xf0] }
 0x1c8   : > { %3805 = vmatpush.bf16.msrb.mxu3 %v8299_v32  ;;  %v8283_v47 = vor.u32 %v10069_v37, %v8280_v44  ;;  %v8318_v32 = vld [vmem:[#allocation11 + $0x348] sm:$0xf] }
 0x1c9   : > { %3846 = vmatpush.bf16.msra.mxu2 %v8191_v3  ;;  %v8302_v44 = vld [vmem:[#allocation11 + $0x328] sm:$0xf] }
 0x1ca   : > { %3874 = vmatpush.bf16.msrb.mxu0 %v7939_v55 }
 0x1cb   : > { %3888 = vmatpush.bf16.msrb.mxu1 %v8067_v48  ;;  %v10054_v48 = vld [vmem:[#allocation11 + $0x28c] sm:$0xf] }
 0x1cc   : > { %3806 = vmatpush.bf16.msrb.mxu3 %v8283_v47 }
 0x1cd   : > { %3847 = vmatpush.bf16.msra.mxu2 %v8175_v13 }
 0x1ce   : > { %3875 = vmatpush.bf16.msrb.mxu0 %v7923_v7  ;;  %v8211_v7 = vor.u32 %v10050_v1, %v8208_v2  ;;  %v10078_v1 = vld [vmem:[#allocation11 + $0x34c] sm:$0xf]  ;;  %v8320_v2 = vld [vmem:[#allocation11 + $0x358] sm:$0xf0] }
 0x1cf   : > { %3889 = vmatpush.bf16.msrb.mxu1 %v8051_v9  ;;  %v8192_v9 = vld [vmem:[#allocation11 + $0x258] sm:$0xf0] }
 0x1d0   : > { %v8195_v22 = vor.u32 %v10046_v8, %v8192_v9  ;;  %v11468_v9 = vld [vmem:[#allocation13] sm:$0xf] }
 0x1d1   : > { %3848 = vmatpush.bf16.msra.mxu2 %v8159_v33  ;;  %v8367_v33 = vor.u32 %v10092_v36, %v8366_v14 }
 0x1d2   : > { %v2777_v58 = vpop.f32.mrf.mxu0  ;;  %3876 = vmatpush.bf16.msrb.mxu0 %v7907_v27 }
 0x1d3   : > { %3890 = vmatpush.bf16.msrb.mxu1 %v8035_v18  ;;  %v2778_v45 = vadd.f32 %v2777_v58, %v2764_v34  ;;  %v2791_v50 = vpop.f32.mrf.mxu1  ;;  %v8350_v34 = vld [vmem:[#allocation11 + $0x388] sm:$0xf] }
 0x1d4   : > { %3849 = vmatmul.bf16.vlgmr.msra.gmra.mxu2 %v11449_v54  ;;  %v8351_v58 = vor.u32 %v10088_v35, %v8350_v34  ;;  %v8470_v34 = vld [vmem:[#allocation16 + $0x80] sm:$0xf]  ;;  %v10119_v35 = vld [vmem:[#allocation16 + $0x8c] sm:$0xf0] }
 0x1d5   : > { %3877 = vmatmul.bf16.vlgmr.msrb.gmra.mxu0 %v11438_v61  ;;  %3897 = vmatpush.bf16.msrb.mxu2 %v8275_v38  ;;  %v2792_v52 = vadd.f32 %v2791_v50, %v2778_v45  ;;  %v8224_v61 = vld [vmem:[#allocation11 + $0x298] sm:$0xf0]  ;;  %v8334_v38 = vld [vmem:[#allocation11 + $0x368] sm:$0xf]  ;;  %v10080_v45 = vld [vmem:[#allocation11 + $0x354] sm:$0xf0] }
 0x1d6   : > { %3891 = vmatmul.bf16.vlgmr.msrb.gmra.mxu1 %v11440_v10  ;;  %v8227_v10 = vor.u32 %v10054_v48, %v8224_v61  ;;  %v8335_v42 = vor.u32 %v10084_v41, %v8334_v38  ;;  %v8319_v37 = vor.u32 %v10080_v45, %v8318_v32  ;;  %v10086_v48 = vld [vmem:[#allocation11 + $0x38c] sm:$0xf]  ;;  %v8352_v61 = vld [vmem:[#allocation11 + $0x398] sm:$0xf0]  ;;  %v10117_v41 = vld [vmem:[#allocation16 + $0x84] sm:$0xf]  ;;  %v8471_v45 = vor.u32 %v10119_v35, %v8470_v34 }
 0x1d7   : > { %v8528_v35 = vld [vmem:[#allocation16 + $0xf8] sm:$0xf0] }
 0x1d9   : > { %3898 = vmatpush.bf16.msrb.mxu2 %v8259_v31  ;;  %v10072_v31 = vld [vmem:[#allocation11 + $0x314] sm:$0xf0] }
 0x1da   : > { %v2805_v0 = vpop.f32.mrf.mxu2  ;;  %v2779_v59 = vpop.f32.mrf.mxu0  ;;  %v8287_v47 = vor.u32 %v10072_v31, %v8286_v40 }
 0x1db   : > { %v2819_v46 = vpop.f32.mrf.mxu3  ;;  %v2806_v55 = vadd.f32 %v2805_v0, %v2792_v52  ;;  %v2780_v63 = vadd.f32 %v2779_v59, %v2766_v51  ;;  %v2793_v62 = vpop.f32.mrf.mxu1  ;;  %v8403_v52 = vor.u32 %v10098_v43, %v8400_v53  ;;  %v10094_v0 = vld [vmem:[#allocation11 + $0x3cc] sm:$0xf]  ;;  %v8368_v59 = vld [vmem:[#allocation11 + $0x3b8] sm:$0xf0]  ;;  %v8454_v43 = vld [vmem:[#allocation16 + $0x60] sm:$0xf] }
 0x1dc   : > { %v10115_v53 = vld [vmem:[#allocation16 + $0x6c] sm:$0xf0] }
 0x1dd   : > { %v2820_v49 = vadd.f32 %v2819_v46, %v2806_v55  ;;  %3899 = vmatpush.bf16.msrb.mxu2 %v8243_v60  ;;  %v2794_v3 = vadd.f32 %v2793_v62, %v2780_v63  ;;  %v8384_v46 = vld [vmem:[#allocation11 + $0x3d8] sm:$0xf0]  ;;  %v10090_v55 = vld [vmem:[#allocation11 + $0x3ac] sm:$0xf]  ;;  %v8355_v63 = vor.u32 %v10086_v48, %v8352_v61  ;;  %v8438_v48 = vld [vmem:[#allocation16 + $0x40] sm:$0xf] }
 0x1de   : > { %v8387_v51 = vor.u32 %v10094_v0, %v8384_v46  ;;  %v8371_v60 = vor.u32 %v10090_v55, %v8368_v59  ;;  %v8456_v0 = vld [vmem:[#allocation16 + $0x70] sm:$0xf0]  ;;  %v3054_v55 = vperm.slane %v11468_v9, 1  ;;  %v10111_v61 = vld [vmem:[#allocation16 + $0x4c] sm:$0xf0] }
 0x1df   : > { %v2888_v12 = vmul.f32 %v11423_v4, %v2820_v49  ;;  %v10038_v4 = vld [vmem:[#allocation11 + $0x20c] sm:$0xf] }
 0x1e0   : > { %v8163_v27 = vor.u32 %v10038_v4, %v8160_v21  ;;  %v10082_v49 = vld [vmem:[#allocation11 + $0x36c] sm:$0xf]  ;;  %v10127_v4 = vld [vmem:[#allocation16 + $0xcc] sm:$0xf0] }
 0x1e1   : > { %3900 = vmatpush.bf16.msrb.mxu2 %v8227_v10  ;;  %v2906_v17 = vadd.f32 %v2898_v15, %v2888_v12  ;;  %v8336_v10 = vld [vmem:[#allocation11 + $0x378] sm:$0xf0]  ;;  %v10074_v12 = vld [vmem:[#allocation11 + $0x32c] sm:$0xf] }
 0x1e2   : > { %v2807_v26 = vpop.f32.mrf.mxu2  ;;  %v8339_v62 = vor.u32 %v10082_v49, %v8336_v10  ;;  %v8439_v10 = vor.u32 %v10111_v61, %v8438_v48  ;;  %v8616_v48 = vld [vmem:[#allocation16 + $0x1b0] sm:$0xf0]  ;;  %v8494_v61 = vld [vmem:[#allocation16 + $0xa8] sm:$0xf] }
 0x1e3   : > { %v2808_v6 = vadd.f32 %v2807_v26, %v2794_v3  ;;  %v2821_v5 = vpop.f32.mrf.mxu3  ;;  %10596 = vtanh.f32 %v2906_v17  ;;  %v8323_v3 = vor.u32 %v10078_v1, %v8320_v2 }
 0x1e5   : > { %v2822_v16 = vadd.f32 %v2821_v5, %v2808_v6  ;;  %3901 = vmatpush.bf16.msrb.mxu2 %v8211_v7  ;;  %v10070_v6 = vld [vmem:[#allocation11 + $0x30c] sm:$0xf]  ;;  %v8288_v7 = vld [vmem:[#allocation11 + $0x318] sm:$0xf0] }
 0x1e6   : > { %v8291_v5 = vor.u32 %v10070_v6, %v8288_v7  ;;  %v10107_v6 = vld [vmem:[#allocation16 + $0x2c] sm:$0xf0]  ;;  %v10105_v7 = vld [vmem:[#allocation16 + $0x24] sm:$0xf] }
 0x1e7   : > { %v2892_v20 = vmul.f32 %v11434_v39, %v2822_v16  ;;  %v8382_v39 = vld [vmem:[#allocation11 + $0x3c8] sm:$0xf] }
 0x1e8   : > { %v8383_v11 = vor.u32 %v10096_v19, %v8382_v39  ;;  %v8486_v39 = vld [vmem:[#allocation16 + $0xa0] sm:$0xf]  ;;  %v10123_v19 = vld [vmem:[#allocation16 + $0xac] sm:$0xf0] }
 0x1e9   : > { %v2910_v13 = vadd.f32 %v2898_v15, %v2892_v20  ;;  %3902 = vmatpush.bf16.msrb.mxu2 %v8195_v22  ;;  %v10597_v28 = vpop.eup %10596  ;;  %v8304_v15 = vld [vmem:[#allocation11 + $0x338] sm:$0xf0]  ;;  %v8518_v20 = vld [vmem:[#allocation16 + $0xe0] sm:$0xf]  ;;  %v10131_v22 = vld [vmem:[#allocation16 + $0xec] sm:$0xf0]  ;;  %v8487_v36 = vor.u32 %v10123_v19, %v8486_v39 }
 0x1ea   : > { %v8307_v26 = vor.u32 %v10074_v12, %v8304_v15  ;;  %v8519_v57 = vor.u32 %v10131_v22, %v8518_v20  ;;  %v8406_v20 = vld [vmem:[#allocation16] sm:$0xf]  ;;  %v10103_v22 = vld [vmem:[#allocation16 + $0xc] sm:$0xf0] }
 0x1eb   : > { %10598 = vtanh.f32 %v2910_v13  ;;  %v8520_v13 = vld [vmem:[#allocation16 + $0xf0] sm:$0xf0] }
 0x1ec   : > { %v8523_v21 = vor.u32 %v10129_v23, %v8520_v13  ;;  %4353 = vmatpush.bf16.msra.mxu0 %v8519_v57  ;;  %v8646_v23 = vld [vmem:[#allocation16 + $0x1e0] sm:$0xf] }
 0x1ed   : > { %3903 = vmatpush.bf16.msrb.mxu2 %v8179_v56  ;;  %v8502_v56 = vld [vmem:[#allocation16 + $0xc0] sm:$0xf] }
 0x1f1   : > { %v10599_v24 = vpop.eup %10598  ;;  %3904 = vmatpush.bf16.msrb.mxu2 %v8163_v27  ;;  %v3053_v27 = vperm.slane %v11468_v9, 0 }
 0x1f2   : > { %v11461_v18 = vpack.c.bf16 %v10599_v24, %v10597_v28  ;;  %v8503_v28 = vor.u32 %v10127_v4, %v8502_v56  ;;  %v8407_v56 = vor.u32 %v10103_v22, %v8406_v20  ;;  %v10163_v4 = vld [vmem:[#allocation16 + $0x1ec] sm:$0xf0]  ;;  %v8478_v22 = vld [vmem:[#allocation16 + $0x88] sm:$0xf] }
 0x1f4   : > { %3751 = vmatmul.bf16.vlgmr.msra.gmra.mxu3 %v11461_v18  ;;  %3905 = vmatmul.bf16.vlgmr.msrb.gmra.mxu2 %v11449_v54  ;;  %v10076_v54 = vld [vmem:[#allocation11 + $0x334] sm:$0xf0] }
 0x1f5   : > { %3855 = vmatpush.bf16.msra.mxu3 %v8399_v29  ;;  %v8303_v50 = vor.u32 %v10076_v54, %v8302_v44  ;;  %4381 = vmatpush.bf16.msra.mxu2 %v8523_v21  ;;  %v8507_v29 = vor.u32 %v10125_v25, %v8504_v30  ;;  %v10101_v21 = vld [vmem:[#allocation16 + $0x4] sm:$0xf]  ;;  %v8408_v25 = vld [vmem:[#allocation16 + $0x10] sm:$0xf0] }
 0x1f6   : > { %4354 = vmatpush.bf16.msra.mxu0 %v8503_v28  ;;  %v8647_v28 = vor.u32 %v10163_v4, %v8646_v23  ;;  %v10120_v23 = vld [vmem:[#allocation16 + $0x94] sm:$0xf0] }
 0x1f7   : > { %v8479_v4 = vor.u32 %v10120_v23, %v8478_v22  ;;  %v10133_v22 = vld [vmem:[#allocation16 + $0x104] sm:$0xf] }
 0x1f8   : > { %4367 = vmatpush.bf16.msra.mxu1 %v8647_v28  ;;  %v10147_v28 = vld [vmem:[#allocation16 + $0x16c] sm:$0xf0] }
 0x1f9   : > { %3856 = vmatpush.bf16.msra.mxu3 %v8383_v11  ;;  %4382 = vmatpush.bf16.msra.mxu2 %v8507_v29  ;;  %v10121_v11 = vld [vmem:[#allocation16 + $0xa4] sm:$0xf] }
 0x1fa   : > { %4355 = vmatpush.bf16.msra.mxu0 %v8487_v36  ;;  %v10161_v29 = vld [vmem:[#allocation16 + $0x1e4] sm:$0xf]  ;;  %v10132_v36 = vld [vmem:[#allocation16 + $0xf4] sm:$0xf0] }
 0x1fd   : > { %3857 = vmatpush.bf16.msra.mxu3 %v8367_v33  ;;  %v8488_v33 = vld [vmem:[#allocation16 + $0xb0] sm:$0xf0] }
 0x1fe   : > { %v8491_v38 = vor.u32 %v10121_v11, %v8488_v33  ;;  %4356 = vmatpush.bf16.msra.mxu0 %v8471_v45  ;;  %v10130_v33 = vld [vmem:[#allocation16 + $0xec] sm:$0xf]  ;;  %v8632_v45 = vld [vmem:[#allocation16 + $0x1d0] sm:$0xf0] }
 0x200   : > { %4383 = vmatpush.bf16.msra.mxu2 %v8491_v38  ;;  %v10159_v38 = vld [vmem:[#allocation16 + $0x1cc] sm:$0xf0] }
 0x201   : > { %3858 = vmatpush.bf16.msra.mxu3 %v8351_v58 }
 0x204   : > { %3807 = vmatmul.bf16.vlgmr.msrb.gmra.mxu3 %v11461_v18 }
 0x205   : > { %3859 = vmatpush.bf16.msra.mxu3 %v8335_v42  ;;  %v8472_v42 = vld [vmem:[#allocation16 + $0x90] sm:$0xf0] }
 0x209   : > { %3860 = vmatpush.bf16.msra.mxu3 %v8319_v37  ;;  %v8475_v37 = vor.u32 %v10117_v41, %v8472_v42  ;;  %v8531_v41 = vor.u32 %v10130_v33, %v8528_v35  ;;  %v10114_v35 = vld [vmem:[#allocation16 + $0x6c] sm:$0xf] }
 0x20b   : > { %4384 = vmatpush.bf16.msra.mxu2 %v8475_v37 }
 0x20d   : > { %3861 = vmatpush.bf16.msra.mxu3 %v8303_v50 }
 0x20e   : > { %v3710_v8 = vpop.f32.mrf.mxu0 }
 0x211   : > { %3862 = vmatpush.bf16.msra.mxu3 %v8287_v47  ;;  %v3724_v16 = vpop.f32.mrf.mxu1  ;;  %v10113_v47 = vld [vmem:[#allocation16 + $0x64] sm:$0xf] }
 0x212   : > { %v8459_v46 = vor.u32 %v10113_v47, %v8456_v0 }
 0x214   : > { %3863 = vmatmul.bf16.vlgmr.msra.gmra.mxu3 %v11461_v18  ;;  %4385 = vmatpush.bf16.msra.mxu2 %v8459_v46  ;;  %v8614_v46 = vld [vmem:[#allocation16 + $0x1a0] sm:$0xf] }
 0x215   : > { %3911 = vmatpush.bf16.msrb.mxu3 %v8403_v52  ;;  %v8455_v52 = vor.u32 %v10115_v53, %v8454_v43  ;;  %v3055_v53 = vperm.slane %v11468_v9, 2 }
 0x216   : > { %v3712_v24 = vpop.f32.mrf.mxu0 }
 0x217   : > { %v3713_v40 = vadd.f32 %v3712_v24, %v3053_v27  ;;  %4357 = vmatpush.bf16.msra.mxu0 %v8455_v52  ;;  %v8411_v24 = vor.u32 %v10101_v21, %v8408_v25  ;;  %v8512_v52 = vld [vmem:[#allocation16 + $0xd8] sm:$0xf0] }
 0x219   : > { %3912 = vmatpush.bf16.msrb.mxu3 %v8387_v51  ;;  %v3726_v14 = vpop.f32.mrf.mxu1 }
 0x21a   : > { %v3727_v51 = vadd.f32 %v3726_v14, %v3713_v40  ;;  %v8526_v14 = vld [vmem:[#allocation16 + $0xe8] sm:$0xf]  ;;  %v10126_v40 = vld [vmem:[#allocation16 + $0xcc] sm:$0xf] }
 0x21b   : > { %4358 = vmatpush.bf16.msra.mxu0 %v8439_v10  ;;  %v8527_v34 = vor.u32 %v10132_v36, %v8526_v14  ;;  %v8515_v0 = vor.u32 %v10126_v40, %v8512_v52  ;;  %v10116_v14 = vld [vmem:[#allocation16 + $0x74] sm:$0xf0]  ;;  %v8446_v40 = vld [vmem:[#allocation16 + $0x48] sm:$0xf] }
 0x21d   : > { %3913 = vmatpush.bf16.msrb.mxu3 %v8371_v60 }
 0x21e   : > { %v3766_v54 = vpop.f32.mrf.mxu0 }
 0x221   : > { %3914 = vmatpush.bf16.msrb.mxu3 %v8355_v63  ;;  %v3780_v59 = vpop.f32.mrf.mxu1  ;;  %v10109_v63 = vld [vmem:[#allocation16 + $0x44] sm:$0xf] }
 0x225   : > { %3915 = vmatpush.bf16.msrb.mxu3 %v8339_v62  ;;  %v8440_v62 = vld [vmem:[#allocation16 + $0x50] sm:$0xf0] }
 0x226   : > { %v8443_v2 = vor.u32 %v10109_v63, %v8440_v62  ;;  %v3768_v15 = vpop.f32.mrf.mxu0  ;;  %v10124_v63 = vld [vmem:[#allocation16 + $0xb4] sm:$0xf0] }
 0x227   : > { %v3769_v39 = vadd.f32 %v3768_v15, %v3054_v55  ;;  %v8495_v62 = vor.u32 %v10124_v63, %v8494_v61  ;;  %v10139_v61 = vld [vmem:[#allocation16 + $0x12c] sm:$0xf0]  ;;  %v10137_v63 = vld [vmem:[#allocation16 + $0x124] sm:$0xf] }
 0x228   : > { %4386 = vmatpush.bf16.msra.mxu2 %v8443_v2  ;;  %v8496_v2 = vld [vmem:[#allocation16 + $0xb8] sm:$0xf0] }
 0x229   : > { %3916 = vmatpush.bf16.msrb.mxu3 %v8323_v3  ;;  %v3767_v3 = vadd.f32 %v3766_v54, %v3054_v55  ;;  %v3782_v57 = vpop.f32.mrf.mxu1  ;;  %v8510_v54 = vld [vmem:[#allocation16 + $0xc8] sm:$0xf]  ;;  %v10153_v55 = vld [vmem:[#allocation16 + $0x1a4] sm:$0xf] }
 0x22a   : > { %v3783_v43 = vadd.f32 %v3782_v57, %v3769_v39  ;;  %v8619_v10 = vor.u32 %v10153_v55, %v8616_v48  ;;  %v10118_v57 = vld [vmem:[#allocation16 + $0x8c] sm:$0xf]  ;;  %v8584_v39 = vld [vmem:[#allocation16 + $0x170] sm:$0xf0]  ;;  %v8550_v48 = vld [vmem:[#allocation16 + $0x120] sm:$0xf] }
 0x22d   : > { %3917 = vmatpush.bf16.msrb.mxu3 %v8307_v26  ;;  %v8422_v26 = vld [vmem:[#allocation16 + $0x20] sm:$0xf] }
 0x231   : > { %3918 = vmatpush.bf16.msrb.mxu3 %v8291_v5  ;;  %v8423_v5 = vor.u32 %v10107_v6, %v8422_v26 }
 0x232   : > { %v3822_v37 = vpop.f32.mrf.mxu0 }
 0x233   : > { %4359 = vmatpush.bf16.msra.mxu0 %v8423_v5  ;;  %v3823_v15 = vadd.f32 %v3822_v37, %v3055_v53  ;;  %v10149_v5 = vld [vmem:[#allocation16 + $0x184] sm:$0xf] }
 0x234   : > { %3919 = vmatmul.bf16.vlgmr.msrb.gmra.mxu3 %v11461_v18  ;;  %v3711_v18 = vadd.f32 %v3710_v8, %v3053_v27  ;;  %v8424_v8 = vld [vmem:[#allocation16 + $0x30] sm:$0xf0]  ;;  %v10141_v37 = vld [vmem:[#allocation16 + $0x144] sm:$0xf] }
 0x236   : > { %v3725_v32 = vadd.f32 %v3724_v16, %v3711_v18  ;;  %v8427_v16 = vor.u32 %v10105_v7, %v8424_v8  ;;  %v8648_v18 = vld [vmem:[#allocation16 + $0x1f0] sm:$0xf0]  ;;  %v10151_v7 = vld [vmem:[#allocation16 + $0x18c] sm:$0xf0] }
 0x237   : > { %v3738_v17 = vpop.f32.mrf.mxu2  ;;  %4360 = vmatpush.bf16.msra.mxu0 %v8407_v56  ;;  %v8651_v11 = vor.u32 %v10161_v29, %v8648_v18  ;;  %v8600_v8 = vld [vmem:[#allocation16 + $0x190] sm:$0xf0]  ;;  %v8480_v56 = vld [vmem:[#allocation16 + $0x98] sm:$0xf0] }
 0x238   : > { %v3739_v44 = vadd.f32 %v3738_v17, %v3725_v32  ;;  %v3781_v17 = vadd.f32 %v3780_v59, %v3767_v3  ;;  %4387 = vmatpush.bf16.msra.mxu2 %v8427_v16  ;;  %v10157_v32 = vld [vmem:[#allocation16 + $0x1c4] sm:$0xf]  ;;  %v8598_v3 = vld [vmem:[#allocation16 + $0x180] sm:$0xf]  ;;  %v3836_v16 = vpop.f32.mrf.mxu1  ;;  %v8483_v25 = vor.u32 %v10118_v57, %v8480_v56  ;;  %v8414_v56 = vld [vmem:[#allocation16 + $0x8] sm:$0xf] }
 0x239   : > { %4395 = vmatpush.bf16.msra.mxu3 %v8651_v11  ;;  %v8599_v20 = vor.u32 %v10151_v7, %v8598_v3  ;;  %v3837_v21 = vadd.f32 %v3836_v16, %v3823_v15  ;;  %v8462_v11 = vld [vmem:[#allocation16 + $0x68] sm:$0xf]  ;;  %v10106_v7 = vld [vmem:[#allocation16 + $0x2c] sm:$0xf] }
 0x23b   : > { %4409 = vmatpush.bf16.msrb.mxu0 %v8527_v34  ;;  %v8463_v34 = vor.u32 %v10116_v14, %v8462_v11  ;;  %v8656_v11 = vld [vmem:[#allocation16 + $0x1f8] sm:$0xf0] }
 0x23c   : > { %4388 = vmatpush.bf16.msra.mxu2 %v8411_v24  ;;  %v10145_v24 = vld [vmem:[#allocation16 + $0x164] sm:$0xf] }
 0x23d   : > { %v8587_v33 = vor.u32 %v10145_v24, %v8584_v39  ;;  %v10162_v39 = vld [vmem:[#allocation16 + $0x1ec] sm:$0xf] }
 0x23f   : > { %v3740_v58 = vpop.f32.mrf.mxu2 }
 0x240   : > { %v3741_v49 = vadd.f32 %v3740_v58, %v3727_v51  ;;  %v8630_v58 = vld [vmem:[#allocation16 + $0x1c0] sm:$0xf]  ;;  %4437 = vmatpush.bf16.msrb.mxu2 %v8531_v41  ;;  %v10155_v51 = vld [vmem:[#allocation16 + $0x1ac] sm:$0xf0] }
 0x241   : > { %v8631_v42 = vor.u32 %v10159_v38, %v8630_v58  ;;  %v8464_v58 = vld [vmem:[#allocation16 + $0x78] sm:$0xf0] }
 0x243   : > { %4368 = vmatpush.bf16.msra.mxu1 %v8631_v42  ;;  %v8467_v42 = vor.u32 %v10114_v35, %v8464_v58  ;;  %v10158_v35 = vld [vmem:[#allocation16 + $0x1cc] sm:$0xf] }
 0x244   : > { %4438 = vmatpush.bf16.msrb.mxu2 %v8515_v0  ;;  %v10112_v0 = vld [vmem:[#allocation16 + $0x54] sm:$0xf0] }
 0x247   : > { %v3794_v60 = vpop.f32.mrf.mxu2 }
 0x248   : > { %v3795_v13 = vadd.f32 %v3794_v60, %v3781_v17  ;;  %v8615_v60 = vor.u32 %v10155_v51, %v8614_v46  ;;  %v10110_v46 = vld [vmem:[#allocation16 + $0x4c] sm:$0xf] }
 0x24a   : > { %4369 = vmatpush.bf16.msra.mxu1 %v8615_v60 }
 0x24e   : > { %4370 = vmatpush.bf16.msra.mxu1 %v8599_v20  ;;  %v10135_v20 = vld [vmem:[#allocation16 + $0x10c] sm:$0xf0] }
 0x24f   : > { %v3796_v30 = vpop.f32.mrf.mxu2 }
 0x250   : > { %v3797_v59 = vadd.f32 %v3796_v30, %v3783_v43  ;;  %v3824_v30 = vpop.f32.mrf.mxu0  ;;  %v3838_v43 = vpop.f32.mrf.mxu1 }
 0x251   : > { %v3825_v38 = vadd.f32 %v3824_v30, %v3055_v53  ;;  %v8448_v53 = vld [vmem:[#allocation16 + $0x58] sm:$0xf0]  ;;  %v10164_v30 = vld [vmem:[#allocation16 + $0x1f4] sm:$0xf0] }
 0x252   : > { %v8451_v60 = vor.u32 %v10110_v46, %v8448_v53  ;;  %v8606_v53 = vld [vmem:[#allocation16 + $0x188] sm:$0xf] }
 0x253   : > { %v3839_v51 = vadd.f32 %v3838_v43, %v3825_v38  ;;  %v8640_v38 = vld [vmem:[#allocation16 + $0x1d8] sm:$0xf0] }
 0x257   : > { %v3850_v17 = vpop.f32.mrf.mxu2 }
 0x258   : > { %v3851_v29 = vadd.f32 %v3850_v17, %v3837_v21  ;;  %v8534_v17 = vld [vmem:[#allocation16 + $0x100] sm:$0xf]  ;;  %v10104_v21 = vld [vmem:[#allocation16 + $0x14] sm:$0xf0] }
 0x259   : > { %v8535_v57 = vor.u32 %v10135_v20, %v8534_v17  ;;  %v8574_v17 = vld [vmem:[#allocation16 + $0x148] sm:$0xf]  ;;  %v10144_v20 = vld [vmem:[#allocation16 + $0x154] sm:$0xf0] }
 0x277   : > { %v3752_v50 = vpop.f32.mrf.mxu3 }
 0x278   : > { %v11471_v31 = vadd.f32 %v3752_v50, %v3739_v44  ;;  %v8635_v44 = vor.u32 %v10157_v32, %v8632_v45  ;;  %v10128_v50 = vld [vmem:[#allocation16 + $0xd4] sm:$0xf0]  ;;  %v8566_v32 = vld [vmem:[#allocation16 + $0x140] sm:$0xf]  ;;  %v10143_v45 = vld [vmem:[#allocation16 + $0x14c] sm:$0xf0] }
 0x279   : > { %v8511_v47 = vor.u32 %v10128_v50, %v8510_v54  ;;  %v8567_v54 = vor.u32 %v10143_v45, %v8566_v32  ;;  %v8568_v50 = vld [vmem:[#allocation16 + $0x150] sm:$0xf0]  ;;  %v3933_v32 = vld [vmem:[#allocation14] sm:$0xff]  ;;  %v8643_v45 = vor.u32 %v10158_v35, %v8640_v38  ;;  %v10134_v38 = vld [vmem:[#allocation16 + $0x10c] sm:$0xf] }
 0x27a   : > { %3925 = vst [vmem:[#allocation21] sm:$0xff] %v11471_v31  ;;  %4396 = vmatpush.bf16.msra.mxu3 %v8635_v44  ;;  %v8571_v52 = vor.u32 %v10141_v37, %v8568_v50  ;;  %v3056_v37 = vperm.slane %v11468_v9, 3  ;;  %v10156_v50 = vld [vmem:[#allocation16 + $0x1b4] sm:$0xf0] }
 0x27b   : > { %4410 = vmatpush.bf16.msrb.mxu0 %v8511_v47  ;;  %v3852_v47 = vpop.f32.mrf.mxu2 }
 0x27e   : > { %4397 = vmatpush.bf16.msra.mxu3 %v8619_v10  ;;  %v8551_v10 = vor.u32 %v10139_v61, %v8550_v48  ;;  %v8608_v48 = vld [vmem:[#allocation16 + $0x198] sm:$0xf0]  ;;  %v3892_v61 = vpop.f32.mrf.mxu1 }
 0x27f   : > { %v3754_v1 = vpop.f32.mrf.mxu3  ;;  %4411 = vmatpush.bf16.msrb.mxu0 %v8495_v62  ;;  %v8552_v62 = vld [vmem:[#allocation16 + $0x130] sm:$0xf0] }
 0x280   : > { %v11475_v12 = vadd.f32 %v3754_v1, %v3741_v49  ;;  %v10122_v1 = vld [vmem:[#allocation16 + $0xac] sm:$0xf]  ;;  %v8555_v15 = vor.u32 %v10137_v63, %v8552_v62 }
 0x281   : > { %v8499_v6 = vor.u32 %v10122_v1, %v8496_v2  ;;  %v8430_v1 = vld [vmem:[#allocation16 + $0x28] sm:$0xf]  ;;  %v10108_v2 = vld [vmem:[#allocation16 + $0x34] sm:$0xf0] }
 0x282   : > { %3927 = vst [vmem:[#allocation21 + $0x10] sm:$0xff] %v11475_v12 }
 0x283   : > { %4439 = vmatpush.bf16.msrb.mxu2 %v8499_v6  ;;  %4412 = vmatpush.bf16.msrb.mxu0 %v8479_v4  ;;  %v8431_v6 = vor.u32 %v10108_v2, %v8430_v1  ;;  %v3906_v63 = vpop.f32.mrf.mxu2  ;;  %v8590_v1 = vld [vmem:[#allocation16 + $0x168] sm:$0xf]  ;;  %v10148_v2 = vld [vmem:[#allocation16 + $0x174] sm:$0xf0] }
 0x287   : > { %v3808_v27 = vpop.f32.mrf.mxu3  ;;  %4440 = vmatpush.bf16.msrb.mxu2 %v8483_v25  ;;  %4413 = vmatpush.bf16.msrb.mxu0 %v8463_v34  ;;  %v8654_v25 = vld [vmem:[#allocation16 + $0x1e8] sm:$0xf]  ;;  %v10160_v34 = vld [vmem:[#allocation16 + $0x1d4] sm:$0xf0] }
 0x288   : > { %v11478_v19 = vadd.f32 %v3808_v27, %v3795_v13  ;;  %v8603_v13 = vor.u32 %v10149_v5, %v8600_v8  ;;  %v8582_v27 = vld [vmem:[#allocation16 + $0x160] sm:$0xf]  ;;  %v8432_v5 = vld [vmem:[#allocation16 + $0x38] sm:$0xf0]  ;;  %v8655_v24 = vor.u32 %v10164_v30, %v8654_v25  ;;  %v10140_v25 = vld [vmem:[#allocation16 + $0x134] sm:$0xf0]  ;;  %v3894_v30 = vpop.f32.mrf.mxu1 }
 0x289   : > { %v8583_v18 = vor.u32 %v10147_v28, %v8582_v27  ;;  %v8435_v16 = vor.u32 %v10106_v7, %v8432_v5  ;;  %v8415_v28 = vor.u32 %v10104_v21, %v8414_v56  ;;  %v8592_v7 = vld [vmem:[#allocation16 + $0x178] sm:$0xf0]  ;;  %v8575_v56 = vor.u32 %v10144_v20, %v8574_v17  ;;  %v8558_v21 = vld [vmem:[#allocation16 + $0x128] sm:$0xf] }
 0x28a   : > { %3926 = vst [vmem:[#allocation21 + $0x8] sm:$0xff] %v11478_v19  ;;  %4398 = vmatpush.bf16.msra.mxu3 %v8603_v13  ;;  %v8536_v13 = vld [vmem:[#allocation16 + $0x110] sm:$0xf0] }
 0x28b   : > { %4371 = vmatpush.bf16.msra.mxu1 %v8583_v18  ;;  %4441 = vmatpush.bf16.msrb.mxu2 %v8467_v42  ;;  %v8539_v4 = vor.u32 %v10133_v22, %v8536_v13  ;;  %v8416_v18 = vld [vmem:[#allocation16 + $0x18] sm:$0xf0]  ;;  %v3878_v42 = vpop.f32.mrf.mxu0 }
 0x28c   : > { %v8576_v13 = vld [vmem:[#allocation16 + $0x158] sm:$0xf0] }
 0x28e   : > { %4399 = vmatpush.bf16.msra.mxu3 %v8587_v33  ;;  %v8638_v33 = vld [vmem:[#allocation16 + $0x1c8] sm:$0xf] }
 0x28f   : > { %v3810_v49 = vpop.f32.mrf.mxu3  ;;  %4372 = vmatpush.bf16.msra.mxu1 %v8567_v54  ;;  %4442 = vmatpush.bf16.msrb.mxu2 %v8451_v60  ;;  %v8639_v58 = vor.u32 %v10160_v34, %v8638_v33  ;;  %v8622_v54 = vld [vmem:[#allocation16 + $0x1a8] sm:$0xf]  ;;  %v10150_v60 = vld [vmem:[#allocation16 + $0x18c] sm:$0xf]  ;;  %v10136_v33 = vld [vmem:[#allocation16 + $0x114] sm:$0xf0] }
 0x290   : > { %v11482_v26 = vadd.f32 %v3810_v49, %v3797_v59  ;;  %v8447_v59 = vor.u32 %v10112_v0, %v8446_v40  ;;  %v3853_v49 = vadd.f32 %v3852_v47, %v3839_v51  ;;  %v10154_v40 = vld [vmem:[#allocation16 + $0x1ac] sm:$0xf]  ;;  %v8623_v47 = vor.u32 %v10156_v50, %v8622_v54  ;;  %v10152_v51 = vld [vmem:[#allocation16 + $0x194] sm:$0xf0] }
 0x291   : > { %v8607_v9 = vor.u32 %v10152_v51, %v8606_v53  ;;  %v8611_v62 = vor.u32 %v10150_v60, %v8608_v48  ;;  %v3934_v54 = vld [vmem:[#allocation14 + $0x8] sm:$0xff]  ;;  %v3936_v50 = vld [vmem:[#allocation14 + $0x18] sm:$0xff]  ;;  %v4023_v51 = vld [vmem:[#allocation17] sm:$0xf] }
 0x292   : > { %3928 = vst [vmem:[#allocation21 + $0x18] sm:$0xff] %v11482_v26  ;;  %4400 = vmatpush.bf16.msra.mxu3 %v8571_v52  ;;  %4414 = vmatpush.bf16.msrb.mxu0 %v8447_v59  ;;  %v8624_v52 = vld [vmem:[#allocation16 + $0x1b8] sm:$0xf0]  ;;  %v4026_v48 = vperm.slane %v4023_v51, 1 }
 0x293   : > { %4373 = vmatpush.bf16.msra.mxu1 %v8551_v10  ;;  %4443 = vmatpush.bf16.msrb.mxu2 %v8435_v16  ;;  %v8627_v46 = vor.u32 %v10154_v40, %v8624_v52  ;;  %v3880_v5 = vpop.f32.mrf.mxu0 }
 0x296   : > { %4401 = vmatpush.bf16.msra.mxu3 %v8555_v15  ;;  %4415 = vmatpush.bf16.msrb.mxu0 %v8431_v6  ;;  %v10146_v6 = vld [vmem:[#allocation16 + $0x16c] sm:$0xf] }
 0x297   : > { %v3864_v36 = vpop.f32.mrf.mxu3  ;;  %4374 = vmatpush.bf16.msra.mxu1 %v8535_v57  ;;  %v10142_v57 = vld [vmem:[#allocation16 + $0x14c] sm:$0xf] }
 0x298   : > { %v3865_v41 = vadd.f32 %v3864_v36, %v3851_v29  ;;  %v10102_v29 = vld [vmem:[#allocation16 + $0xc] sm:$0xf]  ;;  %v8659_v36 = vor.u32 %v10162_v39, %v8656_v11  ;;  %v8559_v39 = vor.u32 %v10140_v25, %v8558_v21 }
 0x299   : > { %v8419_v14 = vor.u32 %v10102_v29, %v8416_v18  ;;  %v10138_v29 = vld [vmem:[#allocation16 + $0x12c] sm:$0xf]  ;;  %v8560_v18 = vld [vmem:[#allocation16 + $0x138] sm:$0xf0] }
 0x29a   : > { %3929 = vst [vmem:[#allocation23] sm:$0xff] %v3865_v41  ;;  %v3937_v44 = vmul.f32 0.5, %v3865_v41  ;;  %4402 = vmatpush.bf16.msra.mxu3 %v8539_v4  ;;  %4416 = vmatpush.bf16.msrb.mxu0 %v8415_v28  ;;  %v8579_v28 = vor.u32 %v10142_v57, %v8576_v13  ;;  %v8563_v35 = vor.u32 %v10138_v29, %v8560_v18 }
 0x29b   : > { %4423 = vmatpush.bf16.msrb.mxu1 %v8655_v24  ;;  %4444 = vmatpush.bf16.msrb.mxu2 %v8419_v14 }
 0x29c   : > { %v3941_v55 = vmul.f32 1.442695, %v3937_v44  ;;  %v3935_v44 = vld [vmem:[#allocation14 + $0x10] sm:$0xff] }
 0x29e   : > { %10600 = vpow2.f32 %v3941_v55  ;;  %4451 = vmatpush.bf16.msrb.mxu3 %v8659_v36  ;;  %v3879_v55 = vadd.f32 %v3878_v42, %v3056_v37  ;;  %v8542_v36 = vld [vmem:[#allocation16 + $0x108] sm:$0xf] }
 0x29f   : > { %v3866_v3 = vpop.f32.mrf.mxu3  ;;  %4424 = vmatpush.bf16.msrb.mxu1 %v8639_v58  ;;  %v8543_v42 = vor.u32 %v10136_v33, %v8542_v36 }
 0x2a0   : > { %v3867_v8 = vadd.f32 %v3866_v3, %v3853_v49  ;;  %v3893_v3 = vadd.f32 %v3892_v61, %v3879_v55 }
 0x2a2   : > { %3931 = vst [vmem:[#allocation23 + $0x10] sm:$0xff] %v3867_v8  ;;  %v3939_v23 = vmul.f32 0.5, %v3867_v8  ;;  %4452 = vmatpush.bf16.msrb.mxu3 %v8643_v45  ;;  %v8591_v8 = vor.u32 %v10148_v2, %v8590_v1  ;;  %v3907_v16 = vadd.f32 %v3906_v63, %v3893_v3 }
 0x2a3   : > { %4425 = vmatpush.bf16.msrb.mxu1 %v8623_v47 }
 0x2a4   : > { %v3945_v27 = vmul.f32 1.442695, %v3939_v23  ;;  %v10601_v41 = vpop.eup %10600 }
 0x2a5   : > { %v3949_v43 = vmul.f32 %v10601_v41, %v3933_v32  ;;  %v8544_v41 = vld [vmem:[#allocation16 + $0x118] sm:$0xf0] }
 0x2a6   : > { %10602 = vpow2.f32 %v3945_v27  ;;  %4453 = vmatpush.bf16.msrb.mxu3 %v8627_v46  ;;  %v3908_v27 = vpop.f32.mrf.mxu2  ;;  %v8547_v45 = vor.u32 %v10134_v38, %v8544_v41 }
 0x2a7   : > { %v3953_v49 = vadd.f32 %v3949_v43, %v11471_v31  ;;  %4426 = vmatpush.bf16.msrb.mxu1 %v8607_v9  ;;  %v8595_v31 = vor.u32 %v10146_v6, %v8592_v7  ;;  %v4027_v7 = vperm.slane %v4023_v51, 2 }
 0x2aa   : > { %4454 = vmatpush.bf16.msrb.mxu3 %v8611_v62 }
 0x2ab   : > { %4427 = vmatpush.bf16.msrb.mxu1 %v8591_v8 }
 0x2ac   : > { %v10603_v0 = vpop.eup %10602 }
 0x2ad   : > { %v3951_v59 = vmul.f32 %v10603_v0, %v3935_v44 }
 0x2ae   : > { %4455 = vmatpush.bf16.msrb.mxu3 %v8595_v31  ;;  %v4028_v31 = vperm.slane %v4023_v51, 3 }
 0x2af   : > { %v3955_v10 = vadd.f32 %v3951_v59, %v11475_v12  ;;  %v3881_v12 = vadd.f32 %v3880_v5, %v3056_v37  ;;  %4428 = vmatpush.bf16.msrb.mxu1 %v8575_v56  ;;  %v4025_v59 = vperm.slane %v4023_v51, 0 }
 0x2b1   : > { %v3957_v15 = vpack.c.bf16 %v3955_v10, %v3953_v49  ;;  %v3895_v24 = vadd.f32 %v3894_v30, %v3881_v12 }
 0x2b2   : > { %4456 = vmatpush.bf16.msrb.mxu3 %v8579_v28 }
 0x2b3   : > { %4361 = vmatmul.bf16.vlgmr.msra.gmra.mxu0 %v3957_v15  ;;  %4389 = vmatmul.bf16.vlgmr.msra.gmra.mxu2 %v3957_v15  ;;  %v3909_v11 = vadd.f32 %v3908_v27, %v3895_v24 }
 0x2b4   : > { %4429 = vmatpush.bf16.msrb.mxu1 %v8559_v39 }
 0x2b6   : > { %4457 = vmatpush.bf16.msrb.mxu3 %v8563_v35 }
 0x2b7   : > { %v3920_v22 = vpop.f32.mrf.mxu3 }
 0x2b8   : > { %v3921_v23 = vadd.f32 %v3920_v22, %v3907_v16  ;;  %4430 = vmatpush.bf16.msrb.mxu1 %v8543_v42 }
 0x2ba   : > { %3930 = vst [vmem:[#allocation23 + $0x8] sm:$0xff] %v3921_v23  ;;  %v3938_v4 = vmul.f32 0.5, %v3921_v23  ;;  %4458 = vmatpush.bf16.msrb.mxu3 %v8547_v45 }
 0x2bc   : > { %v3943_v14 = vmul.f32 1.442695, %v3938_v4 }
 0x2be   : > { %10604 = vpow2.f32 %v3943_v14 }
 0x2bf   : > { %v3922_v34 = vpop.f32.mrf.mxu3 }
 0x2c0   : > { %v3923_v58 = vadd.f32 %v3922_v34, %v3909_v11 }
 0x2c2   : > { %3932 = vst [vmem:[#allocation23 + $0x18] sm:$0xff] %v3923_v58  ;;  %v3940_v32 = vmul.f32 0.5, %v3923_v58 }
 0x2c3   : > { %4417 = vmatmul.bf16.vlgmr.msrb.gmra.mxu0 %v3957_v15  ;;  %4445 = vmatmul.bf16.vlgmr.msrb.gmra.mxu2 %v3957_v15 }
 0x2c4   : > { %v3947_v37 = vmul.f32 1.442695, %v3940_v32  ;;  %v10605_v44 = vpop.eup %10604 }
 0x2c5   : > { %v3950_v40 = vmul.f32 %v10605_v44, %v3934_v54 }
 0x2c6   : > { %10606 = vpow2.f32 %v3947_v37 }
 0x2c7   : > { %v3954_v52 = vadd.f32 %v3950_v40, %v11478_v19 }
 0x2cc   : > { %v10607_v43 = vpop.eup %10606 }
 0x2cd   : > { %v3952_v47 = vmul.f32 %v10607_v43, %v3936_v50 }
 0x2cf   : > { %v3956_v0 = vadd.f32 %v3952_v47, %v11482_v26 }
 0x2d1   : > { %v3958_v46 = vpack.c.bf16 %v3956_v0, %v3954_v52 }
 0x2d3   : > { %4375 = vmatmul.bf16.vlgmr.msra.gmra.mxu1 %v3958_v46  ;;  %4403 = vmatmul.bf16.vlgmr.msra.gmra.mxu3 %v3958_v46 }
 0x2e3   : > { %4431 = vmatmul.bf16.vlgmr.msrb.gmra.mxu1 %v3958_v46  ;;  %4459 = vmatmul.bf16.vlgmr.msrb.gmra.mxu3 %v3958_v46 }
 0x330   : > { %v4362_v53 = vpop.f32.mrf.mxu0 }
 0x331   : > { %v4363_v61 = vadd.f32 %v4362_v53, %v4025_v59 }
 0x336   : > { %v4390_v55 = vpop.f32.mrf.mxu2 }
 0x337   : > { %v4391_v49 = vadd.f32 %v4390_v55, %v4026_v48 }
 0x338   : > { %v4364_v63 = vpop.f32.mrf.mxu0 }
 0x339   : > { %v4365_v1 = vadd.f32 %v4364_v63, %v4025_v59 }
 0x33e   : > { %v4392_v10 = vpop.f32.mrf.mxu2 }
 0x33f   : > { %v4393_v3 = vadd.f32 %v4392_v10, %v4026_v48 }
 0x340   : > { %v4418_v15 = vpop.f32.mrf.mxu0 }
 0x341   : > { %v4419_v12 = vadd.f32 %v4418_v15, %v4027_v7 }
 0x346   : > { %v4446_v17 = vpop.f32.mrf.mxu2 }
 0x347   : > { %v4447_v57 = vadd.f32 %v4446_v17, %v4028_v31 }
 0x348   : > { %v4420_v21 = vpop.f32.mrf.mxu0 }
 0x349   : > { %v4421_v28 = vadd.f32 %v4420_v21, %v4027_v7 }
 0x34e   : > { %v4448_v24 = vpop.f32.mrf.mxu2 }
 0x34f   : > { %v4449_v18 = vadd.f32 %v4448_v24, %v4028_v31 }
 0x350   : > { %v4376_v60 = vpop.f32.mrf.mxu1 }
 0x351   : > { %v4377_v9 = vadd.f32 %v4376_v60, %v4363_v61 }
 0x353   : > { %10608 = vtanh.f32 %v4377_v9 }
 0x356   : > { %v4404_v62 = vpop.f32.mrf.mxu3 }
 0x357   : > { %v4405_v19 = vadd.f32 %v4404_v62, %v4391_v49 }
 0x358   : > { %v4378_v26 = vpop.f32.mrf.mxu1 }
 0x359   : > { %10610 = vtanh.f32 %v4405_v19  ;;  %v4379_v2 = vadd.f32 %v4378_v26, %v4365_v1  ;;  %v10609_v6 = vpop.eup %10608 }
 0x35b   : > { %10612 = vtanh.f32 %v4379_v2 }
 0x35e   : > { %v4406_v5 = vpop.f32.mrf.mxu3 }
 0x35f   : > { %v10611_v8 = vpop.eup %10610  ;;  %v4407_v16 = vadd.f32 %v4406_v5, %v4393_v3 }
 0x360   : > { %v4473_v20 = vpack.c.bf16 %v10611_v8, %v10609_v6  ;;  %v4432_v22 = vpop.f32.mrf.mxu1 }
 0x361   : > { %10614 = vtanh.f32 %v4407_v16  ;;  %v4433_v23 = vadd.f32 %v4432_v22, %v4419_v12  ;;  %v10613_v13 = vpop.eup %10612 }
 0x362   : > { %4477 = vst [vmem:[#allocation4] sm:$0xff] %v4473_v20 }
 0x363   : > { %10616 = vtanh.f32 %v4433_v23 }
 0x366   : > { %v4460_v56 = vpop.f32.mrf.mxu3 }
 0x367   : > { %v10615_v4 = vpop.eup %10614  ;;  %v4461_v25 = vadd.f32 %v4460_v56, %v4447_v57 }
 0x368   : > { %v4475_v30 = vpack.c.bf16 %v10615_v4, %v10613_v13  ;;  %v4434_v27 = vpop.f32.mrf.mxu1 }
 0x369   : > { %10618 = vtanh.f32 %v4461_v25  ;;  %v4435_v29 = vadd.f32 %v4434_v27, %v4421_v28  ;;  %v10617_v39 = vpop.eup %10616 }
 0x36a   : > { %4479 = vst [vmem:[#allocation4 + $0x10] sm:$0xff] %v4475_v30 }
 0x36b   : > { %10620 = vtanh.f32 %v4435_v29 }
 0x36e   : > { %v4462_v11 = vpop.f32.mrf.mxu3 }
 0x36f   : > { %v10619_v14 = vpop.eup %10618  ;;  %v4463_v36 = vadd.f32 %v4462_v11, %v4449_v18 }
 0x370   : > { %v4474_v33 = vpack.c.bf16 %v10619_v14, %v10617_v39 }
 0x371   : > { %10622 = vtanh.f32 %v4463_v36  ;;  %v10621_v34 = vpop.eup %10620 }
 0x372   : > { %4478 = vst [vmem:[#allocation4 + $0x8] sm:$0xff] %v4474_v33 }
 0x377   : > { %v10623_v35 = vpop.eup %10622 }
 0x378   : > { %v4476_v58 = vpack.c.bf16 %v10623_v35, %v10621_v34 }
 0x37a   : > { %4480 = vst [vmem:[#allocation4 + $0x18] sm:$0xff] %v4476_v58 }
 0x37b PF: > { %p8660_p12 = scmp.ne.s32.totalorder %s11028_s21, 1 }
 0x37d   : > { %4484 = sbr.rel (%p8660_p12) target bundleno = 1335 (0x537), region = 112 }
 0x382   : > { %v8903_v38 = vld [vmem:[#allocation19 + $0x1c0] sm:$0xf] }
 0x383   : > { %v10229_v41 = vld [vmem:[#allocation19 + $0x1dc] sm:$0xf0] }
 0x384   : > { %v9159_v42 = vld [vmem:[#allocation19 + $0x3c0] sm:$0xf]  ;;  %v8904_v32 = vor.u32 %v10229_v41, %v8903_v38 }
 0x385   : > { %v10293_v45 = vld [vmem:[#allocation19 + $0x3dc] sm:$0xf0] }
 0x386   : > { %v9415_v37 = vld [vmem:[#allocation19 + $0x5c0] sm:$0xf]  ;;  %v9160_v54 = vor.u32 %v10293_v45, %v9159_v42  ;;  %6063 = vmatpush.bf16.msra.mxu0 %v8904_v32 }
 0x387   : > { %v10357_v44 = vld [vmem:[#allocation19 + $0x5dc] sm:$0xf0] }
 0x388   : > { %v9416_v50 = vor.u32 %v10357_v44, %v9415_v37  ;;  %v9671_v40 = vld [vmem:[#allocation19 + $0x7c0] sm:$0xf]  ;;  %6077 = vmatpush.bf16.msra.mxu1 %v9160_v54 }
 0x389   : > { %v10421_v43 = vld [vmem:[#allocation19 + $0x7dc] sm:$0xf0] }
 0x38a   : > { %v8871_v47 = vld [vmem:[#allocation19 + $0x180] sm:$0xf]  ;;  %v9672_v52 = vor.u32 %v10421_v43, %v9671_v40  ;;  %6091 = vmatpush.bf16.msra.mxu2 %v9416_v50 }
 0x38b   : > { %v10221_v0 = vld [vmem:[#allocation19 + $0x19c] sm:$0xf0] }
 0x38c   : > { %v9127_v46 = vld [vmem:[#allocation19 + $0x380] sm:$0xf]  ;;  %v8872_v51 = vor.u32 %v10221_v0, %v8871_v47  ;;  %6105 = vmatpush.bf16.msra.mxu3 %v9672_v52 }
 0x38d   : > { %v10285_v53 = vld [vmem:[#allocation19 + $0x39c] sm:$0xf0] }
 0x38e   : > { %v9128_v55 = vor.u32 %v10285_v53, %v9127_v46  ;;  %v9383_v59 = vld [vmem:[#allocation19 + $0x580] sm:$0xf]  ;;  %6064 = vmatpush.bf16.msra.mxu0 %v8872_v51 }
 0x38f   : > { %v10349_v60 = vld [vmem:[#allocation19 + $0x59c] sm:$0xf0] }
 0x390   : > { %v9639_v48 = vld [vmem:[#allocation19 + $0x780] sm:$0xf]  ;;  %v9384_v61 = vor.u32 %v10349_v60, %v9383_v59  ;;  %6078 = vmatpush.bf16.msra.mxu1 %v9128_v55 }
 0x391   : > { %v10413_v63 = vld [vmem:[#allocation19 + $0x79c] sm:$0xf0] }
 0x392   : > { %v8839_v9 = vld [vmem:[#allocation19 + $0x140] sm:$0xf]  ;;  %v9640_v10 = vor.u32 %v10413_v63, %v9639_v48  ;;  %6092 = vmatpush.bf16.msra.mxu2 %v9384_v61 }
 0x393   : > { %v10213_v49 = vld [vmem:[#allocation19 + $0x15c] sm:$0xf0] }
 0x394   : > { %v9095_v62 = vld [vmem:[#allocation19 + $0x340] sm:$0xf]  ;;  %v8840_v1 = vor.u32 %v10213_v49, %v8839_v9  ;;  %6106 = vmatpush.bf16.msra.mxu3 %v9640_v10 }
 0x395   : > { %v10277_v19 = vld [vmem:[#allocation19 + $0x35c] sm:$0xf0] }
 0x396   : > { %v9351_v26 = vld [vmem:[#allocation19 + $0x540] sm:$0xf]  ;;  %v9096_v6 = vor.u32 %v10277_v19, %v9095_v62  ;;  %6065 = vmatpush.bf16.msra.mxu0 %v8840_v1  ;;  %v8905_v1 = vld [vmem:[#allocation19 + $0x1e0] sm:$0xf0] }
 0x397   : > { %v10341_v2 = vld [vmem:[#allocation19 + $0x55c] sm:$0xf0] }
 0x398   : > { %v9607_v3 = vld [vmem:[#allocation19 + $0x740] sm:$0xf]  ;;  %v9352_v7 = vor.u32 %v10341_v2, %v9351_v26  ;;  %6079 = vmatpush.bf16.msra.mxu1 %v9096_v6  ;;  %v10225_v26 = vld [vmem:[#allocation19 + $0x1c4] sm:$0xf] }
 0x399   : > { %v10405_v15 = vld [vmem:[#allocation19 + $0x75c] sm:$0xf0]  ;;  %v10289_v2 = vld [vmem:[#allocation19 + $0x3c4] sm:$0xf] }
 0x39a   : > { %v8807_v5 = vld [vmem:[#allocation19 + $0x100] sm:$0xf]  ;;  %v9608_v17 = vor.u32 %v10405_v15, %v9607_v3  ;;  %6093 = vmatpush.bf16.msra.mxu2 %v9352_v7  ;;  %v9161_v15 = vld [vmem:[#allocation19 + $0x3e0] sm:$0xf0] }
 0x39b   : > { %v10205_v8 = vld [vmem:[#allocation19 + $0x11c] sm:$0xf0]  ;;  %v10353_v6 = vld [vmem:[#allocation19 + $0x5c4] sm:$0xf] }
 0x39c   : > { %v9063_v16 = vld [vmem:[#allocation19 + $0x300] sm:$0xf]  ;;  %v8808_v57 = vor.u32 %v10205_v8, %v8807_v5  ;;  %6107 = vmatpush.bf16.msra.mxu3 %v9608_v17  ;;  %v9417_v7 = vld [vmem:[#allocation19 + $0x5e0] sm:$0xf0] }
 0x39d   : > { %v10269_v20 = vld [vmem:[#allocation19 + $0x31c] sm:$0xf0]  ;;  %v9673_v17 = vld [vmem:[#allocation19 + $0x7e0] sm:$0xf0] }
 0x39e   : > { %v9319_v22 = vld [vmem:[#allocation19 + $0x500] sm:$0xf]  ;;  %v9064_v13 = vor.u32 %v10269_v20, %v9063_v16  ;;  %6066 = vmatpush.bf16.msra.mxu0 %v8808_v57  ;;  %v10417_v16 = vld [vmem:[#allocation19 + $0x7c4] sm:$0xf] }
 0x39f   : > { %v10333_v31 = vld [vmem:[#allocation19 + $0x51c] sm:$0xf0]  ;;  %v8873_v57 = vld [vmem:[#allocation19 + $0x1a0] sm:$0xf0] }
 0x3a0   : > { %v9575_v12 = vld [vmem:[#allocation19 + $0x700] sm:$0xf]  ;;  %v9320_v56 = vor.u32 %v10333_v31, %v9319_v22  ;;  %6080 = vmatpush.bf16.msra.mxu1 %v9064_v13  ;;  %v8908_v22 = vor.u32 %v10225_v26, %v8905_v1  ;;  %v9164_v31 = vor.u32 %v10289_v2, %v9161_v15  ;;  %v10281_v13 = vld [vmem:[#allocation19 + $0x384] sm:$0xf]  ;;  %v8665_v26 = vld [vmem:[#allocation4 + $0x10] sm:$0xf0] }
 0x3a1   : > { %v10397_v23 = vld [vmem:[#allocation19 + $0x71c] sm:$0xf0]  ;;  %v9033_v2 = vld [vmem:[#allocation19 + $0x2e0] sm:$0xf0] }
 0x3a2   : > { %v8775_v4 = vld [vmem:[#allocation19 + $0xc0] sm:$0xf]  ;;  %v9576_v30 = vor.u32 %v10397_v23, %v9575_v12  ;;  %6094 = vmatpush.bf16.msra.mxu2 %v9320_v56  ;;  %v9420_v12 = vor.u32 %v10353_v6, %v9417_v7  ;;  %v10217_v23 = vld [vmem:[#allocation19 + $0x184] sm:$0xf]  ;;  %v9676_v56 = vor.u32 %v10417_v16, %v9673_v17 }
 0x3a3   : > { %v10197_v21 = vld [vmem:[#allocation19 + $0xdc] sm:$0xf0]  ;;  %v9289_v15 = vld [vmem:[#allocation19 + $0x4e0] sm:$0xf0] }
 0x3a4   : > { %v9031_v25 = vld [vmem:[#allocation19 + $0x2c0] sm:$0xf]  ;;  %v8776_v39 = vor.u32 %v10197_v21, %v8775_v4  ;;  %6108 = vmatpush.bf16.msra.mxu3 %v9576_v30  ;;  %v9129_v4 = vld [vmem:[#allocation19 + $0x3a0] sm:$0xf0] }
 0x3a5   : > { %v10261_v27 = vld [vmem:[#allocation19 + $0x2dc] sm:$0xf0]  ;;  %v10345_v21 = vld [vmem:[#allocation19 + $0x584] sm:$0xf] }
 0x3a6   : > { %v9287_v28 = vld [vmem:[#allocation19 + $0x4c0] sm:$0xf]  ;;  %v9032_v11 = vor.u32 %v10261_v27, %v9031_v25  ;;  %6067 = vmatpush.bf16.msra.mxu0 %v8776_v39  ;;  %v9385_v25 = vld [vmem:[#allocation19 + $0x5a0] sm:$0xf0] }
 0x3a7   : > { %v10325_v24 = vld [vmem:[#allocation19 + $0x4dc] sm:$0xf0]  ;;  %v10409_v30 = vld [vmem:[#allocation19 + $0x784] sm:$0xf] }
 0x3a8   : > { %v9543_v29 = vld [vmem:[#allocation19 + $0x6c0] sm:$0xf]  ;;  %v9288_v14 = vor.u32 %v10325_v24, %v9287_v28  ;;  %6081 = vmatpush.bf16.msra.mxu1 %v9032_v11  ;;  %v9641_v27 = vld [vmem:[#allocation19 + $0x7a0] sm:$0xf0]  ;;  %v8876_v28 = vor.u32 %v10217_v23, %v8873_v57 }
 0x3a9   : > { %v10389_v18 = vld [vmem:[#allocation19 + $0x6dc] sm:$0xf0]  ;;  %v10209_v24 = vld [vmem:[#allocation19 + $0x144] sm:$0xf] }
 0x3aa   : > { %v8743_v36 = vld [vmem:[#allocation19 + $0x80] sm:$0xf]  ;;  %v9544_v35 = vor.u32 %v10389_v18, %v9543_v29  ;;  %6095 = vmatpush.bf16.msra.mxu2 %v9288_v14  ;;  %v9132_v29 = vor.u32 %v10281_v13, %v9129_v4  ;;  %v9388_v18 = vor.u32 %v10345_v21, %v9385_v25  ;;  %v8841_v39 = vld [vmem:[#allocation19 + $0x160] sm:$0xf0] }
 0x3ab   : > { %v10189_v33 = vld [vmem:[#allocation19 + $0x9c] sm:$0xf0]  ;;  %v10273_v11 = vld [vmem:[#allocation19 + $0x344] sm:$0xf] }
 0x3ac   : > { %v8999_v34 = vld [vmem:[#allocation19 + $0x280] sm:$0xf]  ;;  %v8744_v45 = vor.u32 %v10189_v33, %v8743_v36  ;;  %6109 = vmatpush.bf16.msra.mxu3 %v9544_v35  ;;  %v9097_v14 = vld [vmem:[#allocation19 + $0x360] sm:$0xf0]  ;;  %v9644_v36 = vor.u32 %v10409_v30, %v9641_v27 }
 0x3ad   : > { %v10253_v58 = vld [vmem:[#allocation19 + $0x29c] sm:$0xf0]  ;;  %v10337_v33 = vld [vmem:[#allocation19 + $0x544] sm:$0xf] }
 0x3ae   : > { %v9255_v38 = vld [vmem:[#allocation19 + $0x480] sm:$0xf]  ;;  %v9000_v37 = vor.u32 %v10253_v58, %v8999_v34  ;;  %6068 = vmatpush.bf16.msra.mxu0 %v8744_v45  ;;  %v9353_v34 = vld [vmem:[#allocation19 + $0x560] sm:$0xf0] }
 0x3af   : > { %v10317_v41 = vld [vmem:[#allocation19 + $0x49c] sm:$0xf0]  ;;  %v10401_v35 = vld [vmem:[#allocation19 + $0x744] sm:$0xf] }
 0x3b0   : > { %v9511_v42 = vld [vmem:[#allocation19 + $0x680] sm:$0xf]  ;;  %v9256_v44 = vor.u32 %v10317_v41, %v9255_v38  ;;  %6082 = vmatpush.bf16.msra.mxu1 %v9000_v37  ;;  %v9609_v58 = vld [vmem:[#allocation19 + $0x760] sm:$0xf0]  ;;  %v8671_v37 = vld [vmem:[#allocation4 + $0x8] sm:$0xf] }
 0x3b1   : > { %v10381_v32 = vld [vmem:[#allocation19 + $0x69c] sm:$0xf0]  ;;  %v10201_v38 = vld [vmem:[#allocation19 + $0x104] sm:$0xf] }
 0x3b2   : > { %v8711_v54 = vld [vmem:[#allocation19 + $0x40] sm:$0xf]  ;;  %v9512_v43 = vor.u32 %v10381_v32, %v9511_v42  ;;  %6096 = vmatpush.bf16.msra.mxu2 %v9256_v44  ;;  %v8809_v41 = vld [vmem:[#allocation19 + $0x120] sm:$0xf0]  ;;  %v8844_v42 = vor.u32 %v10209_v24, %v8841_v39  ;;  %v10168_v44 = vld [vmem:[#allocation4 + $0x14] sm:$0xf0] }
 0x3b3   : > { %v10181_v50 = vld [vmem:[#allocation19 + $0x5c] sm:$0xf0]  ;;  %v10265_v32 = vld [vmem:[#allocation19 + $0x304] sm:$0xf] }
 0x3b4   : > { %v8967_v40 = vld [vmem:[#allocation19 + $0x240] sm:$0xf]  ;;  %v8712_v51 = vor.u32 %v10181_v50, %v8711_v54  ;;  %6110 = vmatpush.bf16.msra.mxu3 %v9512_v43  ;;  %v9065_v45 = vld [vmem:[#allocation19 + $0x320] sm:$0xf0]  ;;  %v9100_v54 = vor.u32 %v10273_v11, %v9097_v14  ;;  %v9356_v50 = vor.u32 %v10337_v33, %v9353_v34  ;;  %v8663_v43 = vld [vmem:[#allocation4] sm:$0xf] }
 0x3b5   : > { %v10245_v47 = vld [vmem:[#allocation19 + $0x25c] sm:$0xf0]  ;;  %v10385_v7 = vld [vmem:[#allocation19 + $0x6c4] sm:$0xf] }
 0x3b6   : > { %v9223_v52 = vld [vmem:[#allocation19 + $0x440] sm:$0xf]  ;;  %v8968_v60 = vor.u32 %v10245_v47, %v8967_v40  ;;  %6069 = vmatpush.bf16.msra.mxu0 %v8712_v51  ;;  %v11491_v40 = vor.u32 %v10168_v44, %v8671_v37  ;;  %v10167_v47 = vld [vmem:[#allocation4 + $0xc] sm:$0xf0] }
 0x3b7   : > { %v10309_v0 = vld [vmem:[#allocation19 + $0x45c] sm:$0xf0]  ;;  %v11493_v51 = vor.u32 %v10167_v47, %v8663_v43  ;;  %v9001_v23 = vld [vmem:[#allocation19 + $0x2a0] sm:$0xf0]  ;;  %v10230_v43 = vld [vmem:[#allocation19 + $0x1e4] sm:$0xf0] }
 0x3b8   : > { %v9479_v46 = vld [vmem:[#allocation19 + $0x640] sm:$0xf]  ;;  %v9224_v48 = vor.u32 %v10309_v0, %v9223_v52  ;;  %6083 = vmatpush.bf16.msra.mxu1 %v8968_v60  ;;  %v9612_v0 = vor.u32 %v10401_v35, %v9609_v58  ;;  %v9577_v60 = vld [vmem:[#allocation19 + $0x720] sm:$0xf0]  ;;  %v9167_v47 = vld [vmem:[#allocation19 + $0x3c8] sm:$0xf] }
 0x3b9   : > { %v10373_v53 = vld [vmem:[#allocation19 + $0x65c] sm:$0xf0]  ;;  %v10313_v57 = vld [vmem:[#allocation19 + $0x484] sm:$0xf] }
 0x3ba   : > { %v8679_v55 = vld [vmem:[#allocation19] sm:$0xf]  ;;  %v9480_v49 = vor.u32 %v10373_v53, %v9479_v46  ;;  %6097 = vmatpush.bf16.msra.mxu2 %v9224_v48  ;;  %v10329_v46 = vld [vmem:[#allocation19 + $0x504] sm:$0xf] }
 0x3bb   : > { %v10173_v59 = vld [vmem:[#allocation19 + $0x1c] sm:$0xf0]  ;;  %v9321_v53 = vld [vmem:[#allocation19 + $0x520] sm:$0xf0] }
 0x3bc   : > { %v8935_v61 = vld [vmem:[#allocation19 + $0x200] sm:$0xf]  ;;  %v8680_v3 = vor.u32 %v10173_v59, %v8679_v55  ;;  %6111 = vmatpush.bf16.msra.mxu3 %v9480_v49  ;;  %v8673_v55 = vld [vmem:[#allocation4 + $0x18] sm:$0xf0]  ;;  %v10393_v59 = vld [vmem:[#allocation19 + $0x704] sm:$0xf]  ;;  %v9068_v49 = vor.u32 %v10265_v32, %v9065_v45 }
 0x3bd   : > { %v10237_v63 = vld [vmem:[#allocation19 + $0x21c] sm:$0xf0]  ;;  %v9580_v1 = vor.u32 %v10393_v59, %v9577_v60  ;;  %v9257_v13 = vld [vmem:[#allocation19 + $0x4a0] sm:$0xf0]  ;;  %v9679_v60 = vld [vmem:[#allocation19 + $0x7c8] sm:$0xf] }
 0x3be   : > { %v9191_v9 = vld [vmem:[#allocation19 + $0x400] sm:$0xf]  ;;  %v8936_v5 = vor.u32 %v10237_v63, %v8935_v61  ;;  %6070 = vmatpush.bf16.msra.mxu0 %v8680_v3  ;;  %v8812_v61 = vor.u32 %v10201_v38, %v8809_v41  ;;  %v10193_v63 = vld [vmem:[#allocation19 + $0xc4] sm:$0xf]  ;;  %v9260_v30 = vor.u32 %v10313_v57, %v9257_v13  ;;  %v9359_v57 = vld [vmem:[#allocation19 + $0x548] sm:$0xf] }
 0x3bf   : > { %v10301_v10 = vld [vmem:[#allocation19 + $0x41c] sm:$0xf0]  ;;  %v10321_v3 = vld [vmem:[#allocation19 + $0x4c4] sm:$0xf]  ;;  %v10342_v13 = vld [vmem:[#allocation19 + $0x564] sm:$0xf0] }
 0x3c0   : > { %v9447_v62 = vld [vmem:[#allocation19 + $0x600] sm:$0xf]  ;;  %v9192_v8 = vor.u32 %v10301_v10, %v9191_v9  ;;  %6084 = vmatpush.bf16.msra.mxu1 %v8936_v5  ;;  %v8777_v9 = vld [vmem:[#allocation19 + $0xe0] sm:$0xf0]  ;;  %v9324_v10 = vor.u32 %v10329_v46, %v9321_v53  ;;  %v9292_v17 = vor.u32 %v10321_v3, %v9289_v15  ;;  %v9423_v46 = vld [vmem:[#allocation19 + $0x5c8] sm:$0xf] }
 0x3c1   : > { %v10365_v19 = vld [vmem:[#allocation19 + $0x61c] sm:$0xf0]  ;;  %6071 = vmatmul.bf16.vlgmr.msra.gmra.mxu0 %v11493_v51  ;;  %v9545_v5 = vld [vmem:[#allocation19 + $0x6e0] sm:$0xf0]  ;;  %v10358_v53 = vld [vmem:[#allocation19 + $0x5e4] sm:$0xf0] }
 0x3c2   : > { %v9448_v20 = vor.u32 %v10365_v19, %v9447_v62  ;;  %6098 = vmatpush.bf16.msra.mxu2 %v9192_v8  ;;  %6119 = vmatpush.bf16.msrb.mxu0 %v8908_v22  ;;  %v10166_v52 = vld [vmem:[#allocation4 + $0xc] sm:$0xf]  ;;  %v10257_v62 = vld [vmem:[#allocation19 + $0x2c4] sm:$0xf]  ;;  %v10165_v19 = vld [vmem:[#allocation4 + $0x4] sm:$0xf]  ;;  %v8780_v8 = vor.u32 %v10193_v63, %v8777_v9 }
 0x3c3   : > { %v11496_v48 = vor.u32 %v10166_v52, %v8673_v55  ;;  %v11499_v6 = vor.u32 %v10165_v19, %v8665_v26  ;;  %v9036_v16 = vor.u32 %v10257_v62, %v9033_v2  ;;  %v8745_v22 = vld [vmem:[#allocation19 + $0xa0] sm:$0xf0]  ;;  %v8879_v62 = vld [vmem:[#allocation19 + $0x188] sm:$0xf] }
 0x3c4   : > { %6112 = vmatpush.bf16.msra.mxu3 %v9448_v20  ;;  %6133 = vmatpush.bf16.msrb.mxu1 %v9164_v31  ;;  %v10185_v20 = vld [vmem:[#allocation19 + $0x84] sm:$0xf]  ;;  %v10222_v19 = vld [vmem:[#allocation19 + $0x1a4] sm:$0xf0] }
 0x3c5   : > { %6099 = vmatmul.bf16.vlgmr.msra.gmra.mxu2 %v11491_v40  ;;  %6085 = vmatmul.bf16.vlgmr.msra.gmra.mxu1 %v11499_v6  ;;  %v10249_v31 = vld [vmem:[#allocation19 + $0x284] sm:$0xf]  ;;  %v8748_v21 = vor.u32 %v10185_v20, %v8745_v22  ;;  %v9135_v26 = vld [vmem:[#allocation19 + $0x388] sm:$0xf] }
 0x3c6   : > { %6147 = vmatpush.bf16.msrb.mxu2 %v9420_v12  ;;  %6120 = vmatpush.bf16.msrb.mxu0 %v8876_v28  ;;  %v9548_v12 = vor.u32 %v10385_v7, %v9545_v5  ;;  %v9513_v4 = vld [vmem:[#allocation19 + $0x6a0] sm:$0xf0]  ;;  %v9004_v25 = vor.u32 %v10249_v31, %v9001_v23  ;;  %v10286_v2 = vld [vmem:[#allocation19 + $0x3a4] sm:$0xf0] }
 0x3c7   : > { %6113 = vmatmul.bf16.vlgmr.msra.gmra.mxu3 %v11496_v48  ;;  %v10177_v27 = vld [vmem:[#allocation19 + $0x44] sm:$0xf]  ;;  %v9391_v3 = vld [vmem:[#allocation19 + $0x588] sm:$0xf] }
 0x3c8   : > { %6161 = vmatpush.bf16.msrb.mxu3 %v9676_v56  ;;  %6134 = vmatpush.bf16.msrb.mxu1 %v9132_v29  ;;  %v10377_v56 = vld [vmem:[#allocation19 + $0x684] sm:$0xf]  ;;  %v10350_v15 = vld [vmem:[#allocation19 + $0x5a4] sm:$0xf0] }
 0x3c9   : > { %v8713_v28 = vld [vmem:[#allocation19 + $0x60] sm:$0xf0]  ;;  %v9516_v29 = vor.u32 %v10377_v56, %v9513_v4  ;;  %v9647_v7 = vld [vmem:[#allocation19 + $0x788] sm:$0xf] }
 0x3ca   : > { %6148 = vmatpush.bf16.msrb.mxu2 %v9388_v18  ;;  %6121 = vmatpush.bf16.msrb.mxu0 %v8844_v42  ;;  %v10241_v24 = vld [vmem:[#allocation19 + $0x244] sm:$0xf]  ;;  %v8716_v33 = vor.u32 %v10177_v27, %v8713_v28  ;;  %v10414_v5 = vld [vmem:[#allocation19 + $0x7a4] sm:$0xf0] }
 0x3cb   : > { %v8969_v18 = vld [vmem:[#allocation19 + $0x260] sm:$0xf0]  ;;  %v8847_v20 = vld [vmem:[#allocation19 + $0x148] sm:$0xf] }
 0x3cc   : > { %6162 = vmatpush.bf16.msrb.mxu3 %v9644_v36  ;;  %6135 = vmatpush.bf16.msrb.mxu1 %v9100_v54  ;;  %v10305_v39 = vld [vmem:[#allocation19 + $0x444] sm:$0xf]  ;;  %v8972_v58 = vor.u32 %v10241_v24, %v8969_v18  ;;  %v10214_v22 = vld [vmem:[#allocation19 + $0x164] sm:$0xf0] }
 0x3cd   : > { %v9225_v11 = vld [vmem:[#allocation19 + $0x460] sm:$0xf0]  ;;  %v9103_v31 = vld [vmem:[#allocation19 + $0x348] sm:$0xf] }
 0x3ce   : > { %6149 = vmatpush.bf16.msrb.mxu2 %v9356_v50  ;;  %6122 = vmatpush.bf16.msrb.mxu0 %v8812_v61  ;;  %v10369_v14 = vld [vmem:[#allocation19 + $0x644] sm:$0xf]  ;;  %v9228_v38 = vor.u32 %v10305_v39, %v9225_v11  ;;  %v8911_v50 = vld [vmem:[#allocation19 + $0x1c8] sm:$0xf] }
 0x3cf   : > { %v9481_v36 = vld [vmem:[#allocation19 + $0x660] sm:$0xf0]  ;;  %v10422_v61 = vld [vmem:[#allocation19 + $0x7e4] sm:$0xf0]  ;;  %v8912_v9 = vor.u32 %v10230_v43, %v8911_v50 }
 0x3d0   : > { %6163 = vmatpush.bf16.msrb.mxu3 %v9612_v0  ;;  %6136 = vmatpush.bf16.msrb.mxu1 %v9068_v49  ;;  %v10169_v34 = vld [vmem:[#allocation19 + $0x4] sm:$0xf]  ;;  %v9484_v45 = vor.u32 %v10369_v14, %v9481_v36  ;;  %v10294_v0 = vld [vmem:[#allocation19 + $0x3e4] sm:$0xf0] }
 0x3d1   : > { %v8681_v35 = vld [vmem:[#allocation19 + $0x20] sm:$0xf0]  ;;  %v9168_v49 = vor.u32 %v10294_v0, %v9167_v47  ;;  %v10278_v23 = vld [vmem:[#allocation19 + $0x364] sm:$0xf0] }
 0x3d2   : > { %6150 = vmatpush.bf16.msrb.mxu2 %v9324_v10  ;;  %6123 = vmatpush.bf16.msrb.mxu0 %v8780_v8  ;;  %v10233_v41 = vld [vmem:[#allocation19 + $0x204] sm:$0xf]  ;;  %v8684_v52 = vor.u32 %v10169_v34, %v8681_v35  ;;  %v9424_v10 = vor.u32 %v10358_v53, %v9423_v46  ;;  %v8880_v8 = vor.u32 %v10222_v19, %v8879_v62  ;;  %v9615_v56 = vld [vmem:[#allocation19 + $0x748] sm:$0xf] }
 0x3d3   : > { %v8937_v42 = vld [vmem:[#allocation19 + $0x220] sm:$0xf0]  ;;  %v10406_v4 = vld [vmem:[#allocation19 + $0x764] sm:$0xf0] }
 0x3d4   : > { %6164 = vmatpush.bf16.msrb.mxu3 %v9580_v1  ;;  %6137 = vmatpush.bf16.msrb.mxu1 %v9036_v16  ;;  %v10297_v32 = vld [vmem:[#allocation19 + $0x404] sm:$0xf]  ;;  %v8940_v55 = vor.u32 %v10233_v41, %v8937_v42  ;;  %v9680_v1 = vor.u32 %v10422_v61, %v9679_v60  ;;  %v9136_v16 = vor.u32 %v10286_v2, %v9135_v26  ;;  %v8815_v27 = vld [vmem:[#allocation19 + $0x108] sm:$0xf] }
 0x3d5   : > { %v9193_v37 = vld [vmem:[#allocation19 + $0x420] sm:$0xf0]  ;;  %v10206_v28 = vld [vmem:[#allocation19 + $0x124] sm:$0xf0] }
 0x3d6   : > { %6151 = vmatpush.bf16.msrb.mxu2 %v9292_v17  ;;  %6124 = vmatpush.bf16.msrb.mxu0 %v8748_v21  ;;  %v10361_v44 = vld [vmem:[#allocation19 + $0x604] sm:$0xf]  ;;  %v9196_v59 = vor.u32 %v10297_v32, %v9193_v37  ;;  %v9392_v17 = vor.u32 %v10350_v15, %v9391_v3  ;;  %v8848_v21 = vor.u32 %v10214_v22, %v8847_v20  ;;  %v9071_v24 = vld [vmem:[#allocation19 + $0x308] sm:$0xf] }
 0x3d7   : > { %v9449_v54 = vld [vmem:[#allocation19 + $0x620] sm:$0xf0]  ;;  %v10270_v18 = vld [vmem:[#allocation19 + $0x324] sm:$0xf0] }
 0x3d8   : > { %6165 = vmatpush.bf16.msrb.mxu3 %v9548_v12  ;;  %6138 = vmatpush.bf16.msrb.mxu1 %v9004_v25  ;;  %v9452_v63 = vor.u32 %v10361_v44, %v9449_v54  ;;  %v9648_v12 = vor.u32 %v10414_v5, %v9647_v7  ;;  %v9104_v25 = vor.u32 %v10278_v23, %v9103_v31  ;;  %v9327_v39 = vld [vmem:[#allocation19 + $0x508] sm:$0xf] }
 0x3d9   : > { %v10334_v11 = vld [vmem:[#allocation19 + $0x524] sm:$0xf0]  ;;  %v9072_v34 = vor.u32 %v10270_v18, %v9071_v24  ;;  %v10354_v24 = vld [vmem:[#allocation19 + $0x5cc] sm:$0xf] }
 0x3da   : > { %6152 = vmatpush.bf16.msrb.mxu2 %v9260_v30  ;;  %6125 = vmatpush.bf16.msrb.mxu0 %v8716_v33  ;;  %v9360_v30 = vor.u32 %v10342_v13, %v9359_v57  ;;  %v9583_v14 = vld [vmem:[#allocation19 + $0x708] sm:$0xf]  ;;  %v8816_v33 = vor.u32 %v10206_v28, %v8815_v27  ;;  %v9328_v35 = vor.u32 %v10334_v11, %v9327_v39  ;;  %v9169_v28 = vld [vmem:[#allocation19 + $0x3e8] sm:$0xf0] }
 0x3db   : > { %v10398_v36 = vld [vmem:[#allocation19 + $0x724] sm:$0xf0]  ;;  %v10418_v11 = vld [vmem:[#allocation19 + $0x7cc] sm:$0xf] }
 0x3dc   : > { %6166 = vmatpush.bf16.msrb.mxu3 %v9516_v29  ;;  %6139 = vmatpush.bf16.msrb.mxu1 %v8972_v58  ;;  %v9616_v29 = vor.u32 %v10406_v4, %v9615_v56  ;;  %v8783_v58 = vld [vmem:[#allocation19 + $0xc8] sm:$0xf]  ;;  %v9584_v42 = vor.u32 %v10398_v36, %v9583_v14  ;;  %v9681_v14 = vld [vmem:[#allocation19 + $0x7e8] sm:$0xf0] }
 0x3dd   : > { %v9039_v41 = vld [vmem:[#allocation19 + $0x2c8] sm:$0xf] }
 0x3de   : > { %6153 = vmatpush.bf16.msrb.mxu2 %v9228_v38  ;;  %6126 = vmatpush.bf16.msrb.mxu0 %v8684_v52  ;;  %v10198_v38 = vld [vmem:[#allocation19 + $0xe4] sm:$0xf0] }
 0x3df   : > { %v10262_v32 = vld [vmem:[#allocation19 + $0x2e4] sm:$0xf0]  ;;  %v8784_v50 = vor.u32 %v10198_v38, %v8783_v58  ;;  %v10218_v58 = vld [vmem:[#allocation19 + $0x18c] sm:$0xf] }
 0x3e0   : > { %6167 = vmatpush.bf16.msrb.mxu3 %v9484_v45  ;;  %6140 = vmatpush.bf16.msrb.mxu1 %v8940_v55  ;;  %v9295_v45 = vld [vmem:[#allocation19 + $0x4c8] sm:$0xf]  ;;  %v9040_v43 = vor.u32 %v10262_v32, %v9039_v41  ;;  %v8881_v38 = vld [vmem:[#allocation19 + $0x1a8] sm:$0xf0] }
 0x3e1   : > { %6127 = vmatmul.bf16.vlgmr.msrb.gmra.mxu0 %v11493_v51  ;;  %v10326_v37 = vld [vmem:[#allocation19 + $0x4e4] sm:$0xf0]  ;;  %v10282_v41 = vld [vmem:[#allocation19 + $0x38c] sm:$0xf] }
 0x3e2   : > { %6154 = vmatpush.bf16.msrb.mxu2 %v9196_v59  ;;  %6175 = vmatpush.bf16.msra.mxu0 %v8912_v9  ;;  %v9551_v44 = vld [vmem:[#allocation19 + $0x6c8] sm:$0xf]  ;;  %v9296_v47 = vor.u32 %v10326_v37, %v9295_v45  ;;  %v9137_v32 = vld [vmem:[#allocation19 + $0x3a8] sm:$0xf0] }
 0x3e3   : > { %6141 = vmatmul.bf16.vlgmr.msrb.gmra.mxu1 %v11499_v6  ;;  %v10390_v54 = vld [vmem:[#allocation19 + $0x6e4] sm:$0xf0]  ;;  %v10346_v45 = vld [vmem:[#allocation19 + $0x58c] sm:$0xf] }
 0x3e4   : > { %6168 = vmatpush.bf16.msrb.mxu3 %v9452_v63  ;;  %6189 = vmatpush.bf16.msra.mxu1 %v9168_v49  ;;  %v8751_v52 = vld [vmem:[#allocation19 + $0x88] sm:$0xf]  ;;  %v9552_v53 = vor.u32 %v10390_v54, %v9551_v44  ;;  %v9393_v37 = vld [vmem:[#allocation19 + $0x5a8] sm:$0xf0] }
 0x3e5   : > { %6155 = vmatmul.bf16.vlgmr.msrb.gmra.mxu2 %v11491_v40  ;;  %v10190_v0 = vld [vmem:[#allocation19 + $0xa4] sm:$0xf0]  ;;  %v10410_v44 = vld [vmem:[#allocation19 + $0x78c] sm:$0xf] }
 0x3e6   : > { %6203 = vmatpush.bf16.msra.mxu2 %v9424_v10  ;;  %6176 = vmatpush.bf16.msra.mxu0 %v8880_v8  ;;  %v9007_v46 = vld [vmem:[#allocation19 + $0x288] sm:$0xf]  ;;  %v8752_v9 = vor.u32 %v10190_v0, %v8751_v52  ;;  %v9649_v54 = vld [vmem:[#allocation19 + $0x7a8] sm:$0xf0] }
 0x3e7   : > { %6169 = vmatmul.bf16.vlgmr.msrb.gmra.mxu3 %v11496_v48  ;;  %v10254_v55 = vld [vmem:[#allocation19 + $0x2a4] sm:$0xf0]  ;;  %v10210_v52 = vld [vmem:[#allocation19 + $0x14c] sm:$0xf] }
 0x3e8   : > { %6217 = vmatpush.bf16.msra.mxu3 %v9680_v1  ;;  %6190 = vmatpush.bf16.msra.mxu1 %v9136_v16  ;;  %v9263_v59 = vld [vmem:[#allocation19 + $0x488] sm:$0xf]  ;;  %v9008_v49 = vor.u32 %v10254_v55, %v9007_v46  ;;  %v8849_v0 = vld [vmem:[#allocation19 + $0x168] sm:$0xf0] }
 0x3e9   : > { %v10318_v60 = vld [vmem:[#allocation19 + $0x4a4] sm:$0xf0]  ;;  %v10274_v46 = vld [vmem:[#allocation19 + $0x34c] sm:$0xf] }
 0x3ea   : > { %6204 = vmatpush.bf16.msra.mxu2 %v9392_v17  ;;  %6177 = vmatpush.bf16.msra.mxu0 %v8848_v21  ;;  %v9519_v61 = vld [vmem:[#allocation19 + $0x688] sm:$0xf]  ;;  %v9264_v10 = vor.u32 %v10318_v60, %v9263_v59  ;;  %v10226_v21 = vld [vmem:[#allocation19 + $0x1cc] sm:$0xf] }
 0x3eb   : > { %v10382_v63 = vld [vmem:[#allocation19 + $0x6a4] sm:$0xf0]  ;;  %v9105_v55 = vld [vmem:[#allocation19 + $0x368] sm:$0xf0] }
 0x3ec   : > { %6218 = vmatpush.bf16.msra.mxu3 %v9648_v12  ;;  %6191 = vmatpush.bf16.msra.mxu1 %v9104_v25  ;;  %v8719_v62 = vld [vmem:[#allocation19 + $0x48] sm:$0xf]  ;;  %v9520_v1 = vor.u32 %v10382_v63, %v9519_v61  ;;  %v8913_v25 = vld [vmem:[#allocation19 + $0x1e8] sm:$0xf0] }
 0x3ed   : > { %v10182_v19 = vld [vmem:[#allocation19 + $0x64] sm:$0xf0]  ;;  %v10338_v59 = vld [vmem:[#allocation19 + $0x54c] sm:$0xf] }
 0x3ee   : > { %6205 = vmatpush.bf16.msra.mxu2 %v9360_v30  ;;  %6178 = vmatpush.bf16.msra.mxu0 %v8816_v33  ;;  %v8975_v26 = vld [vmem:[#allocation19 + $0x248] sm:$0xf]  ;;  %v8720_v8 = vor.u32 %v10182_v19, %v8719_v62  ;;  %v10290_v30 = vld [vmem:[#allocation19 + $0x3cc] sm:$0xf]  ;;  %v8916_v33 = vor.u32 %v10226_v21, %v8913_v25 }
 0x3ef   : > { %v10246_v2 = vld [vmem:[#allocation19 + $0x264] sm:$0xf0]  ;;  %v9361_v60 = vld [vmem:[#allocation19 + $0x568] sm:$0xf0] }
 0x3f0   : > { %6219 = vmatpush.bf16.msra.mxu3 %v9616_v29  ;;  %6192 = vmatpush.bf16.msra.mxu1 %v9072_v34  ;;  %v9231_v3 = vld [vmem:[#allocation19 + $0x448] sm:$0xf]  ;;  %v8976_v20 = vor.u32 %v10246_v2, %v8975_v26  ;;  %v9425_v29 = vld [vmem:[#allocation19 + $0x5e8] sm:$0xf0]  ;;  %v9172_v34 = vor.u32 %v10290_v30, %v9169_v28 }
 0x3f1   : > { %v10310_v15 = vld [vmem:[#allocation19 + $0x464] sm:$0xf0]  ;;  %v10402_v61 = vld [vmem:[#allocation19 + $0x74c] sm:$0xf] }
 0x3f2   : > { %6206 = vmatpush.bf16.msra.mxu2 %v9328_v35  ;;  %6179 = vmatpush.bf16.msra.mxu0 %v8784_v50  ;;  %v9487_v7 = vld [vmem:[#allocation19 + $0x648] sm:$0xf]  ;;  %v9232_v22 = vor.u32 %v10310_v15, %v9231_v3  ;;  %v9428_v35 = vor.u32 %v10354_v24, %v9425_v29  ;;  %v8884_v50 = vor.u32 %v10218_v58, %v8881_v38  ;;  %v9617_v63 = vld [vmem:[#allocation19 + $0x768] sm:$0xf0] }
 0x3f3   : > { %v10374_v5 = vld [vmem:[#allocation19 + $0x664] sm:$0xf0]  ;;  %v10202_v62 = vld [vmem:[#allocation19 + $0x10c] sm:$0xf] }
 0x3f4   : > { %6220 = vmatpush.bf16.msra.mxu3 %v9584_v42  ;;  %6193 = vmatpush.bf16.msra.mxu1 %v9040_v43  ;;  %v8687_v16 = vld [vmem:[#allocation19 + $0x8] sm:$0xf]  ;;  %v9488_v57 = vor.u32 %v10374_v5, %v9487_v7  ;;  %v9684_v42 = vor.u32 %v10418_v11, %v9681_v14  ;;  %v9140_v43 = vor.u32 %v10282_v41, %v9137_v32  ;;  %v8817_v19 = vld [vmem:[#allocation19 + $0x128] sm:$0xf0] }
 0x3f5   : > { %v10174_v17 = vld [vmem:[#allocation19 + $0x24] sm:$0xf0]  ;;  %v10266_v26 = vld [vmem:[#allocation19 + $0x30c] sm:$0xf] }
 0x3f6   : > { %6207 = vmatpush.bf16.msra.mxu2 %v9296_v47  ;;  %6180 = vmatpush.bf16.msra.mxu0 %v8752_v9  ;;  %v8943_v31 = vld [vmem:[#allocation19 + $0x208] sm:$0xf]  ;;  %v8688_v27 = vor.u32 %v10174_v17, %v8687_v16  ;;  %v9396_v47 = vor.u32 %v10346_v45, %v9393_v37  ;;  %v8852_v9 = vor.u32 %v10210_v52, %v8849_v0  ;;  %v9073_v2 = vld [vmem:[#allocation19 + $0x328] sm:$0xf0] }
 0x3f7   : > { %v10238_v12 = vld [vmem:[#allocation19 + $0x224] sm:$0xf0]  ;;  %v10330_v3 = vld [vmem:[#allocation19 + $0x50c] sm:$0xf]  ;;  %v9076_v16 = vor.u32 %v10266_v26, %v9073_v2  ;;  %v9431_v26 = vld [vmem:[#allocation19 + $0x5d0] sm:$0xf] }
 0x3f8   : > { %6221 = vmatpush.bf16.msra.mxu3 %v9552_v53  ;;  %6194 = vmatpush.bf16.msra.mxu1 %v9008_v49  ;;  %v9199_v23 = vld [vmem:[#allocation19 + $0x408] sm:$0xf]  ;;  %v8944_v18 = vor.u32 %v10238_v12, %v8943_v31  ;;  %v9652_v53 = vor.u32 %v10410_v44, %v9649_v54  ;;  %v9108_v49 = vor.u32 %v10274_v46, %v9105_v55  ;;  %v9329_v15 = vld [vmem:[#allocation19 + $0x528] sm:$0xf0] }
 0x3f9   : > { %v10302_v13 = vld [vmem:[#allocation19 + $0x424] sm:$0xf0]  ;;  %v10394_v7 = vld [vmem:[#allocation19 + $0x70c] sm:$0xf]  ;;  %v9332_v17 = vor.u32 %v10330_v3, %v9329_v15  ;;  %v9687_v15 = vld [vmem:[#allocation19 + $0x7d0] sm:$0xf] }
 0x3fa   : > { %6208 = vmatpush.bf16.msra.mxu2 %v9264_v10  ;;  %v9455_v56 = vld [vmem:[#allocation19 + $0x608] sm:$0xf]  ;;  %6181 = vmatpush.bf16.msra.mxu0 %v8720_v8  ;;  %v9200_v39 = vor.u32 %v10302_v13, %v9199_v23  ;;  %v9364_v10 = vor.u32 %v10338_v59, %v9361_v60  ;;  %v9585_v5 = vld [vmem:[#allocation19 + $0x728] sm:$0xf0]  ;;  %v8820_v8 = vor.u32 %v10202_v62, %v8817_v19  ;;  %v10295_v19 = vld [vmem:[#allocation19 + $0x3ec] sm:$0xf0] }
 0x3fb   : > { %v10366_v4 = vld [vmem:[#allocation19 + $0x624] sm:$0xf0]  ;;  %v10258_v31 = vld [vmem:[#allocation19 + $0x2cc] sm:$0xf]  ;;  %v9588_v12 = vor.u32 %v10394_v7, %v9585_v5  ;;  %v10423_v7 = vld [vmem:[#allocation19 + $0x7ec] sm:$0xf0] }
 0x3fc   : > { %6222 = vmatpush.bf16.msra.mxu3 %v9520_v1  ;;  %6195 = vmatpush.bf16.msra.mxu1 %v8976_v20  ;;  %v9456_v36 = vor.u32 %v10366_v4, %v9455_v56  ;;  %v9620_v1 = vor.u32 %v10402_v61, %v9617_v63  ;;  %v10194_v20 = vld [vmem:[#allocation19 + $0xcc] sm:$0xf] }
 0x3fd   : > { %v9041_v23 = vld [vmem:[#allocation19 + $0x2e8] sm:$0xf0] }
 0x3fe   : > { %6209 = vmatpush.bf16.msra.mxu2 %v9232_v22  ;;  %6182 = vmatpush.bf16.msra.mxu0 %v8688_v27  ;;  %v8785_v22 = vld [vmem:[#allocation19 + $0xe8] sm:$0xf0]  ;;  %v9044_v25 = vor.u32 %v10258_v31, %v9041_v23  ;;  %v9143_v31 = vld [vmem:[#allocation19 + $0x390] sm:$0xf] }
 0x3ff   : > { %v9297_v13 = vld [vmem:[#allocation19 + $0x4e8] sm:$0xf0]  ;;  %v8788_v21 = vor.u32 %v10194_v20, %v8785_v22  ;;  %v8887_v20 = vld [vmem:[#allocation19 + $0x190] sm:$0xf] }
 0x400   : > { %6223 = vmatpush.bf16.msra.mxu3 %v9488_v57  ;;  %6196 = vmatpush.bf16.msra.mxu1 %v8944_v18  ;;  %v10322_v57 = vld [vmem:[#allocation19 + $0x4cc] sm:$0xf]  ;;  %v10223_v22 = vld [vmem:[#allocation19 + $0x1ac] sm:$0xf0] }
 0x401   : > { %6183 = vmatmul.bf16.vlgmr.msra.gmra.mxu0 %v11493_v51  ;;  %v10386_v56 = vld [vmem:[#allocation19 + $0x6cc] sm:$0xf]  ;;  %v9300_v30 = vor.u32 %v10322_v57, %v9297_v13  ;;  %v10287_v23 = vld [vmem:[#allocation19 + $0x3ac] sm:$0xf0] }
 0x402   : > { %6210 = vmatpush.bf16.msra.mxu2 %v9200_v39  ;;  %6231 = vmatpush.bf16.msrb.mxu0 %v8916_v33  ;;  %v9553_v4 = vld [vmem:[#allocation19 + $0x6e8] sm:$0xf0]  ;;  %v9399_v57 = vld [vmem:[#allocation19 + $0x590] sm:$0xf] }
 0x403   : > { %6197 = vmatmul.bf16.vlgmr.msra.gmra.mxu1 %v11499_v6  ;;  %v10186_v27 = vld [vmem:[#allocation19 + $0x8c] sm:$0xf]  ;;  %v9556_v29 = vor.u32 %v10386_v56, %v9553_v4  ;;  %v10351_v13 = vld [vmem:[#allocation19 + $0x5ac] sm:$0xf0] }
 0x404   : > { %6224 = vmatpush.bf16.msra.mxu3 %v9456_v36  ;;  %6245 = vmatpush.bf16.msrb.mxu1 %v9172_v34  ;;  %v8753_v28 = vld [vmem:[#allocation19 + $0xa8] sm:$0xf0]  ;;  %v9655_v56 = vld [vmem:[#allocation19 + $0x790] sm:$0xf] }
 0x405   : > { %6211 = vmatmul.bf16.vlgmr.msra.gmra.mxu2 %v11491_v40  ;;  %v10250_v24 = vld [vmem:[#allocation19 + $0x28c] sm:$0xf]  ;;  %v8756_v33 = vor.u32 %v10186_v27, %v8753_v28  ;;  %v10415_v4 = vld [vmem:[#allocation19 + $0x7ac] sm:$0xf0] }
 0x406   : > { %6259 = vmatpush.bf16.msrb.mxu2 %v9428_v35  ;;  %6232 = vmatpush.bf16.msrb.mxu0 %v8884_v50  ;;  %v9009_v18 = vld [vmem:[#allocation19 + $0x2a8] sm:$0xf0]  ;;  %v8855_v27 = vld [vmem:[#allocation19 + $0x150] sm:$0xf] }
 0x407   : > { %6225 = vmatmul.bf16.vlgmr.msra.gmra.mxu3 %v11496_v48  ;;  %v10314_v39 = vld [vmem:[#allocation19 + $0x48c] sm:$0xf]  ;;  %v9012_v34 = vor.u32 %v10250_v24, %v9009_v18  ;;  %v10215_v28 = vld [vmem:[#allocation19 + $0x16c] sm:$0xf0] }
 0x408   : > { %6273 = vmatpush.bf16.msrb.mxu3 %v9684_v42  ;;  %6246 = vmatpush.bf16.msrb.mxu1 %v9140_v43  ;;  %v9265_v11 = vld [vmem:[#allocation19 + $0x4a8] sm:$0xf0]  ;;  %v9111_v24 = vld [vmem:[#allocation19 + $0x350] sm:$0xf] }
 0x409   : > { %v10378_v14 = vld [vmem:[#allocation19 + $0x68c] sm:$0xf]  ;;  %v9268_v35 = vor.u32 %v10314_v39, %v9265_v11  ;;  %v10279_v18 = vld [vmem:[#allocation19 + $0x36c] sm:$0xf0] }
 0x40a   : > { %6260 = vmatpush.bf16.msrb.mxu2 %v9396_v47  ;;  %6233 = vmatpush.bf16.msrb.mxu0 %v8852_v9  ;;  %v9521_v36 = vld [vmem:[#allocation19 + $0x6a8] sm:$0xf0]  ;;  %v8919_v9 = vld [vmem:[#allocation19 + $0x1d0] sm:$0xf] }
 0x40b   : > { %v10178_v58 = vld [vmem:[#allocation19 + $0x4c] sm:$0xf]  ;;  %v9524_v42 = vor.u32 %v10378_v14, %v9521_v36  ;;  %v9367_v39 = vld [vmem:[#allocation19 + $0x550] sm:$0xf] }
 0x40c   : > { %6274 = vmatpush.bf16.msrb.mxu3 %v9652_v53  ;;  %6247 = vmatpush.bf16.msrb.mxu1 %v9108_v49  ;;  %v8721_v38 = vld [vmem:[#allocation19 + $0x68] sm:$0xf0]  ;;  %v10231_v49 = vld [vmem:[#allocation19 + $0x1ec] sm:$0xf0] }
 0x40d   : > { %v10242_v41 = vld [vmem:[#allocation19 + $0x24c] sm:$0xf]  ;;  %v8724_v50 = vor.u32 %v10178_v58, %v8721_v38  ;;  %v10343_v11 = vld [vmem:[#allocation19 + $0x56c] sm:$0xf0] }
 0x40e   : > { %6261 = vmatpush.bf16.msrb.mxu2 %v9364_v10  ;;  %6234 = vmatpush.bf16.msrb.mxu0 %v8820_v8  ;;  %v8977_v32 = vld [vmem:[#allocation19 + $0x268] sm:$0xf0]  ;;  %v9175_v10 = vld [vmem:[#allocation19 + $0x3d0] sm:$0xf]  ;;  %v8920_v8 = vor.u32 %v10231_v49, %v8919_v9 }
 0x40f   : > { %v10306_v45 = vld [vmem:[#allocation19 + $0x44c] sm:$0xf]  ;;  %v8980_v52 = vor.u32 %v10242_v41, %v8977_v32  ;;  %v9623_v14 = vld [vmem:[#allocation19 + $0x750] sm:$0xf] }
 0x410   : > { %6275 = vmatpush.bf16.msrb.mxu3 %v9620_v1  ;;  %6248 = vmatpush.bf16.msrb.mxu1 %v9076_v16  ;;  %v9233_v37 = vld [vmem:[#allocation19 + $0x468] sm:$0xf0]  ;;  %v10359_v1 = vld [vmem:[#allocation19 + $0x5ec] sm:$0xf0]  ;;  %v9176_v16 = vor.u32 %v10295_v19, %v9175_v10 }
 0x411   : > { %v10370_v44 = vld [vmem:[#allocation19 + $0x64c] sm:$0xf]  ;;  %v9236_v0 = vor.u32 %v10306_v45, %v9233_v37  ;;  %v10407_v36 = vld [vmem:[#allocation19 + $0x76c] sm:$0xf0] }
 0x412   : > { %6262 = vmatpush.bf16.msrb.mxu2 %v9332_v17  ;;  %6235 = vmatpush.bf16.msrb.mxu0 %v8788_v21  ;;  %v9489_v54 = vld [vmem:[#allocation19 + $0x668] sm:$0xf0]  ;;  %v9432_v17 = vor.u32 %v10359_v1, %v9431_v26  ;;  %v8888_v21 = vor.u32 %v10223_v22, %v8887_v20  ;;  %v8823_v58 = vld [vmem:[#allocation19 + $0x110] sm:$0xf] }
 0x413   : > { %v10170_v43 = vld [vmem:[#allocation19 + $0xc] sm:$0xf]  ;;  %v9492_v59 = vor.u32 %v10370_v44, %v9489_v54  ;;  %v10207_v38 = vld [vmem:[#allocation19 + $0x12c] sm:$0xf0] }
 0x414   : > { %6276 = vmatpush.bf16.msrb.mxu3 %v9588_v12  ;;  %6249 = vmatpush.bf16.msrb.mxu1 %v9044_v25  ;;  %v8689_v47 = vld [vmem:[#allocation19 + $0x28] sm:$0xf0]  ;;  %v9688_v12 = vor.u32 %v10423_v7, %v9687_v15  ;;  %v9144_v25 = vor.u32 %v10287_v23, %v9143_v31  ;;  %v9079_v41 = vld [vmem:[#allocation19 + $0x310] sm:$0xf] }
 0x415   : > { %v10234_v46 = vld [vmem:[#allocation19 + $0x20c] sm:$0xf]  ;;  %v8692_v62 = vor.u32 %v10170_v43, %v8689_v47  ;;  %v10271_v32 = vld [vmem:[#allocation19 + $0x32c] sm:$0xf0] }
 0x416   : > { %6263 = vmatpush.bf16.msrb.mxu2 %v9300_v30  ;;  %6236 = vmatpush.bf16.msrb.mxu0 %v8756_v33  ;;  %v8945_v53 = vld [vmem:[#allocation19 + $0x228] sm:$0xf0]  ;;  %v9400_v30 = vor.u32 %v10351_v13, %v9399_v57  ;;  %v8856_v33 = vor.u32 %v10215_v28, %v8855_v27  ;;  %v9335_v45 = vld [vmem:[#allocation19 + $0x510] sm:$0xf]  ;;  %v9080_v43 = vor.u32 %v10271_v32, %v9079_v41  ;;  %v10355_v41 = vld [vmem:[#allocation19 + $0x5d4] sm:$0xf] }
 0x417   : > { %v10298_v55 = vld [vmem:[#allocation19 + $0x40c] sm:$0xf]  ;;  %v8948_v2 = vor.u32 %v10234_v46, %v8945_v53  ;;  %v10335_v37 = vld [vmem:[#allocation19 + $0x52c] sm:$0xf0] }
 0x418   : > { %6277 = vmatpush.bf16.msrb.mxu3 %v9556_v29  ;;  %6250 = vmatpush.bf16.msrb.mxu1 %v9012_v34  ;;  %v9201_v60 = vld [vmem:[#allocation19 + $0x428] sm:$0xf0]  ;;  %v9656_v29 = vor.u32 %v10415_v4, %v9655_v56  ;;  %v9112_v34 = vor.u32 %v10279_v18, %v9111_v24  ;;  %v9591_v44 = vld [vmem:[#allocation19 + $0x710] sm:$0xf]  ;;  %v9336_v47 = vor.u32 %v10335_v37, %v9335_v45  ;;  %v10419_v37 = vld [vmem:[#allocation19 + $0x7d4] sm:$0xf] }
 0x419   : > { %v10362_v61 = vld [vmem:[#allocation19 + $0x60c] sm:$0xf]  ;;  %v9204_v3 = vor.u32 %v10298_v55, %v9201_v60  ;;  %v10399_v54 = vld [vmem:[#allocation19 + $0x72c] sm:$0xf0] }
 0x41a   : > { %6264 = vmatpush.bf16.msrb.mxu2 %v9268_v35  ;;  %v9457_v63 = vld [vmem:[#allocation19 + $0x628] sm:$0xf0]  ;;  %6237 = vmatpush.bf16.msrb.mxu0 %v8724_v50  ;;  %v9368_v35 = vor.u32 %v10343_v11, %v9367_v39  ;;  %v8824_v50 = vor.u32 %v10207_v38, %v8823_v58  ;;  %v9047_v46 = vld [vmem:[#allocation19 + $0x2d0] sm:$0xf]  ;;  %v9592_v53 = vor.u32 %v10399_v54, %v9591_v44  ;;  %v9177_v38 = vld [vmem:[#allocation19 + $0x3f0] sm:$0xf0] }
 0x41b   : > { %v9460_v5 = vor.u32 %v10362_v61, %v9457_v63  ;;  %v10263_v55 = vld [vmem:[#allocation19 + $0x2ec] sm:$0xf0]  ;;  %v9689_v44 = vld [vmem:[#allocation19 + $0x7f0] sm:$0xf0] }
 0x41c   : > { %6278 = vmatpush.bf16.msrb.mxu3 %v9524_v42  ;;  %6251 = vmatpush.bf16.msrb.mxu1 %v8980_v52  ;;  %v9624_v42 = vor.u32 %v10407_v36, %v9623_v14  ;;  %v8791_v52 = vld [vmem:[#allocation19 + $0xd0] sm:$0xf]  ;;  %v9048_v49 = vor.u32 %v10263_v55, %v9047_v46  ;;  %v10283_v46 = vld [vmem:[#allocation19 + $0x394] sm:$0xf] }
 0x41d   : > { %v10327_v60 = vld [vmem:[#allocation19 + $0x4ec] sm:$0xf0]  ;;  %v9145_v55 = vld [vmem:[#allocation19 + $0x3b0] sm:$0xf0] }
 0x41e   : > { %6265 = vmatpush.bf16.msrb.mxu2 %v9236_v0  ;;  %6238 = vmatpush.bf16.msrb.mxu0 %v8692_v62  ;;  %v10199_v0 = vld [vmem:[#allocation19 + $0xec] sm:$0xf0] }
 0x41f   : > { %v9559_v61 = vld [vmem:[#allocation19 + $0x6d0] sm:$0xf]  ;;  %v8792_v9 = vor.u32 %v10199_v0, %v8791_v52  ;;  %v10219_v52 = vld [vmem:[#allocation19 + $0x194] sm:$0xf] }
 0x420   : > { %6279 = vmatpush.bf16.msrb.mxu3 %v9492_v59  ;;  %6252 = vmatpush.bf16.msrb.mxu1 %v8948_v2  ;;  %v9303_v59 = vld [vmem:[#allocation19 + $0x4d0] sm:$0xf]  ;;  %v8889_v0 = vld [vmem:[#allocation19 + $0x1b0] sm:$0xf0] }
 0x421   : > { %6239 = vmatmul.bf16.vlgmr.msrb.gmra.mxu0 %v11493_v51  ;;  %v10391_v63 = vld [vmem:[#allocation19 + $0x6ec] sm:$0xf0]  ;;  %v9304_v10 = vor.u32 %v10327_v60, %v9303_v59  ;;  %v10347_v59 = vld [vmem:[#allocation19 + $0x594] sm:$0xf] }
 0x422   : > { %6266 = vmatpush.bf16.msrb.mxu2 %v9204_v3  ;;  %6287 = vmatpush.bf16.msra.mxu0 %v8920_v8  ;;  %v8759_v62 = vld [vmem:[#allocation19 + $0x90] sm:$0xf]  ;;  %v9560_v1 = vor.u32 %v10391_v63, %v9559_v61  ;;  %v9401_v60 = vld [vmem:[#allocation19 + $0x5b0] sm:$0xf0] }
 0x423   : > { %6253 = vmatmul.bf16.vlgmr.msrb.gmra.mxu1 %v11499_v6  ;;  %v10191_v19 = vld [vmem:[#allocation19 + $0xac] sm:$0xf0]  ;;  %v10411_v61 = vld [vmem:[#allocation19 + $0x794] sm:$0xf] }
 0x424   : > { %6280 = vmatpush.bf16.msrb.mxu3 %v9460_v5  ;;  %6301 = vmatpush.bf16.msra.mxu1 %v9176_v16  ;;  %v9015_v26 = vld [vmem:[#allocation19 + $0x290] sm:$0xf]  ;;  %v8760_v8 = vor.u32 %v10191_v19, %v8759_v62  ;;  %v9657_v63 = vld [vmem:[#allocation19 + $0x7b0] sm:$0xf0] }
 0x425   : > { %6267 = vmatmul.bf16.vlgmr.msrb.gmra.mxu2 %v11491_v40  ;;  %v10255_v2 = vld [vmem:[#allocation19 + $0x2ac] sm:$0xf0]  ;;  %v10211_v62 = vld [vmem:[#allocation19 + $0x154] sm:$0xf] }
 0x426   : > { %6315 = vmatpush.bf16.msra.mxu2 %v9432_v17  ;;  %6288 = vmatpush.bf16.msra.mxu0 %v8888_v21  ;;  %v9271_v3 = vld [vmem:[#allocation19 + $0x490] sm:$0xf]  ;;  %v9016_v16 = vor.u32 %v10255_v2, %v9015_v26  ;;  %v8857_v19 = vld [vmem:[#allocation19 + $0x170] sm:$0xf0] }
 0x427   : > { %6281 = vmatmul.bf16.vlgmr.msrb.gmra.mxu3 %v11496_v48  ;;  %v10319_v15 = vld [vmem:[#allocation19 + $0x4ac] sm:$0xf0]  ;;  %v10275_v26 = vld [vmem:[#allocation19 + $0x354] sm:$0xf] }
 0x428   : > { %6329 = vmatpush.bf16.msra.mxu3 %v9688_v12  ;;  %6302 = vmatpush.bf16.msra.mxu1 %v9144_v25  ;;  %v9527_v7 = vld [vmem:[#allocation19 + $0x690] sm:$0xf]  ;;  %v9272_v17 = vor.u32 %v10319_v15, %v9271_v3  ;;  %v9113_v2 = vld [vmem:[#allocation19 + $0x370] sm:$0xf0] }
 0x429   : > { %v10383_v5 = vld [vmem:[#allocation19 + $0x6ac] sm:$0xf0]  ;;  %v10339_v3 = vld [vmem:[#allocation19 + $0x554] sm:$0xf] }
 0x42a   : > { %6316 = vmatpush.bf16.msra.mxu2 %v9400_v30  ;;  %6289 = vmatpush.bf16.msra.mxu0 %v8856_v33  ;;  %v8727_v20 = vld [vmem:[#allocation19 + $0x50] sm:$0xf]  ;;  %v9528_v12 = vor.u32 %v10383_v5, %v9527_v7  ;;  %v10227_v33 = vld [vmem:[#allocation19 + $0x1d4] sm:$0xf] }
 0x42b   : > { %v10183_v22 = vld [vmem:[#allocation19 + $0x6c] sm:$0xf0]  ;;  %v9369_v15 = vld [vmem:[#allocation19 + $0x570] sm:$0xf0] }
 0x42c   : > { %6330 = vmatpush.bf16.msra.mxu3 %v9656_v29  ;;  %6303 = vmatpush.bf16.msra.mxu1 %v9112_v34  ;;  %v8983_v31 = vld [vmem:[#allocation19 + $0x250] sm:$0xf]  ;;  %v8728_v21 = vor.u32 %v10183_v22, %v8727_v20  ;;  %v8921_v34 = vld [vmem:[#allocation19 + $0x1f0] sm:$0xf0] }
 0x42d   : > { %v10247_v23 = vld [vmem:[#allocation19 + $0x26c] sm:$0xf0]  ;;  %v10403_v7 = vld [vmem:[#allocation19 + $0x754] sm:$0xf] }
 0x42e   : > { %6317 = vmatpush.bf16.msra.mxu2 %v9368_v35  ;;  %6290 = vmatpush.bf16.msra.mxu0 %v8824_v50  ;;  %v9239_v57 = vld [vmem:[#allocation19 + $0x450] sm:$0xf]  ;;  %v8984_v27 = vor.u32 %v10247_v23, %v8983_v31  ;;  %v10291_v35 = vld [vmem:[#allocation19 + $0x3d4] sm:$0xf]  ;;  %v8924_v50 = vor.u32 %v10227_v33, %v8921_v34 }
 0x42f   : > { %v10311_v13 = vld [vmem:[#allocation19 + $0x46c] sm:$0xf0]  ;;  %v9625_v5 = vld [vmem:[#allocation19 + $0x770] sm:$0xf0] }
 0x430   : > { %6331 = vmatpush.bf16.msra.mxu3 %v9624_v42  ;;  %6304 = vmatpush.bf16.msra.mxu1 %v9080_v43  ;;  %v9495_v56 = vld [vmem:[#allocation19 + $0x650] sm:$0xf]  ;;  %v9240_v28 = vor.u32 %v10311_v13, %v9239_v57  ;;  %v9433_v42 = vld [vmem:[#allocation19 + $0x5f0] sm:$0xf0]  ;;  %v9180_v43 = vor.u32 %v10291_v35, %v9177_v38 }
 0x431   : > { %v10375_v4 = vld [vmem:[#allocation19 + $0x66c] sm:$0xf0]  ;;  %v10203_v20 = vld [vmem:[#allocation19 + $0x114] sm:$0xf] }
 0x432   : > { %6318 = vmatpush.bf16.msra.mxu2 %v9336_v47  ;;  %6291 = vmatpush.bf16.msra.mxu0 %v8792_v9  ;;  %v8695_v25 = vld [vmem:[#allocation19 + $0x10] sm:$0xf]  ;;  %v9496_v39 = vor.u32 %v10375_v4, %v9495_v56  ;;  %v9436_v47 = vor.u32 %v10355_v41, %v9433_v42  ;;  %v8892_v9 = vor.u32 %v10219_v52, %v8889_v0  ;;  %v8825_v22 = vld [vmem:[#allocation19 + $0x130] sm:$0xf0] }
 0x433   : > { %v10175_v30 = vld [vmem:[#allocation19 + $0x2c] sm:$0xf0]  ;;  %v10267_v31 = vld [vmem:[#allocation19 + $0x314] sm:$0xf] }
 0x434   : > { %6332 = vmatpush.bf16.msra.mxu3 %v9592_v53  ;;  %6305 = vmatpush.bf16.msra.mxu1 %v9048_v49  ;;  %v8951_v24 = vld [vmem:[#allocation19 + $0x210] sm:$0xf]  ;;  %v8696_v58 = vor.u32 %v10175_v30, %v8695_v25  ;;  %v9692_v53 = vor.u32 %v10419_v37, %v9689_v44  ;;  %v9148_v49 = vor.u32 %v10283_v46, %v9145_v55  ;;  %v9081_v23 = vld [vmem:[#allocation19 + $0x330] sm:$0xf0] }
 0x435   : > { %v10239_v29 = vld [vmem:[#allocation19 + $0x22c] sm:$0xf0]  ;;  %v10331_v57 = vld [vmem:[#allocation19 + $0x514] sm:$0xf]  ;;  %v9084_v30 = vor.u32 %v10267_v31, %v9081_v23 }
 0x436   : > { %6319 = vmatpush.bf16.msra.mxu2 %v9304_v10  ;;  %6292 = vmatpush.bf16.msra.mxu0 %v8760_v8  ;;  %v9207_v18 = vld [vmem:[#allocation19 + $0x410] sm:$0xf]  ;;  %v8952_v32 = vor.u32 %v10239_v29, %v8951_v24  ;;  %v9404_v10 = vor.u32 %v10347_v59, %v9401_v60  ;;  %v8860_v8 = vor.u32 %v10211_v62, %v8857_v19  ;;  %v9337_v13 = vld [vmem:[#allocation19 + $0x530] sm:$0xf0]  ;;  %v11522_v29 = vld [vmem:[%s11590_s9] sm:$0xff] }
 0x437   : > { %v10303_v11 = vld [vmem:[#allocation19 + $0x42c] sm:$0xf0]  ;;  %v10395_v56 = vld [vmem:[#allocation19 + $0x714] sm:$0xf]  ;;  %v4747_v35 = vperm.slane %v11522_v29, 0 }
 0x438   : > { %6333 = vmatpush.bf16.msra.mxu3 %v9560_v1  ;;  %6306 = vmatpush.bf16.msra.mxu1 %v9016_v16  ;;  %v9463_v14 = vld [vmem:[#allocation19 + $0x610] sm:$0xf]  ;;  %v9208_v45 = vor.u32 %v10303_v11, %v9207_v18  ;;  %v9660_v1 = vor.u32 %v10411_v61, %v9657_v63  ;;  %v9116_v16 = vor.u32 %v10275_v26, %v9113_v2  ;;  %v9593_v4 = vld [vmem:[#allocation19 + $0x730] sm:$0xf0] }
 0x439   : > { %v10367_v36 = vld [vmem:[#allocation19 + $0x62c] sm:$0xf0]  ;;  %v10195_v25 = vld [vmem:[#allocation19 + $0xd4] sm:$0xf]  ;;  %v9596_v18 = vor.u32 %v10395_v56, %v9593_v4  ;;  %v10232_v56 = vld [vmem:[#allocation19 + $0x1f4] sm:$0xf0] }
 0x43a   : > { %6320 = vmatpush.bf16.msra.mxu2 %v9272_v17  ;;  %6293 = vmatpush.bf16.msra.mxu0 %v8728_v21  ;;  %v9464_v54 = vor.u32 %v10367_v36, %v9463_v14  ;;  %v9372_v17 = vor.u32 %v10339_v3, %v9369_v15  ;;  %v8828_v21 = vor.u32 %v10203_v20, %v8825_v22  ;;  %v10259_v24 = vld [vmem:[#allocation19 + $0x2d4] sm:$0xf]  ;;  %v9183_v4 = vld [vmem:[#allocation19 + $0x3d8] sm:$0xf] }
 0x43b   : > { %v10323_v11 = vld [vmem:[#allocation19 + $0x4d4] sm:$0xf] }
 0x43c   : > { %6334 = vmatpush.bf16.msra.mxu3 %v9528_v12  ;;  %6307 = vmatpush.bf16.msra.mxu1 %v8984_v27  ;;  %v9628_v12 = vor.u32 %v10403_v7, %v9625_v5  ;;  %v9340_v27 = vor.u32 %v10331_v57, %v9337_v13  ;;  %v9305_v14 = vld [vmem:[#allocation19 + $0x4f0] sm:$0xf0]  ;;  %v8927_v13 = vld [vmem:[#allocation19 + $0x1d8] sm:$0xf] }
 0x43d   : > { %v10387_v36 = vld [vmem:[#allocation19 + $0x6d4] sm:$0xf]  ;;  %v9308_v38 = vor.u32 %v10323_v11, %v9305_v14  ;;  %v9695_v14 = vld [vmem:[#allocation19 + $0x7d8] sm:$0xf] }
 0x43e   : > { %6321 = vmatpush.bf16.msra.mxu2 %v9240_v28  ;;  %6294 = vmatpush.bf16.msra.mxu0 %v8696_v58  ;;  %v8793_v28 = vld [vmem:[#allocation19 + $0xf0] sm:$0xf0] }
 0x43f   : > { %v9561_v33 = vld [vmem:[#allocation19 + $0x6f0] sm:$0xf0]  ;;  %v8796_v34 = vor.u32 %v10195_v25, %v8793_v28  ;;  %v9439_v28 = vld [vmem:[#allocation19 + $0x5d8] sm:$0xf] }
 0x440   : > { %6335 = vmatpush.bf16.msra.mxu3 %v9496_v39  ;;  %6308 = vmatpush.bf16.msra.mxu1 %v8952_v32  ;;  %v9049_v39 = vld [vmem:[#allocation19 + $0x2f0] sm:$0xf0] }
 0x441   : > { %6295 = vmatmul.bf16.vlgmr.msra.gmra.mxu0 %v11493_v51  ;;  %v9052_v58 = vor.u32 %v10259_v24, %v9049_v39  ;;  %v10187_v41 = vld [vmem:[#allocation19 + $0x94] sm:$0xf]  ;;  %v10360_v24 = vld [vmem:[#allocation19 + $0x5f4] sm:$0xf0] }
 0x442   : > { %6322 = vmatpush.bf16.msra.mxu2 %v9208_v45  ;;  %6343 = vmatpush.bf16.msrb.mxu0 %v8924_v50  ;;  %v8761_v42 = vld [vmem:[#allocation19 + $0xb0] sm:$0xf0]  ;;  %v9564_v45 = vor.u32 %v10387_v36, %v9561_v33  ;;  %v6086_v61 = vpop.f32.mrf.mxu1  ;;  %v10424_v36 = vld [vmem:[#allocation19 + $0x7f4] sm:$0xf0] }
 0x443   : > { %6309 = vmatmul.bf16.vlgmr.msra.gmra.mxu1 %v11499_v6  ;;  %v10251_v32 = vld [vmem:[#allocation19 + $0x294] sm:$0xf]  ;;  %v8764_v52 = vor.u32 %v10187_v41, %v8761_v42 }
 0x444   : > { %6336 = vmatpush.bf16.msra.mxu3 %v9464_v54  ;;  %6357 = vmatpush.bf16.msrb.mxu1 %v9180_v43  ;;  %v9017_v37 = vld [vmem:[#allocation19 + $0x2b0] sm:$0xf0] }
 0x445   : > { %6323 = vmatmul.bf16.vlgmr.msra.gmra.mxu2 %v11491_v40  ;;  %v10315_v44 = vld [vmem:[#allocation19 + $0x494] sm:$0xf]  ;;  %v9020_v46 = vor.u32 %v10251_v32, %v9017_v37  ;;  %v9440_v32 = vor.u32 %v10360_v24, %v9439_v28  ;;  %v10224_v37 = vld [vmem:[#allocation19 + $0x1b4] sm:$0xf0] }
 0x446   : > { %6371 = vmatpush.bf16.msrb.mxu2 %v9436_v47  ;;  %6344 = vmatpush.bf16.msrb.mxu0 %v8892_v9  ;;  %v9273_v54 = vld [vmem:[#allocation19 + $0x4b0] sm:$0xf0]  ;;  %v6072_v47 = vpop.f32.mrf.mxu0 }
 0x447   : > { %6337 = vmatmul.bf16.vlgmr.msra.gmra.mxu3 %v11496_v48  ;;  %v10379_v50 = vld [vmem:[#allocation19 + $0x694] sm:$0xf]  ;;  %v6073_v0 = vadd.f32 %v6072_v47, %v4747_v35 }
 0x448   : > { %6385 = vmatpush.bf16.msrb.mxu3 %v9692_v53  ;;  %6358 = vmatpush.bf16.msrb.mxu1 %v9148_v49  ;;  %v9529_v43 = vld [vmem:[#allocation19 + $0x6b0] sm:$0xf0]  ;;  %v9276_v53 = vor.u32 %v10315_v44, %v9273_v54  ;;  %v6100_v19 = vpop.f32.mrf.mxu2  ;;  %v9151_v44 = vld [vmem:[#allocation19 + $0x398] sm:$0xf] }
 0x449   : > { %v10179_v55 = vld [vmem:[#allocation19 + $0x54] sm:$0xf]  ;;  %v9532_v63 = vor.u32 %v10379_v50, %v9529_v43  ;;  %v6087_v62 = vadd.f32 %v6086_v61, %v6073_v0  ;;  %v10288_v54 = vld [vmem:[#allocation19 + $0x3b4] sm:$0xf0] }
 0x44a   : > { %6372 = vmatpush.bf16.msrb.mxu2 %v9404_v10  ;;  %6345 = vmatpush.bf16.msrb.mxu0 %v8860_v8  ;;  %v8729_v59 = vld [vmem:[#allocation19 + $0x70] sm:$0xf0]  ;;  %v6114_v57 = vpop.f32.mrf.mxu3  ;;  %v6088_v33 = vpop.f32.mrf.mxu1  ;;  %v9407_v50 = vld [vmem:[#allocation19 + $0x598] sm:$0xf] }
 0x44b   : > { %v10243_v60 = vld [vmem:[#allocation19 + $0x254] sm:$0xf]  ;;  %v8732_v2 = vor.u32 %v10179_v55, %v8729_v59  ;;  %v6101_v7 = vadd.f32 %v6100_v19, %v6087_v62  ;;  %v10352_v43 = vld [vmem:[#allocation19 + $0x5b4] sm:$0xf0]  ;;  %v9152_v55 = vor.u32 %v10288_v54, %v9151_v44 }
 0x44c   : > { %6386 = vmatpush.bf16.msrb.mxu3 %v9660_v1  ;;  %6359 = vmatpush.bf16.msrb.mxu1 %v9116_v16  ;;  %v8985_v9 = vld [vmem:[#allocation19 + $0x270] sm:$0xf0]  ;;  %v10416_v0 = vld [vmem:[#allocation19 + $0x7b4] sm:$0xf0]  ;;  %v9408_v59 = vor.u32 %v10352_v43, %v9407_v50 }
 0x44d   : > { %v10307_v49 = vld [vmem:[#allocation19 + $0x454] sm:$0xf]  ;;  %v8988_v5 = vor.u32 %v10243_v60, %v8985_v9  ;;  %v8863_v60 = vld [vmem:[#allocation19 + $0x158] sm:$0xf] }
 0x44e   : > { %6373 = vmatpush.bf16.msrb.mxu2 %v9372_v17  ;;  %6346 = vmatpush.bf16.msrb.mxu0 %v8828_v21  ;;  %v9241_v10 = vld [vmem:[#allocation19 + $0x470] sm:$0xf0]  ;;  %v6115_v21 = vadd.f32 %v6114_v57, %v6101_v7  ;;  %v6074_v25 = vpop.f32.mrf.mxu0  ;;  %v10216_v61 = vld [vmem:[#allocation19 + $0x174] sm:$0xf0] }
 0x44f   : > { %v10371_v26 = vld [vmem:[#allocation19 + $0x654] sm:$0xf]  ;;  %v9244_v8 = vor.u32 %v10307_v49, %v9241_v10  ;;  %v10280_v10 = vld [vmem:[#allocation19 + $0x374] sm:$0xf0] }
 0x450   : > { %6387 = vmatpush.bf16.msrb.mxu3 %v9628_v12  ;;  %6360 = vmatpush.bf16.msrb.mxu1 %v9084_v30  ;;  %v9497_v1 = vld [vmem:[#allocation19 + $0x670] sm:$0xf0]  ;;  %6511 = vst [vmem:[#allocation20] sm:$0xff] %v6115_v21  ;;  %v6102_v41 = vpop.f32.mrf.mxu2  ;;  %v9375_v62 = vld [vmem:[#allocation19 + $0x558] sm:$0xf] }
 0x451   : > { %v10171_v3 = vld [vmem:[#allocation19 + $0x14] sm:$0xf]  ;;  %v9500_v22 = vor.u32 %v10371_v26, %v9497_v1  ;;  %v10344_v19 = vld [vmem:[#allocation19 + $0x574] sm:$0xf0] }
 0x452   : > { %6374 = vmatpush.bf16.msrb.mxu2 %v9340_v27  ;;  %6347 = vmatpush.bf16.msrb.mxu0 %v8796_v34  ;;  %v8697_v15 = vld [vmem:[#allocation19 + $0x30] sm:$0xf0]  ;;  %v10296_v27 = vld [vmem:[#allocation19 + $0x3f4] sm:$0xf0]  ;;  %v9376_v7 = vor.u32 %v10344_v19, %v9375_v62 }
 0x453   : > { %v10235_v16 = vld [vmem:[#allocation19 + $0x214] sm:$0xf]  ;;  %v8700_v30 = vor.u32 %v10171_v3, %v8697_v15  ;;  %v9184_v42 = vor.u32 %v10296_v27, %v9183_v4  ;;  %v9631_v26 = vld [vmem:[#allocation19 + $0x758] sm:$0xf] }
 0x454   : > { %6388 = vmatpush.bf16.msrb.mxu3 %v9596_v18  ;;  %6361 = vmatpush.bf16.msrb.mxu1 %v9052_v58  ;;  %v8953_v17 = vld [vmem:[#allocation19 + $0x230] sm:$0xf0]  ;;  %v6075_v18 = vadd.f32 %v6074_v25, %v4747_v35  ;;  %v8928_v58 = vor.u32 %v10232_v56, %v8927_v13  ;;  %v9696_v35 = vor.u32 %v10424_v36, %v9695_v14  ;;  %v10408_v1 = vld [vmem:[#allocation19 + $0x774] sm:$0xf0] }
 0x455   : > { %v10299_v20 = vld [vmem:[#allocation19 + $0x414] sm:$0xf]  ;;  %v8956_v39 = vor.u32 %v10235_v16, %v8953_v17  ;;  %v8831_v3 = vld [vmem:[#allocation19 + $0x118] sm:$0xf]  ;;  %v4748_v16 = vperm.slane %v11522_v29, 1  ;;  %v9632_v17 = vor.u32 %v10408_v1, %v9631_v26 }
 0x456   : > { %6375 = vmatpush.bf16.msrb.mxu2 %v9308_v38  ;;  %6348 = vmatpush.bf16.msrb.mxu0 %v8764_v52  ;;  %v9209_v31 = vld [vmem:[#allocation19 + $0x430] sm:$0xf0]  ;;  %v6089_v38 = vadd.f32 %v6088_v33, %v6075_v18  ;;  %v9663_v52 = vld [vmem:[#allocation19 + $0x798] sm:$0xf] }
 0x457   : > { %v10363_v12 = vld [vmem:[#allocation19 + $0x614] sm:$0xf]  ;;  %v9212_v11 = vor.u32 %v10299_v20, %v9209_v31  ;;  %v9664_v49 = vor.u32 %v10416_v0, %v9663_v52  ;;  %v10272_v20 = vld [vmem:[#allocation19 + $0x334] sm:$0xf0] }
 0x458   : > { %6389 = vmatpush.bf16.msrb.mxu3 %v9564_v45  ;;  %6362 = vmatpush.bf16.msrb.mxu1 %v9020_v46  ;;  %v9465_v23 = vld [vmem:[#allocation19 + $0x630] sm:$0xf0]  ;;  %v8895_v45 = vld [vmem:[#allocation19 + $0x198] sm:$0xf]  ;;  %v6103_v47 = vadd.f32 %v6102_v41, %v6089_v38 }
 0x459   : > { %v9468_v34 = vor.u32 %v10363_v12, %v9465_v23  ;;  %v8896_v46 = vor.u32 %v10224_v37, %v8895_v45  ;;  %v10336_v31 = vld [vmem:[#allocation19 + $0x534] sm:$0xf0] }
 0x45a   : > { %6376 = vmatpush.bf16.msrb.mxu2 %v9276_v53  ;;  %6349 = vmatpush.bf16.msrb.mxu0 %v8732_v2  ;;  %v6116_v53 = vpop.f32.mrf.mxu3  ;;  %v8864_v2 = vor.u32 %v10216_v61, %v8863_v60  ;;  %v9599_v12 = vld [vmem:[#allocation19 + $0x718] sm:$0xf] }
 0x45b   : > { %v6117_v9 = vadd.f32 %v6116_v53, %v6103_v47  ;;  %v10400_v23 = vld [vmem:[#allocation19 + $0x734] sm:$0xf0] }
 0x45c   : > { %6390 = vmatpush.bf16.msrb.mxu3 %v9532_v63  ;;  %6363 = vmatpush.bf16.msrb.mxu1 %v8988_v5  ;;  %v9119_v63 = vld [vmem:[#allocation19 + $0x358] sm:$0xf]  ;;  %v9600_v24 = vor.u32 %v10400_v23, %v9599_v12 }
 0x45d   : > { %6519 = vst [vmem:[#allocation20 + $0x40] sm:$0xff] %v6117_v9  ;;  %v9120_v15 = vor.u32 %v10280_v10, %v9119_v63  ;;  %v10208_v5 = vld [vmem:[#allocation19 + $0x134] sm:$0xf0] }
 0x45e   : > { %6377 = vmatpush.bf16.msrb.mxu2 %v9244_v8  ;;  %6350 = vmatpush.bf16.msrb.mxu0 %v8700_v30  ;;  %v9087_v8 = vld [vmem:[#allocation19 + $0x318] sm:$0xf]  ;;  %v8832_v57 = vor.u32 %v10208_v5, %v8831_v3  ;;  %v6128_v13 = vpop.f32.mrf.mxu0 }
 0x45f   : > { %v9088_v56 = vor.u32 %v10272_v20, %v9087_v8  ;;  %v8799_v21 = vld [vmem:[#allocation19 + $0xd8] sm:$0xf]  ;;  %v6129_v27 = vadd.f32 %v6128_v13, %v4748_v16 }
 0x460   : > { %6391 = vmatpush.bf16.msrb.mxu3 %v9500_v22  ;;  %6364 = vmatpush.bf16.msrb.mxu1 %v8956_v39  ;;  %v9343_v22 = vld [vmem:[#allocation19 + $0x518] sm:$0xf]  ;;  %v6142_v28 = vpop.f32.mrf.mxu1 }
 0x461   : > { %6351 = vmatmul.bf16.vlgmr.msrb.gmra.mxu0 %v11493_v51  ;;  %v9344_v4 = vor.u32 %v10336_v31, %v9343_v22  ;;  %v10200_v25 = vld [vmem:[#allocation19 + $0xf4] sm:$0xf0]  ;;  %v6143_v33 = vadd.f32 %v6142_v28, %v6129_v27  ;;  %v9185_v28 = vld [vmem:[#allocation19 + $0x3f8] sm:$0xf0] }
 0x462   : > { %6378 = vmatpush.bf16.msrb.mxu2 %v9212_v11  ;;  %6399 = vmatpush.bf16.msra.mxu0 %v8928_v58  ;;  %v9055_v30 = vld [vmem:[#allocation19 + $0x2d8] sm:$0xf] }
 0x463   : > { %6365 = vmatmul.bf16.vlgmr.msrb.gmra.mxu1 %v11499_v6  ;;  %v10264_v18 = vld [vmem:[#allocation19 + $0x2f4] sm:$0xf0] }
 0x464   : > { %6392 = vmatpush.bf16.msrb.mxu3 %v9468_v34  ;;  %6413 = vmatpush.bf16.msra.mxu1 %v9184_v42  ;;  %v9311_v39 = vld [vmem:[#allocation19 + $0x4d8] sm:$0xf]  ;;  %v8800_v34 = vor.u32 %v10200_v25, %v8799_v21  ;;  %v9056_v58 = vor.u32 %v10264_v18, %v9055_v30  ;;  %v10228_v21 = vld [vmem:[#allocation19 + $0x1dc] sm:$0xf] }
 0x465   : > { %6379 = vmatmul.bf16.vlgmr.msrb.gmra.mxu2 %v11491_v40  ;;  %v10328_v11 = vld [vmem:[#allocation19 + $0x4f4] sm:$0xf0]  ;;  %v8929_v25 = vld [vmem:[#allocation19 + $0x1f8] sm:$0xf0] }
 0x466   : > { %6427 = vmatpush.bf16.msra.mxu2 %v9440_v32  ;;  %6400 = vmatpush.bf16.msra.mxu0 %v8896_v46  ;;  %v9567_v14 = vld [vmem:[#allocation19 + $0x6d8] sm:$0xf]  ;;  %v9312_v38 = vor.u32 %v10328_v11, %v9311_v39  ;;  %v10292_v30 = vld [vmem:[#allocation19 + $0x3dc] sm:$0xf] }
 0x467   : > { %6393 = vmatmul.bf16.vlgmr.msrb.gmra.mxu3 %v11496_v48  ;;  %v10392_v36 = vld [vmem:[#allocation19 + $0x6f4] sm:$0xf0]  ;;  %v9441_v18 = vld [vmem:[#allocation19 + $0x5f8] sm:$0xf0] }
 0x468   : > { %6441 = vmatpush.bf16.msra.mxu3 %v9696_v35  ;;  %6414 = vmatpush.bf16.msra.mxu1 %v9152_v55  ;;  %v8767_v41 = vld [vmem:[#allocation19 + $0x98] sm:$0xf]  ;;  %v6156_v45 = vpop.f32.mrf.mxu2  ;;  %v9568_v37 = vor.u32 %v10392_v36, %v9567_v14  ;;  %v6130_v55 = vpop.f32.mrf.mxu0  ;;  %v10420_v36 = vld [vmem:[#allocation19 + $0x7dc] sm:$0xf] }
 0x469   : > { %v10192_v42 = vld [vmem:[#allocation19 + $0xb4] sm:$0xf0]  ;;  %v6157_v50 = vadd.f32 %v6156_v45, %v6143_v33  ;;  %v6144_v10 = vpop.f32.mrf.mxu1  ;;  %v9697_v33 = vld [vmem:[#allocation19 + $0x7f8] sm:$0xf0] }
 0x46a   : > { %6428 = vmatpush.bf16.msra.mxu2 %v9408_v59  ;;  %6401 = vmatpush.bf16.msra.mxu0 %v8864_v2  ;;  %v9023_v32 = vld [vmem:[#allocation19 + $0x298] sm:$0xf]  ;;  %v6170_v43 = vpop.f32.mrf.mxu3  ;;  %v8768_v0 = vor.u32 %v10192_v42, %v8767_v41  ;;  %v10220_v42 = vld [vmem:[#allocation19 + $0x19c] sm:$0xf] }
 0x46b   : > { %v10256_v44 = vld [vmem:[#allocation19 + $0x2b4] sm:$0xf0]  ;;  %v6171_v53 = vadd.f32 %v6170_v43, %v6157_v50  ;;  %v10284_v45 = vld [vmem:[#allocation19 + $0x39c] sm:$0xf] }
 0x46c   : > { %6442 = vmatpush.bf16.msra.mxu3 %v9664_v49  ;;  %6415 = vmatpush.bf16.msra.mxu1 %v9120_v15  ;;  %v9279_v35 = vld [vmem:[#allocation19 + $0x498] sm:$0xf]  ;;  %v9024_v59 = vor.u32 %v10256_v44, %v9023_v32  ;;  %v6131_v49 = vadd.f32 %v6130_v55, %v4748_v16  ;;  %v8897_v32 = vld [vmem:[#allocation19 + $0x1b8] sm:$0xf0] }
 0x46d   : > { %v10320_v54 = vld [vmem:[#allocation19 + $0x4b4] sm:$0xf0]  ;;  %6512 = vst [vmem:[#allocation20 + $0x8] sm:$0xff] %v6171_v53  ;;  %v9153_v44 = vld [vmem:[#allocation19 + $0x3b8] sm:$0xf0] }
 0x46e   : > { %6429 = vmatpush.bf16.msra.mxu2 %v9376_v7  ;;  %6402 = vmatpush.bf16.msra.mxu0 %v8832_v57  ;;  %v9535_v47 = vld [vmem:[#allocation19 + $0x698] sm:$0xf]  ;;  %v9280_v60 = vor.u32 %v10320_v54, %v9279_v35  ;;  %v6145_v3 = vadd.f32 %v6144_v10, %v6131_v49  ;;  %v10348_v35 = vld [vmem:[#allocation19 + $0x59c] sm:$0xf] }
 0x46f   : > { %v10384_v52 = vld [vmem:[#allocation19 + $0x6b4] sm:$0xf0]  ;;  %v9409_v54 = vld [vmem:[#allocation19 + $0x5b8] sm:$0xf0] }
 0x470   : > { %6443 = vmatpush.bf16.msra.mxu3 %v9632_v17  ;;  %6416 = vmatpush.bf16.msra.mxu1 %v9088_v56  ;;  %v8735_v46 = vld [vmem:[#allocation19 + $0x58] sm:$0xf]  ;;  %v9536_v62 = vor.u32 %v10384_v52, %v9535_v47  ;;  %v6158_v31 = vpop.f32.mrf.mxu2  ;;  %v10412_v50 = vld [vmem:[#allocation19 + $0x79c] sm:$0xf]  ;;  %v8900_v47 = vor.u32 %v10220_v42, %v8897_v32  ;;  %v9156_v52 = vor.u32 %v10284_v45, %v9153_v44 }
 0x471   : > { %v10184_v61 = vld [vmem:[#allocation19 + $0x74] sm:$0xf0]  ;;  %v6159_v56 = vadd.f32 %v6158_v31, %v6145_v3  ;;  %v9665_v43 = vld [vmem:[#allocation19 + $0x7b8] sm:$0xf0]  ;;  %v4749_v3 = vperm.slane %v11522_v29, 2 }
 0x472   : > { %6430 = vmatpush.bf16.msra.mxu2 %v9344_v4  ;;  %6403 = vmatpush.bf16.msra.mxu0 %v8800_v34  ;;  %v8991_v63 = vld [vmem:[#allocation19 + $0x258] sm:$0xf]  ;;  %v8736_v15 = vor.u32 %v10184_v61, %v8735_v46  ;;  %v6172_v4 = vpop.f32.mrf.mxu3  ;;  %v10212_v46 = vld [vmem:[#allocation19 + $0x15c] sm:$0xf] }
 0x473   : > { %v10248_v9 = vld [vmem:[#allocation19 + $0x274] sm:$0xf0]  ;;  %v6173_v39 = vadd.f32 %v6172_v4, %v6159_v56  ;;  %v8865_v53 = vld [vmem:[#allocation19 + $0x178] sm:$0xf0] }
 0x474   : > { %6444 = vmatpush.bf16.msra.mxu3 %v9600_v24  ;;  %6417 = vmatpush.bf16.msra.mxu1 %v9056_v58  ;;  %v9247_v19 = vld [vmem:[#allocation19 + $0x458] sm:$0xf]  ;;  %v8992_v8 = vor.u32 %v10248_v9, %v8991_v63  ;;  %v10356_v24 = vld [vmem:[#allocation19 + $0x5dc] sm:$0xf]  ;;  %v8932_v58 = vor.u32 %v10228_v21, %v8929_v25  ;;  %v8868_v10 = vor.u32 %v10212_v46, %v8865_v53 }
 0x475   : > { %v10312_v26 = vld [vmem:[#allocation19 + $0x474] sm:$0xf0]  ;;  %6520 = vst [vmem:[#allocation20 + $0x48] sm:$0xff] %v6173_v39  ;;  %v9444_v41 = vor.u32 %v10356_v24, %v9441_v18  ;;  %v10276_v55 = vld [vmem:[#allocation19 + $0x35c] sm:$0xf] }
 0x476   : > { %6431 = vmatpush.bf16.msra.mxu2 %v9312_v38  ;;  %v9503_v1 = vld [vmem:[#allocation19 + $0x658] sm:$0xf]  ;;  %6404 = vmatpush.bf16.msra.mxu0 %v8768_v0  ;;  %v9248_v17 = vor.u32 %v10312_v26, %v9247_v19  ;;  %v9188_v38 = vor.u32 %v10292_v30, %v9185_v28  ;;  %v9412_v0 = vor.u32 %v10348_v35, %v9409_v54  ;;  %v10340_v61 = vld [vmem:[#allocation19 + $0x55c] sm:$0xf] }
 0x477   : > { %v10376_v2 = vld [vmem:[#allocation19 + $0x674] sm:$0xf0]  ;;  %v9377_v63 = vld [vmem:[#allocation19 + $0x578] sm:$0xf0] }
 0x478   : > { %6445 = vmatpush.bf16.msra.mxu3 %v9568_v37  ;;  %v8703_v7 = vld [vmem:[#allocation19 + $0x18] sm:$0xf]  ;;  %6418 = vmatpush.bf16.msra.mxu1 %v9024_v59  ;;  %v9504_v12 = vor.u32 %v10376_v2, %v9503_v1  ;;  %v9700_v37 = vor.u32 %v10420_v36, %v9697_v33  ;;  %v9668_v59 = vor.u32 %v10412_v50, %v9665_v43  ;;  %v10404_v9 = vld [vmem:[#allocation19 + $0x75c] sm:$0xf] }
 0x479   : > { %v10176_v5 = vld [vmem:[#allocation19 + $0x34] sm:$0xf0]  ;;  %v9633_v49 = vld [vmem:[#allocation19 + $0x778] sm:$0xf0]  ;;  %v9380_v26 = vor.u32 %v10340_v61, %v9377_v63 }
 0x47a   : > { %6432 = vmatpush.bf16.msra.mxu2 %v9280_v60  ;;  %v8959_v20 = vld [vmem:[#allocation19 + $0x218] sm:$0xf]  ;;  %6405 = vmatpush.bf16.msra.mxu0 %v8736_v15  ;;  %v8704_v27 = vor.u32 %v10176_v5, %v8703_v7  ;;  %v9121_v60 = vld [vmem:[#allocation19 + $0x378] sm:$0xf0]  ;;  %v9636_v15 = vor.u32 %v10404_v9, %v9633_v49 }
 0x47b   : > { %v10240_v22 = vld [vmem:[#allocation19 + $0x234] sm:$0xf0]  ;;  %v9124_v19 = vor.u32 %v10276_v55, %v9121_v60  ;;  %v8833_v1 = vld [vmem:[#allocation19 + $0x138] sm:$0xf0] }
 0x47c   : > { %v9215_v16 = vld [vmem:[#allocation19 + $0x418] sm:$0xf]  ;;  %6446 = vmatpush.bf16.msra.mxu3 %v9536_v62  ;;  %6419 = vmatpush.bf16.msra.mxu1 %v8992_v8  ;;  %v8960_v11 = vor.u32 %v10240_v22, %v8959_v20  ;;  %v10204_v62 = vld [vmem:[#allocation19 + $0x11c] sm:$0xf] }
 0x47d   : > { %v10304_v23 = vld [vmem:[#allocation19 + $0x434] sm:$0xf0]  ;;  %v10268_v2 = vld [vmem:[#allocation19 + $0x31c] sm:$0xf]  ;;  %v8836_v22 = vor.u32 %v10204_v62, %v8833_v1 }
 0x47e   : > { %v9471_v57 = vld [vmem:[#allocation19 + $0x618] sm:$0xf]  ;;  %6433 = vmatpush.bf16.msra.mxu2 %v9248_v17  ;;  %v9216_v14 = vor.u32 %v10304_v23, %v9215_v16  ;;  %6406 = vmatpush.bf16.msra.mxu0 %v8704_v27  ;;  %v9089_v7 = vld [vmem:[#allocation19 + $0x338] sm:$0xf0]  ;;  %v6184_v16 = vpop.f32.mrf.mxu0 }
 0x47f   : > { %v10368_v13 = vld [vmem:[#allocation19 + $0x634] sm:$0xf0]  ;;  %v10332_v5 = vld [vmem:[#allocation19 + $0x51c] sm:$0xf]  ;;  %v9092_v31 = vor.u32 %v10268_v2, %v9089_v7  ;;  %v6185_v56 = vadd.f32 %v6184_v16, %v4749_v3 }
 0x480   : > { %6447 = vmatpush.bf16.msra.mxu3 %v9504_v12  ;;  %v9472_v34 = vor.u32 %v10368_v13, %v9471_v57  ;;  %6420 = vmatpush.bf16.msra.mxu1 %v8960_v11  ;;  %v9345_v8 = vld [vmem:[#allocation19 + $0x538] sm:$0xf0]  ;;  %v6198_v4 = vpop.f32.mrf.mxu1 }
 0x481   : > { %6407 = vmatmul.bf16.vlgmr.msra.gmra.mxu0 %v11493_v51  ;;  %v10396_v17 = vld [vmem:[#allocation19 + $0x71c] sm:$0xf]  ;;  %v9348_v12 = vor.u32 %v10332_v5, %v9345_v8  ;;  %v6199_v18 = vadd.f32 %v6198_v4, %v6185_v56 }
 0x482   : > { %6434 = vmatpush.bf16.msra.mxu2 %v9216_v14  ;;  %6455 = vmatpush.bf16.msrb.mxu0 %v8932_v58  ;;  %v9601_v20 = vld [vmem:[#allocation19 + $0x738] sm:$0xf0] }
 0x483   : > { %6421 = vmatmul.bf16.vlgmr.msra.gmra.mxu1 %v11499_v6  ;;  %v10196_v23 = vld [vmem:[#allocation19 + $0xdc] sm:$0xf]  ;;  %v9604_v21 = vor.u32 %v10396_v17, %v9601_v20 }
 0x484   : > { %6448 = vmatpush.bf16.msra.mxu3 %v9472_v34  ;;  %6469 = vmatpush.bf16.msrb.mxu1 %v9188_v38  ;;  %v8801_v57 = vld [vmem:[#allocation19 + $0xf8] sm:$0xf0] }
 0x485   : > { %6435 = vmatmul.bf16.vlgmr.msra.gmra.mxu2 %v11491_v40  ;;  %v10260_v13 = vld [vmem:[#allocation19 + $0x2dc] sm:$0xf]  ;;  %v8804_v39 = vor.u32 %v10196_v23, %v8801_v57 }
 0x486   : > { %6483 = vmatpush.bf16.msrb.mxu2 %v9444_v41  ;;  %6456 = vmatpush.bf16.msrb.mxu0 %v8900_v47  ;;  %v9057_v25 = vld [vmem:[#allocation19 + $0x2f8] sm:$0xf0]  ;;  %v6186_v47 = vpop.f32.mrf.mxu0 }
 0x487   : > { %6449 = vmatmul.bf16.vlgmr.msra.gmra.mxu3 %v11496_v48  ;;  %v10324_v30 = vld [vmem:[#allocation19 + $0x4dc] sm:$0xf]  ;;  %v9060_v11 = vor.u32 %v10260_v13, %v9057_v25 }
 0x488   : > { %6497 = vmatpush.bf16.msrb.mxu3 %v9700_v37  ;;  %6470 = vmatpush.bf16.msrb.mxu1 %v9156_v52  ;;  %v9313_v27 = vld [vmem:[#allocation19 + $0x4f8] sm:$0xf0]  ;;  %v6212_v58 = vpop.f32.mrf.mxu2  ;;  %v6200_v60 = vpop.f32.mrf.mxu1 }
 0x489   : > { %v10388_v28 = vld [vmem:[#allocation19 + $0x6dc] sm:$0xf]  ;;  %v9316_v14 = vor.u32 %v10324_v30, %v9313_v27  ;;  %v6213_v45 = vadd.f32 %v6212_v58, %v6199_v18 }
 0x48a   : > { %6484 = vmatpush.bf16.msrb.mxu2 %v9412_v0  ;;  %6457 = vmatpush.bf16.msrb.mxu0 %v8868_v10  ;;  %v9569_v24 = vld [vmem:[#allocation19 + $0x6f8] sm:$0xf0]  ;;  %v6226_v37 = vpop.f32.mrf.mxu3 }
 0x48b   : > { %v10188_v36 = vld [vmem:[#allocation19 + $0x9c] sm:$0xf]  ;;  %v9572_v38 = vor.u32 %v10388_v28, %v9569_v24  ;;  %v6227_v43 = vadd.f32 %v6226_v37, %v6213_v45 }
 0x48c   : > { %6498 = vmatpush.bf16.msrb.mxu3 %v9668_v59  ;;  %6471 = vmatpush.bf16.msrb.mxu1 %v9124_v19  ;;  %v8769_v33 = vld [vmem:[#allocation19 + $0xb8] sm:$0xf0]  ;;  %v6187_v59 = vadd.f32 %v6186_v47, %v4749_v3 }
 0x48d   : > { %v10252_v34 = vld [vmem:[#allocation19 + $0x29c] sm:$0xf]  ;;  %v8772_v54 = vor.u32 %v10188_v36, %v8769_v33  ;;  %6513 = vst [vmem:[#allocation20 + $0x10] sm:$0xff] %v6227_v43 }
 0x48e   : > { %6485 = vmatpush.bf16.msrb.mxu2 %v9380_v26  ;;  %6458 = vmatpush.bf16.msrb.mxu0 %v8836_v22  ;;  %v9025_v41 = vld [vmem:[#allocation19 + $0x2b8] sm:$0xf0]  ;;  %v6201_v62 = vadd.f32 %v6200_v60, %v6187_v59 }
 0x48f   : > { %v10316_v42 = vld [vmem:[#allocation19 + $0x49c] sm:$0xf]  ;;  %v9028_v52 = vor.u32 %v10252_v34, %v9025_v41 }
 0x490   : > { %6499 = vmatpush.bf16.msrb.mxu3 %v9636_v15  ;;  %6472 = vmatpush.bf16.msrb.mxu1 %v9092_v31  ;;  %v9281_v32 = vld [vmem:[#allocation19 + $0x4b8] sm:$0xf0]  ;;  %v6214_v5 = vpop.f32.mrf.mxu2 }
 0x491   : > { %v10380_v44 = vld [vmem:[#allocation19 + $0x69c] sm:$0xf]  ;;  %v9284_v0 = vor.u32 %v10316_v42, %v9281_v32  ;;  %v6215_v22 = vadd.f32 %v6214_v5, %v6201_v62 }
 0x492   : > { %6486 = vmatpush.bf16.msrb.mxu2 %v9348_v12  ;;  %v9537_v35 = vld [vmem:[#allocation19 + $0x6b8] sm:$0xf0]  ;;  %6459 = vmatpush.bf16.msrb.mxu0 %v8804_v39  ;;  %v6228_v16 = vpop.f32.mrf.mxu3 }
 0x493   : > { %v10180_v50 = vld [vmem:[#allocation19 + $0x5c] sm:$0xf]  ;;  %v9540_v61 = vor.u32 %v10380_v44, %v9537_v35  ;;  %v6229_v57 = vadd.f32 %v6228_v16, %v6215_v22 }
 0x494   : > { %6500 = vmatpush.bf16.msrb.mxu3 %v9604_v21  ;;  %6473 = vmatpush.bf16.msrb.mxu1 %v9060_v11  ;;  %v8737_v46 = vld [vmem:[#allocation19 + $0x78] sm:$0xf0]  ;;  %v4750_v21 = vperm.slane %v11522_v29, 3 }
 0x495   : > { %v10244_v53 = vld [vmem:[#allocation19 + $0x25c] sm:$0xf]  ;;  %v8740_v19 = vor.u32 %v10180_v50, %v8737_v46  ;;  %6521 = vst [vmem:[#allocation20 + $0x50] sm:$0xff] %v6229_v57 }
 0x496   : > { %6487 = vmatpush.bf16.msrb.mxu2 %v9316_v14  ;;  %v8993_v55 = vld [vmem:[#allocation19 + $0x278] sm:$0xf0]  ;;  %6460 = vmatpush.bf16.msrb.mxu0 %v8772_v54 }
 0x497   : > { %v10308_v63 = vld [vmem:[#allocation19 + $0x45c] sm:$0xf]  ;;  %v8996_v26 = vor.u32 %v10244_v53, %v8993_v55  ;;  %v4752_v55 = vperm.slane %v11522_v29, 5 }
 0x498   : > { %6501 = vmatpush.bf16.msrb.mxu3 %v9572_v38  ;;  %v9249_v9 = vld [vmem:[#allocation19 + $0x478] sm:$0xf0]  ;;  %6474 = vmatpush.bf16.msrb.mxu1 %v9028_v52 }
 0x499   : > { %v10372_v49 = vld [vmem:[#allocation19 + $0x65c] sm:$0xf]  ;;  %v9252_v1 = vor.u32 %v10308_v63, %v9249_v9 }
 0x49a   : > { %v9505_v10 = vld [vmem:[#allocation19 + $0x678] sm:$0xf0]  ;;  %6488 = vmatpush.bf16.msrb.mxu2 %v9284_v0  ;;  %6461 = vmatpush.bf16.msrb.mxu0 %v8740_v19 }
 0x49b   : > { %v10172_v2 = vld [vmem:[#allocation19 + $0x1c] sm:$0xf]  ;;  %v9508_v3 = vor.u32 %v10372_v49, %v9505_v10 }
 0x49c   : > { %v8705_v15 = vld [vmem:[#allocation19 + $0x38] sm:$0xf0]  ;;  %6502 = vmatpush.bf16.msrb.mxu3 %v9540_v61  ;;  %6475 = vmatpush.bf16.msrb.mxu1 %v8996_v26 }
 0x49d   : > { %v10236_v7 = vld [vmem:[#allocation19 + $0x21c] sm:$0xf]  ;;  %v8708_v23 = vor.u32 %v10172_v2, %v8705_v15 }
 0x49e   : > { %v8961_v8 = vld [vmem:[#allocation19 + $0x238] sm:$0xf0]  ;;  %6489 = vmatpush.bf16.msrb.mxu2 %v9252_v1  ;;  %v6240_v25 = vpop.f32.mrf.mxu0 }
 0x49f   : > { %v10300_v17 = vld [vmem:[#allocation19 + $0x41c] sm:$0xf]  ;;  %v8964_v13 = vor.u32 %v10236_v7, %v8961_v8  ;;  %6462 = vmatpush.bf16.msrb.mxu0 %v8708_v23  ;;  %v6241_v30 = vadd.f32 %v6240_v25, %v4750_v21  ;;  %v4753_v8 = vperm.slane %v11522_v29, 6 }
 0x4a0   : > { %v9217_v20 = vld [vmem:[#allocation19 + $0x438] sm:$0xf0]  ;;  %6503 = vmatpush.bf16.msrb.mxu3 %v9508_v3  ;;  %v6254_v27 = vpop.f32.mrf.mxu1 }
 0x4a1   : > { %v10364_v31 = vld [vmem:[#allocation19 + $0x61c] sm:$0xf]  ;;  %v9220_v56 = vor.u32 %v10300_v17, %v9217_v20  ;;  %6476 = vmatpush.bf16.msrb.mxu1 %v8964_v13  ;;  %v6255_v28 = vadd.f32 %v6254_v27, %v6241_v30 }
 0x4a2   : > { %v9473_v12 = vld [vmem:[#allocation19 + $0x638] sm:$0xf0]  ;;  %6463 = vmatmul.bf16.vlgmr.msrb.gmra.mxu0 %v11493_v51 }
 0x4a3   : > { %v9476_v4 = vor.u32 %v10364_v31, %v9473_v12  ;;  %6490 = vmatpush.bf16.msrb.mxu2 %v9220_v56 }
 0x4a4   : > { %6477 = vmatmul.bf16.vlgmr.msrb.gmra.mxu1 %v11499_v6 }
 0x4a5   : > { %6504 = vmatpush.bf16.msrb.mxu3 %v9476_v4 }
 0x4a6   : > { %6491 = vmatmul.bf16.vlgmr.msrb.gmra.mxu2 %v11491_v40  ;;  %v6242_v14 = vpop.f32.mrf.mxu0 }
 0x4a7   : > { %v6243_v36 = vadd.f32 %v6242_v14, %v4750_v21 }
 0x4a8   : > { %6505 = vmatmul.bf16.vlgmr.msrb.gmra.mxu3 %v11496_v48  ;;  %v6268_v24 = vpop.f32.mrf.mxu2  ;;  %v6256_v33 = vpop.f32.mrf.mxu1  ;;  %v4751_v48 = vperm.slane %v11522_v29, 4 }
 0x4a9   : > { %v6269_v18 = vadd.f32 %v6268_v24, %v6255_v28  ;;  %v6257_v51 = vadd.f32 %v6256_v33, %v6243_v36  ;;  %v4754_v24 = vperm.slane %v11522_v29, 7 }
 0x4aa   : > { %v6282_v39 = vpop.f32.mrf.mxu3 }
 0x4ab   : > { %v6283_v11 = vadd.f32 %v6282_v39, %v6269_v18 }
 0x4ad   : > { %6514 = vst [vmem:[#allocation20 + $0x18] sm:$0xff] %v6283_v11 }
 0x4b0   : > { %v6270_v6 = vpop.f32.mrf.mxu2 }
 0x4b1   : > { %v6271_v34 = vadd.f32 %v6270_v6, %v6257_v51 }
 0x4b2   : > { %v6284_v40 = vpop.f32.mrf.mxu3 }
 0x4b3   : > { %v6285_v58 = vadd.f32 %v6284_v40, %v6271_v34 }
 0x4b5   : > { %6522 = vst [vmem:[#allocation20 + $0x58] sm:$0xff] %v6285_v58 }
 0x4be   : > { %v6296_v38 = vpop.f32.mrf.mxu0 }
 0x4bf   : > { %v6297_v41 = vadd.f32 %v6296_v38, %v4751_v48 }
 0x4c0   : > { %v6310_v42 = vpop.f32.mrf.mxu1 }
 0x4c1   : > { %v6311_v32 = vadd.f32 %v6310_v42, %v6297_v41 }
 0x4c6   : > { %v6298_v54 = vpop.f32.mrf.mxu0 }
 0x4c7   : > { %v6299_v50 = vadd.f32 %v6298_v54, %v4751_v48 }
 0x4c8   : > { %v6324_v45 = vpop.f32.mrf.mxu2  ;;  %v6312_v43 = vpop.f32.mrf.mxu1 }
 0x4c9   : > { %v6325_v37 = vadd.f32 %v6324_v45, %v6311_v32  ;;  %v6313_v47 = vadd.f32 %v6312_v43, %v6299_v50 }
 0x4ca   : > { %v6338_v44 = vpop.f32.mrf.mxu3 }
 0x4cb   : > { %v6339_v35 = vadd.f32 %v6338_v44, %v6325_v37 }
 0x4cd   : > { %6515 = vst [vmem:[#allocation20 + $0x20] sm:$0xff] %v6339_v35 }
 0x4d0   : > { %v6326_v52 = vpop.f32.mrf.mxu2 }
 0x4d1   : > { %v6327_v0 = vadd.f32 %v6326_v52, %v6313_v47 }
 0x4d2   : > { %v6340_v46 = vpop.f32.mrf.mxu3 }
 0x4d3   : > { %v6341_v53 = vadd.f32 %v6340_v46, %v6327_v0 }
 0x4d5   : > { %6523 = vst [vmem:[#allocation20 + $0x60] sm:$0xff] %v6341_v53 }
 0x4de   : > { %v6352_v59 = vpop.f32.mrf.mxu0 }
 0x4df   : > { %v6353_v60 = vadd.f32 %v6352_v59, %v4752_v55 }
 0x4e0   : > { %v6366_v61 = vpop.f32.mrf.mxu1 }
 0x4e1   : > { %v6367_v63 = vadd.f32 %v6366_v61, %v6353_v60 }
 0x4e6   : > { %v6354_v19 = vpop.f32.mrf.mxu0 }
 0x4e7   : > { %v6355_v26 = vadd.f32 %v6354_v19, %v4752_v55 }
 0x4e8   : > { %v6380_v9 = vpop.f32.mrf.mxu2  ;;  %v6368_v1 = vpop.f32.mrf.mxu1 }
 0x4e9   : > { %v6381_v49 = vadd.f32 %v6380_v9, %v6367_v63  ;;  %v6369_v2 = vadd.f32 %v6368_v1, %v6355_v26 }
 0x4ea   : > { %v6394_v10 = vpop.f32.mrf.mxu3 }
 0x4eb   : > { %v6395_v62 = vadd.f32 %v6394_v10, %v6381_v49 }
 0x4ed   : > { %6516 = vst [vmem:[#allocation20 + $0x28] sm:$0xff] %v6395_v62 }
 0x4f0   : > { %v6382_v15 = vpop.f32.mrf.mxu2 }
 0x4f1   : > { %v6383_v7 = vadd.f32 %v6382_v15, %v6369_v2 }
 0x4f2   : > { %v6396_v5 = vpop.f32.mrf.mxu3 }
 0x4f3   : > { %v6397_v3 = vadd.f32 %v6396_v5, %v6383_v7 }
 0x4f5   : > { %6524 = vst [vmem:[#allocation20 + $0x68] sm:$0xff] %v6397_v3 }
 0x4fe   : > { %v6408_v17 = vpop.f32.mrf.mxu0 }
 0x4ff   : > { %v6409_v20 = vadd.f32 %v6408_v17, %v4753_v8 }
 0x500   : > { %v6422_v22 = vpop.f32.mrf.mxu1 }
 0x501   : > { %v6423_v16 = vadd.f32 %v6422_v22, %v6409_v20 }
 0x506   : > { %v6410_v13 = vpop.f32.mrf.mxu0 }
 0x507   : > { %v6411_v56 = vadd.f32 %v6410_v13, %v4753_v8 }
 0x508   : > { %v6436_v31 = vpop.f32.mrf.mxu2  ;;  %v6424_v4 = vpop.f32.mrf.mxu1 }
 0x509   : > { %v6437_v12 = vadd.f32 %v6436_v31, %v6423_v16  ;;  %v6425_v21 = vadd.f32 %v6424_v4, %v6411_v56 }
 0x50a   : > { %v6450_v23 = vpop.f32.mrf.mxu3 }
 0x50b   : > { %v6451_v57 = vadd.f32 %v6450_v23, %v6437_v12 }
 0x50d   : > { %6517 = vst [vmem:[#allocation20 + $0x30] sm:$0xff] %v6451_v57 }
 0x510   : > { %v6438_v25 = vpop.f32.mrf.mxu2 }
 0x511   : > { %v6439_v30 = vadd.f32 %v6438_v25, %v6425_v21 }
 0x512   : > { %v6452_v27 = vpop.f32.mrf.mxu3 }
 0x513   : > { %v6453_v28 = vadd.f32 %v6452_v27, %v6439_v30 }
 0x515   : > { %6525 = vst [vmem:[#allocation20 + $0x70] sm:$0xff] %v6453_v28 }
 0x51f   : > { %v6464_v18 = vpop.f32.mrf.mxu0 }
 0x520   : > { %v6465_v39 = vadd.f32 %v6464_v18, %v4754_v24 }
 0x521   : > { %v6478_v11 = vpop.f32.mrf.mxu1 }
 0x522   : > { %v6479_v14 = vadd.f32 %v6478_v11, %v6465_v39 }
 0x527   : > { %v6466_v6 = vpop.f32.mrf.mxu0 }
 0x528   : > { %v6467_v40 = vadd.f32 %v6466_v6, %v4754_v24 }
 0x529   : > { %v6492_v36 = vpop.f32.mrf.mxu2  ;;  %v6480_v58 = vpop.f32.mrf.mxu1 }
 0x52a   : > { %v6493_v33 = vadd.f32 %v6492_v36, %v6479_v14  ;;  %v6481_v48 = vadd.f32 %v6480_v58, %v6467_v40 }
 0x52b   : > { %v6506_v51 = vpop.f32.mrf.mxu3 }
 0x52c   : > { %v6507_v34 = vadd.f32 %v6506_v51, %v6493_v33 }
 0x52e   : > { %6518 = vst [vmem:[#allocation20 + $0x38] sm:$0xff] %v6507_v34 }
 0x531   : > { %v6494_v38 = vpop.f32.mrf.mxu2 }
 0x532   : > { %v6495_v41 = vadd.f32 %v6494_v38, %v6481_v48 }
 0x533   : > { %v6508_v42 = vpop.f32.mrf.mxu3 }
 0x534   : > { %v6509_v32 = vadd.f32 %v6508_v42, %v6495_v41 }
 0x536   : > { %6526 = vst [vmem:[#allocation20 + $0x78] sm:$0xff] %v6509_v32 }
 0x537 PF: > { %p10525_p13 = scmp.eq.s32.totalorder %s11141_s24, 1  ;;  %s11053_s16 = smov [#allocation21]  }
 0x538   : > { %s6562_s25 = sshll.u32 %s11053_s16, 4  ;;  %s6564_s19 = sshll.u32 %s11592_s11, 4  ;;  %s6563_s25 = int_to_ptr.vmem [resolvable:$true] %s6562_s25  ;;  %s6565_s19 = int_to_ptr.hbm [resolvable:$true] %s6564_s19 }
 0x539   : > { %s11054_s20 = smov 256   ;;  %s11055_s5 = smov 16  }
 0x53a   : > { %10464 = dma.vmem_to_hbm [thread:$0]  (%p10525_p13), %s6563_s25, 512, %s6565_s19, [#allocation22], %s11054_s20, %s11054_s20, %s11055_s5  }
 0x53b   : > { %s11056_s26 = smov [#allocation20]   ;;  %s6546_s0 = sshll.u32 %s11591_s10, 4  ;;  %s6547_s0 = int_to_ptr.hbm [resolvable:$true] %s6546_s0 }
 0x53c   : > { %s6544_s13 = sshll.u32 %s11056_s26, 4  ;;  %s11057_s29 = smov 1024   ;;  %s6545_s13 = int_to_ptr.vmem [resolvable:$true] %s6544_s13 }
 0x53d   : > { %s11058_s15 = smov 64   ;;  %s6582_s3 = sshll.u32 %s11593_s12, 4  ;;  %s6583_s3 = int_to_ptr.hbm [resolvable:$true] %s6582_s3 }
 0x53e   : > { %10462 = dma.vmem_to_hbm [thread:$0]  (%p10525_p13), %s6545_s13, 2048, %s6547_s0, [#allocation7], %s11057_s29, %s11057_s29, %s11058_s15  }
 0x53f   : > { %s11059_s4 = smov [#allocation23]  }
 0x540   : > { %s6580_s21 = sshll.u32 %s11059_s4, 4  ;;  %s6581_s21 = int_to_ptr.vmem [resolvable:$true] %s6580_s21 }
 0x541   : > { %10466 = dma.vmem_to_hbm [thread:$0]  (%p10525_p13), %s6581_s21, 512, %s6583_s3, [#allocation22], %s11054_s20, %s11054_s20, %s11055_s5  }
 0x542   : > { %11019 = dma.done.wait (%p10525_p13), [#allocation22], 1024  }
 0x543   : > { %11021 = vsyncadd (%p10525_p13), [#allocation22], 4294966272 }
 0x544 PF: > { %s11624_s27 = sadd.s32 4294967294, %s11036_s23  }
 0x545   : > { %p10531_p0 = scmp.eq.s32.totalorder %s11624_s27, 1 }
 0x547   : > { %p10503_p1 = pnand %p10531_p0, %p6820_p6 }
 0x549   : > { %p10504_p2 = pneg %p10503_p1 }
 0x54b   : > { %11023 = dma.done.wait (%p10504_p2), [#allocation7], 2048  }
 0x54c   : > { %11025 = vsyncadd (%p10504_p2), [#allocation7], 4294965248  ;;  %s36_s23 = sadd.s32 1, %s11036_s23   ;;  %s11625_s16 = sld [smem:[#allocation33_spill]] }
 0x54d   : > { %p33_p3 = scmp.ge.s32.totalorder %s36_s23, 4   ;;  %s11626_s21 = smov %s11032_s22 }
 0x54f   :  { %35 = sbr.rel (!%p33_p3) target bundleno = 17 (0x11), region = 191 }
 0x552   : > { %s11627_s22 = smov %s11625_s16 }
 0x554   :  { %6614 = vsyncpa [#allocation6], 1 }
 0x555   :  { %6616 = vsyncpa [#allocation6 + $0x1], 1 }
 0x556   :  { %6617 = vsyncpa [#allocation9], 1 }
 0x557   :  { %6619 = vsyncpa [#allocation9 + $0x1], 1 }
 0x558   :  { %6620 = vsyncpa [#allocation12], 1 }
 0x559   :  { %6621 = vsyncpa [#allocation15], 1 }
 0x55a   :  { %6622 = vsyncpa [#allocation18], 1 }
 0x55b   :  { %6623 = vsyncpa [#allocation7], 1 }
 0x55c   :  { %6625 = vsyncpa [#allocation7 + $0x1], 1 }
 0x55d   :  { %6626 = vsyncpa [#allocation22], 1 }

</bundles_post_ra>
